<compile_context>
chip_gen: v7x
topology: tpu7x:2x2x1
jax: 0.10.0
libtpu: 0.0.40
codegen_flags: <defaults>
</compile_context>

<pallas_src>
import math
from functools import partial

import jax
import jax.numpy as jnp
from jax.experimental import pallas as pl
from jax.experimental.pallas import tpu as pltpu


# ---------------------------------------------------------------------------
# Mish (matches torch.nn.Mish: softplus with threshold 20, then tanh).
# The exp argument is clamped so the discarded where-branch stays finite.
# ---------------------------------------------------------------------------
def _mish(x):
    sp = jnp.where(x > 20.0, x, jnp.log(1.0 + jnp.exp(jnp.minimum(x, 20.0))))
    return x * jnp.tanh(sp)


# ---------------------------------------------------------------------------
# Fused kernel: one grid step == one batch (all l slices, all heads).
# ---------------------------------------------------------------------------
def _comm_attn_kernel(
    q_ref, kv_ref, te_ref, expand_ref,
    w_ref, bt_ref, bout_ref,
    o_ref,
    *, num_heads, l, t, t_, l_, f, scale, matmul_dtype,
):
    f32 = jnp.float32
    S = t_ * l_
    md = matmul_dtype

    def mm(a, b):                     # plain matmul, f32 accumulation
        return jnp.dot(a.astype(md), b.astype(md), preferred_element_type=f32)

    def mm_t(a, b):                   # a @ b.T without materializing b.T
        return jax.lax.dot_general(a.astype(md), b.astype(md),
                                    (((1,), (1,)), ((), ())),
                                    preferred_element_type=f32)

    q_rows = q_ref[0].astype(f32)     # (l*t, f)   row = li*t  + ti
    kv_rows = kv_ref[0].astype(f32)   # (l*S, f)   row = ni*S + ti*l_ + li_
    te = te_ref[0].astype(f32)        # (t, f)
    expand = expand_ref[...]          # (S, t_) constant 0/1 broadcast matrix

    # Hoisted: Mish once per batch step, and only on the unique time rows.
    mish_te = _mish(te)               # (t, f)
    mish_te_kv = mish_te[:t_]         # (t_, f)

    acc = [None] * l                  # per-l-slice output accumulators (t, f)
    for h in range(num_heads):        # H = 3 : fully unrolled, LLO-visible
        wq = w_ref[0, h, :, :]
        wk = w_ref[1, h, :, :]
        wv = w_ref[2, h, :, :]
        wqt = w_ref[3, h, :, :]
        wkt = w_ref[4, h, :, :]
        wvt = w_ref[5, h, :, :]
        wout = w_ref[6, h, :, :]

        # Time-MLP on unique rows only; broadcast over l_ via an MXU matmul.
        q_time = mm(mish_te, wqt) + bt_ref[0, h, :, :]      # (t,  f)
        k_time = mm(mish_te_kv, wkt) + bt_ref[1, h, :, :]   # (t_, f)
        v_time = mm(mish_te_kv, wvt) + bt_ref[2, h, :, :]   # (t_, f)
        k_time_b = mm(expand, k_time)                       # (S,  f)
        v_time_b = mm(expand, v_time)                       # (S,  f)

        # Head-major projections over all l slices at once (big sublane fill).
        q_proj = mm(q_rows, wq)        # (l*t, f)
        k_proj = mm(kv_rows, wk)       # (l*S, f)
        v_proj = mm(kv_rows, wv)       # (l*S, f)

        for li in range(l):            # static sublane slices (offsets % 8 == 0)
            qh = (q_proj[li * t:(li + 1) * t] + q_time) * scale   # (t, f)
            kh = k_proj[li * S:(li + 1) * S] + k_time_b           # (S, f)
            vh = v_proj[li * S:(li + 1) * S] + v_time_b           # (S, f)

            s = mm_t(qh, kh)                                      # (t, S)
            s = s - jnp.max(s, axis=-1, keepdims=True)
            p = jnp.exp(s)
            p = p / jnp.sum(p, axis=-1, keepdims=True)            # exact divide
            contrib = mm(mm(p, vh), wout)                         # (t, f)
            acc[li] = contrib if acc[li] is None else acc[li] + contrib

    bout = bout_ref[...]               # (1, f)
    for li in range(l):
        o_ref[0, li * t:(li + 1) * t, :] = (acc[li] + bout).astype(o_ref.dtype)


# ---------------------------------------------------------------------------
# CommAttention forward
# ---------------------------------------------------------------------------
def comm_attention_forward(params, q_x, kv_x, t_embed, num_heads,
                           matmul_dtype=jnp.float32):
    """q_x: (b,t,l,f)  kv_x: (b,n,t_,l_,f)  t_embed: (b,t,1,f)  -> (b,t,l,f)."""
    b, t, l, f = q_x.shape
    b_, n, t_, l_, f_ = kv_x.shape
    assert n == l and b_ == b and f_ == f
    assert t_ <= t, (t_, t)
    H = num_heads
    S = t_ * l_

    # Tiny wrapper-side layout prep (contiguous reshapes / one small transpose).
    q_slab = q_x.transpose(0, 2, 1, 3).reshape(b, l * t, f)     # (b, l*t, f)
    kv_slab = kv_x.reshape(b, l * S, f)                         # (b, l*S, f)
    te = t_embed.reshape(b, t, f)                               # (b, t, f)

    # Head-major weight packing: (f, H*f) -> (H, f, f); to_out (H*f, f) -> (H, f, f).
    def head_major(w):
        return w.reshape(f, H, f).transpose(1, 0, 2)

    w_all = jnp.stack([
        head_major(params["Wq"]), head_major(params["Wk"]), head_major(params["Wv"]),
        head_major(params["Wqt"]), head_major(params["Wkt"]), head_major(params["Wvt"]),
        params["Wout"].reshape(H, f, f),
    ])                                                          # (7, H, f, f)
    b_time = jnp.stack(
        [params["bqt"], params["bkt"], params["bvt"]]).reshape(3, H, 1, f)
    bout = params["bout"].reshape(1, f)

    # Constant 0/1 matrix that broadcasts the (t_, f) kv-time rows across l_
    # (expand[ti*l_ + li_, ti] = 1); applied in-kernel as an MXU matmul.
    expand = jnp.repeat(jnp.eye(t_, dtype=jnp.float32), l_, axis=0)   # (S, t_)

    # Advisory cost estimate so XLA schedules the fused custom call sensibly.
    flops = b * H * (
        2 * t * f * f                  # q time-MLP
        + 2 * (2 * t_ * f * f)         # k,v time-MLP
        + 2 * (2 * S * t_ * f)         # expand broadcasts (k,v)
        + 2 * (l * t) * f * f          # q projection
        + 2 * (2 * (l * S) * f * f)    # k,v projections
        + l * (2 * t * S * f + 2 * t * S * f + 2 * t * f * f)
    )
    transcendentals = b * (3 * t * f + H * l * t * S)
    bytes_accessed = 4 * (q_slab.size + kv_slab.size + te.size + expand.size
                          + w_all.size + b_time.size + bout.size + b * l * t * f)

    out = pl.pallas_call(
        partial(_comm_attn_kernel, num_heads=H, l=l, t=t, t_=t_, l_=l_, f=f,
                scale=1.0 / math.sqrt(f), matmul_dtype=matmul_dtype),
        out_shape=jax.ShapeDtypeStruct((b, l * t, f), q_x.dtype),
        grid=(b,),
        in_specs=[
            pl.BlockSpec((1, l * t, f), lambda i: (i, 0, 0)),          # q rows
            pl.BlockSpec((1, l * S, f), lambda i: (i, 0, 0)),          # kv rows
            pl.BlockSpec((1, t, f), lambda i: (i, 0, 0)),              # t_embed
            pl.BlockSpec((S, t_), lambda i: (0, 0)),                   # expand
            pl.BlockSpec((7, H, f, f), lambda i: (0, 0, 0, 0)),        # weights
            pl.BlockSpec((3, H, 1, f), lambda i: (0, 0, 0, 0)),        # time biases
            pl.BlockSpec((1, f), lambda i: (0, 0)),                    # out bias
        ],
        out_specs=pl.BlockSpec((1, l * t, f), lambda i: (i, 0, 0)),
        compiler_params=pltpu.CompilerParams(
            dimension_semantics=("parallel",)),
        cost_estimate=pl.CostEstimate(
            flops=int(flops),
            transcendentals=int(transcendentals),
            bytes_accessed=int(bytes_accessed),
        ),
    )(q_slab, kv_slab, te, expand, w_all, b_time, bout)

    # (b, l, t, f) -> (b, t, l, f); tiny (2 KB) XLA transpose.
    return out.reshape(b, l, t, f).transpose(0, 2, 1, 3)


# ---------------------------------------------------------------------------
# Pure-JAX reference (for correctness check)
# ---------------------------------------------------------------------------
def comm_attention_reference(params, q_x, kv_x, t_embed, num_heads):
    b, t, l, f = q_x.shape
    _, n, t_, l_, _ = kv_x.shape
    H = num_heads
    hid = H * f

    q_full = q_x @ params["Wq"] + (_mish(t_embed) @ params["Wqt"] + params["bqt"])
    k_full = kv_x @ params["Wk"] + (
        _mish(t_embed[:, :t_]) @ params["Wkt"] + params["bkt"]
    )[:, None]
    v_full = kv_x @ params["Wv"] + (
        _mish(t_embed[:, :t_]) @ params["Wvt"] + params["bvt"]
    )[:, None]

    S = t_ * l_
    q_h = q_full.reshape(b, t, l, H, f).transpose(0, 2, 3, 1, 4).reshape(b * l * H, t, f)
    k_h = k_full.reshape(b, n, S, H, f).transpose(0, 1, 3, 2, 4).reshape(b * n * H, S, f)
    v_h = v_full.reshape(b, n, S, H, f).transpose(0, 1, 3, 2, 4).reshape(b * n * H, S, f)

    scores = jnp.einsum("btd,bsd->bts", q_h, k_h) / math.sqrt(f)
    probs = jax.nn.softmax(scores, axis=-1)
    out = jnp.einsum("bts,bsd->btd", probs, v_h)
    out = out.reshape(b, l, H, t, f).transpose(0, 3, 1, 2, 4).reshape(b, t, l, hid)
    return out @ params["Wout"] + params["bout"]


# ---------------------------------------------------------------------------
if __name__ == "__main__":
    # Small shapes consistent with the module: dim=f=8, num_heads=3.
    b, t, l, f = 2, 8, 4, 8
    n, t_, l_ = l, 8, 6           # n == l required; t_ <= t
    num_heads = 3
    hid = num_heads * f

    key = jax.random.PRNGKey(0)
    ks = jax.random.split(key, 16)

    def w(k, shape):
        return jax.random.normal(k, shape, jnp.float32) * 0.05

    params = {
        "Wq": w(ks[0], (f, hid)),
        "Wk": w(ks[1], (f, hid)),
        "Wv": w(ks[2], (f, hid)),
        "Wqt": w(ks[3], (f, hid)),
        "bqt": w(ks[4], (hid,)),
        "Wkt": w(ks[5], (f, hid)),
        "bkt": w(ks[6], (hid,)),
        "Wvt": w(ks[7], (f, hid)),
        "bvt": w(ks[8], (hid,)),
        "Wout": w(ks[9], (hid, f)),
        "bout": w(ks[10], (f,)),
    }

    q_x = jax.random.normal(ks[11], (b, t, l, f), jnp.float32)
    kv_x = jax.random.normal(ks[12], (b, n, t_, l_, f), jnp.float32)
    t_embed = jax.random.normal(ks[13], (b, t, 1, f), jnp.float32)

    out = comm_attention_forward(params, q_x, kv_x, t_embed, num_heads)
    out = jax.block_until_ready(out)

    ref = comm_attention_reference(params, q_x, kv_x, t_embed, num_heads)
    assert out.shape == (b, t, l, f), out.shape
    max_err = float(jnp.max(jnp.abs(out - ref)))
    assert jnp.allclose(out, ref, atol=2e-3, rtol=2e-3), max_err

    print("KERNEL_OK")
</pallas_src>

<mosaic_0001>
module attributes {stable_mosaic.version = 11 : i64} {
  func.func @_comm_attn_kernel(%arg0: i32, %arg1: memref<1x32x8xf32, #tpu.memory_space<vmem>>, %arg2: memref<1x192x8xf32, #tpu.memory_space<vmem>>, %arg3: memref<1x8x8xf32, #tpu.memory_space<vmem>>, %arg4: memref<48x8xf32, #tpu.memory_space<vmem>>, %arg5: memref<7x3x8x8xf32, #tpu.memory_space<vmem>>, %arg6: memref<3x3x1x8xf32, #tpu.memory_space<vmem>>, %arg7: memref<1x8xf32, #tpu.memory_space<vmem>>, %arg8: memref<1x32x8xf32, #tpu.memory_space<vmem>>) attributes {dimension_semantics = [#tpu.dimension_semantics<parallel>], iteration_bounds = array<i64: 2>, scalar_prefetch = 0 : i64, scratch_operands = 0 : i64, tpu.core_type = #tpu.core_type<tc>, window_params = [{transform_indices = @transform_0, window_bounds = array<i64: 1, 32, 8>}, {transform_indices = @transform_1, window_bounds = array<i64: 1, 192, 8>}, {transform_indices = @transform_2, window_bounds = array<i64: 1, 8, 8>}, {pipeline_mode = #tpu.pipeline_mode<synchronous>, transform_indices = @transform_3, window_bounds = array<i64: 48, 8>}, {pipeline_mode = #tpu.pipeline_mode<synchronous>, transform_indices = @transform_4, window_bounds = array<i64: 7, 3, 8, 8>}, {pipeline_mode = #tpu.pipeline_mode<synchronous>, transform_indices = @transform_5, window_bounds = array<i64: 3, 3, 1, 8>}, {pipeline_mode = #tpu.pipeline_mode<synchronous>, transform_indices = @transform_6, window_bounds = array<i64: 1, 8>}, {transform_indices = @transform_7, window_bounds = array<i64: 1, 32, 8>}]} {
    %c0 = arith.constant 0 : index
    %c0_0 = arith.constant 0 : index
    %c0_1 = arith.constant 0 : index
    %0 = vector.load %arg1[%c0, %c0_0, %c0_1] : memref<1x32x8xf32, #tpu.memory_space<vmem>>, vector<1x32x8xf32>
    %1 = vector.shape_cast %0 : vector<1x32x8xf32> to vector<32x8xf32>
    %c0_2 = arith.constant 0 : index
    %c0_3 = arith.constant 0 : index
    %c0_4 = arith.constant 0 : index
    %2 = vector.load %arg2[%c0_2, %c0_3, %c0_4] : memref<1x192x8xf32, #tpu.memory_space<vmem>>, vector<1x192x8xf32>
    %3 = vector.shape_cast %2 : vector<1x192x8xf32> to vector<192x8xf32>
    %c0_5 = arith.constant 0 : index
    %c0_6 = arith.constant 0 : index
    %c0_7 = arith.constant 0 : index
    %4 = vector.load %arg3[%c0_5, %c0_6, %c0_7] : memref<1x8x8xf32, #tpu.memory_space<vmem>>, vector<1x8x8xf32>
    %5 = vector.shape_cast %4 : vector<1x8x8xf32> to vector<8x8xf32>
    %c0_8 = arith.constant 0 : index
    %c0_9 = arith.constant 0 : index
    %6 = vector.load %arg4[%c0_8, %c0_9] : memref<48x8xf32, #tpu.memory_space<vmem>>, vector<48x8xf32>
    %cst = arith.constant 2.000000e+01 : f32
    %7 = vector.broadcast %cst : f32 to vector<8x8xf32>
    %8 = arith.cmpf ogt, %5, %7 : vector<8x8xf32>
    %cst_10 = arith.constant 2.000000e+01 : f32
    %9 = vector.broadcast %cst_10 : f32 to vector<8x8xf32>
    %10 = arith.minimumf %5, %9 : vector<8x8xf32>
    %11 = math.exp %10 : vector<8x8xf32>
    %cst_11 = arith.constant 1.000000e+00 : f32
    %12 = vector.broadcast %cst_11 : f32 to vector<8x8xf32>
    %13 = arith.addf %12, %11 : vector<8x8xf32>
    %14 = math.log %13 : vector<8x8xf32>
    %15 = arith.select %8, %5, %14 : vector<8x8xi1>, vector<8x8xf32>
    %16 = math.tanh %15 : vector<8x8xf32>
    %17 = arith.mulf %5, %16 : vector<8x8xf32>
    %c0_12 = arith.constant 0 : index
    %c0_13 = arith.constant 0 : index
    %c0_14 = arith.constant 0 : index
    %c0_15 = arith.constant 0 : index
    %18 = vector.load %arg5[%c0_12, %c0_13, %c0_14, %c0_15] : memref<7x3x8x8xf32, #tpu.memory_space<vmem>>, vector<1x1x8x8xf32>
    %19 = vector.shape_cast %18 : vector<1x1x8x8xf32> to vector<8x8xf32>
    %c1 = arith.constant 1 : index
    %c0_16 = arith.constant 0 : index
    %c0_17 = arith.constant 0 : index
    %c0_18 = arith.constant 0 : index
    %20 = vector.load %arg5[%c1, %c0_16, %c0_17, %c0_18] : memref<7x3x8x8xf32, #tpu.memory_space<vmem>>, vector<1x1x8x8xf32>
    %21 = vector.shape_cast %20 : vector<1x1x8x8xf32> to vector<8x8xf32>
    %c2 = arith.constant 2 : index
    %c0_19 = arith.constant 0 : index
    %c0_20 = arith.constant 0 : index
    %c0_21 = arith.constant 0 : index
    %22 = vector.load %arg5[%c2, %c0_19, %c0_20, %c0_21] : memref<7x3x8x8xf32, #tpu.memory_space<vmem>>, vector<1x1x8x8xf32>
    %23 = vector.shape_cast %22 : vector<1x1x8x8xf32> to vector<8x8xf32>
    %c3 = arith.constant 3 : index
    %c0_22 = arith.constant 0 : index
    %c0_23 = arith.constant 0 : index
    %c0_24 = arith.constant 0 : index
    %24 = vector.load %arg5[%c3, %c0_22, %c0_23, %c0_24] : memref<7x3x8x8xf32, #tpu.memory_space<vmem>>, vector<1x1x8x8xf32>
    %25 = vector.shape_cast %24 : vector<1x1x8x8xf32> to vector<8x8xf32>
    %c4 = arith.constant 4 : index
    %c0_25 = arith.constant 0 : index
    %c0_26 = arith.constant 0 : index
    %c0_27 = arith.constant 0 : index
    %26 = vector.load %arg5[%c4, %c0_25, %c0_26, %c0_27] : memref<7x3x8x8xf32, #tpu.memory_space<vmem>>, vector<1x1x8x8xf32>
    %27 = vector.shape_cast %26 : vector<1x1x8x8xf32> to vector<8x8xf32>
    %c5 = arith.constant 5 : index
    %c0_28 = arith.constant 0 : index
    %c0_29 = arith.constant 0 : index
    %c0_30 = arith.constant 0 : index
    %28 = vector.load %arg5[%c5, %c0_28, %c0_29, %c0_30] : memref<7x3x8x8xf32, #tpu.memory_space<vmem>>, vector<1x1x8x8xf32>
    %29 = vector.shape_cast %28 : vector<1x1x8x8xf32> to vector<8x8xf32>
    %c6 = arith.constant 6 : index
    %c0_31 = arith.constant 0 : index
    %c0_32 = arith.constant 0 : index
    %c0_33 = arith.constant 0 : index
    %30 = vector.load %arg5[%c6, %c0_31, %c0_32, %c0_33] : memref<7x3x8x8xf32, #tpu.memory_space<vmem>>, vector<1x1x8x8xf32>
    %31 = vector.shape_cast %30 : vector<1x1x8x8xf32> to vector<8x8xf32>
    %cst_34 = arith.constant dense<0.000000e+00> : vector<8x8xf32>
    %32 = tpu.matmul %17, %25, %cst_34 {dimension_numbers = #tpu.dot_dimension_numbers<[1], [0], [0], [1], [0, 0, 1, 1], [], []>} : vector<8x8xf32>, vector<8x8xf32>, vector<8x8xf32> -> vector<8x8xf32>
    %c0_35 = arith.constant 0 : index
    %c0_36 = arith.constant 0 : index
    %c0_37 = arith.constant 0 : index
    %c0_38 = arith.constant 0 : index
    %33 = vector.load %arg6[%c0_35, %c0_36, %c0_37, %c0_38] : memref<3x3x1x8xf32, #tpu.memory_space<vmem>>, vector<1x1x1x8xf32>
    %34 = vector.shape_cast %33 : vector<1x1x1x8xf32> to vector<1x8xf32>
    %35 = vector.broadcast %34 : vector<1x8xf32> to vector<8x8xf32>
    %36 = arith.addf %32, %35 : vector<8x8xf32>
    %cst_39 = arith.constant dense<0.000000e+00> : vector<8x8xf32>
    %37 = tpu.matmul %17, %27, %cst_39 {dimension_numbers = #tpu.dot_dimension_numbers<[1], [0], [0], [1], [0, 0, 1, 1], [], []>} : vector<8x8xf32>, vector<8x8xf32>, vector<8x8xf32> -> vector<8x8xf32>
    %c1_40 = arith.constant 1 : index
    %c0_41 = arith.constant 0 : index
    %c0_42 = arith.constant 0 : index
    %c0_43 = arith.constant 0 : index
    %38 = vector.load %arg6[%c1_40, %c0_41, %c0_42, %c0_43] : memref<3x3x1x8xf32, #tpu.memory_space<vmem>>, vector<1x1x1x8xf32>
    %39 = vector.shape_cast %38 : vector<1x1x1x8xf32> to vector<1x8xf32>
    %40 = vector.broadcast %39 : vector<1x8xf32> to vector<8x8xf32>
    %41 = arith.addf %37, %40 : vector<8x8xf32>
    %cst_44 = arith.constant dense<0.000000e+00> : vector<8x8xf32>
    %42 = tpu.matmul %17, %29, %cst_44 {dimension_numbers = #tpu.dot_dimension_numbers<[1], [0], [0], [1], [0, 0, 1, 1], [], []>} : vector<8x8xf32>, vector<8x8xf32>, vector<8x8xf32> -> vector<8x8xf32>
    %c2_45 = arith.constant 2 : index
    %c0_46 = arith.constant 0 : index
    %c0_47 = arith.constant 0 : index
    %c0_48 = arith.constant 0 : index
    %43 = vector.load %arg6[%c2_45, %c0_46, %c0_47, %c0_48] : memref<3x3x1x8xf32, #tpu.memory_space<vmem>>, vector<1x1x1x8xf32>
    %44 = vector.shape_cast %43 : vector<1x1x1x8xf32> to vector<1x8xf32>
    %45 = vector.broadcast %44 : vector<1x8xf32> to vector<8x8xf32>
    %46 = arith.addf %42, %45 : vector<8x8xf32>
    %cst_49 = arith.constant dense<0.000000e+00> : vector<48x8xf32>
    %47 = tpu.matmul %6, %41, %cst_49 {dimension_numbers = #tpu.dot_dimension_numbers<[1], [0], [0], [1], [0, 0, 1, 1], [], []>} : vector<48x8xf32>, vector<8x8xf32>, vector<48x8xf32> -> vector<48x8xf32>
    %cst_50 = arith.constant dense<0.000000e+00> : vector<48x8xf32>
    %48 = tpu.matmul %6, %46, %cst_50 {dimension_numbers = #tpu.dot_dimension_numbers<[1], [0], [0], [1], [0, 0, 1, 1], [], []>} : vector<48x8xf32>, vector<8x8xf32>, vector<48x8xf32> -> vector<48x8xf32>
    %cst_51 = arith.constant dense<0.000000e+00> : vector<32x8xf32>
    %49 = tpu.matmul %1, %19, %cst_51 {dimension_numbers = #tpu.dot_dimension_numbers<[1], [0], [0], [1], [0, 0, 1, 1], [], []>} : vector<32x8xf32>, vector<8x8xf32>, vector<32x8xf32> -> vector<32x8xf32>
    %cst_52 = arith.constant dense<0.000000e+00> : vector<192x8xf32>
    %50 = tpu.matmul %3, %21, %cst_52 {dimension_numbers = #tpu.dot_dimension_numbers<[1], [0], [0], [1], [0, 0, 1, 1], [], []>} : vector<192x8xf32>, vector<8x8xf32>, vector<192x8xf32> -> vector<192x8xf32>
    %cst_53 = arith.constant dense<0.000000e+00> : vector<192x8xf32>
    %51 = tpu.matmul %3, %23, %cst_53 {dimension_numbers = #tpu.dot_dimension_numbers<[1], [0], [0], [1], [0, 0, 1, 1], [], []>} : vector<192x8xf32>, vector<8x8xf32>, vector<192x8xf32> -> vector<192x8xf32>
    %52 = vector.extract_strided_slice %49 {offsets = [0, 0], sizes = [8, 8], strides = [1, 1]} : vector<32x8xf32> to vector<8x8xf32>
    %53 = arith.addf %52, %36 : vector<8x8xf32>
    %cst_54 = arith.constant 0.353553385 : f32
    %54 = vector.broadcast %cst_54 : f32 to vector<8x8xf32>
    %55 = arith.mulf %53, %54 : vector<8x8xf32>
    %56 = vector.extract_strided_slice %50 {offsets = [0, 0], sizes = [48, 8], strides = [1, 1]} : vector<192x8xf32> to vector<48x8xf32>
    %57 = arith.addf %56, %47 : vector<48x8xf32>
    %58 = vector.extract_strided_slice %51 {offsets = [0, 0], sizes = [48, 8], strides = [1, 1]} : vector<192x8xf32> to vector<48x8xf32>
    %59 = arith.addf %58, %48 : vector<48x8xf32>
    %cst_55 = arith.constant dense<0.000000e+00> : vector<8x48xf32>
    %60 = tpu.matmul %55, %57, %cst_55 {dimension_numbers = #tpu.dot_dimension_numbers<[1], [1], [0], [0], [0, 0, 1, 0], [], []>} : vector<8x8xf32>, vector<48x8xf32>, vector<8x48xf32> -> vector<8x48xf32>
    %cst_56 = arith.constant dense<0xFF800000> : vector<8xf32>
    %61 = vector.multi_reduction <maximumf>, %60, %cst_56 [1] : vector<8x48xf32> to vector<8xf32>
    %62 = vector.shape_cast %61 : vector<8xf32> to vector<8x1xf32>
    %63 = vector.broadcast %62 : vector<8x1xf32> to vector<8x48xf32>
    %64 = arith.subf %60, %63 : vector<8x48xf32>
    %65 = math.exp %64 : vector<8x48xf32>
    %cst_57 = arith.constant dense<0.000000e+00> : vector<8xf32>
    %66 = vector.multi_reduction <add>, %65, %cst_57 [1] : vector<8x48xf32> to vector<8xf32>
    %67 = vector.shape_cast %66 : vector<8xf32> to vector<8x1xf32>
    %68 = vector.broadcast %67 : vector<8x1xf32> to vector<8x48xf32>
    %69 = arith.divf %65, %68 : vector<8x48xf32>
    %cst_58 = arith.constant dense<0.000000e+00> : vector<8x8xf32>
    %70 = tpu.matmul %69, %59, %cst_58 {dimension_numbers = #tpu.dot_dimension_numbers<[1], [0], [0], [1], [0, 0, 1, 1], [], []>} : vector<8x48xf32>, vector<48x8xf32>, vector<8x8xf32> -> vector<8x8xf32>
    %cst_59 = arith.constant dense<0.000000e+00> : vector<8x8xf32>
    %71 = tpu.matmul %70, %31, %cst_59 {dimension_numbers = #tpu.dot_dimension_numbers<[1], [0], [0], [1], [0, 0, 1, 1], [], []>} : vector<8x8xf32>, vector<8x8xf32>, vector<8x8xf32> -> vector<8x8xf32>
    %72 = vector.extract_strided_slice %49 {offsets = [8, 0], sizes = [8, 8], strides = [1, 1]} : vector<32x8xf32> to vector<8x8xf32>
    %73 = arith.addf %72, %36 : vector<8x8xf32>
    %cst_60 = arith.constant 0.353553385 : f32
    %74 = vector.broadcast %cst_60 : f32 to vector<8x8xf32>
    %75 = arith.mulf %73, %74 : vector<8x8xf32>
    %76 = vector.extract_strided_slice %50 {offsets = [48, 0], sizes = [48, 8], strides = [1, 1]} : vector<192x8xf32> to vector<48x8xf32>
    %77 = arith.addf %76, %47 : vector<48x8xf32>
    %78 = vector.extract_strided_slice %51 {offsets = [48, 0], sizes = [48, 8], strides = [1, 1]} : vector<192x8xf32> to vector<48x8xf32>
    %79 = arith.addf %78, %48 : vector<48x8xf32>
    %cst_61 = arith.constant dense<0.000000e+00> : vector<8x48xf32>
    %80 = tpu.matmul %75, %77, %cst_61 {dimension_numbers = #tpu.dot_dimension_numbers<[1], [1], [0], [0], [0, 0, 1, 0], [], []>} : vector<8x8xf32>, vector<48x8xf32>, vector<8x48xf32> -> vector<8x48xf32>
    %cst_62 = arith.constant dense<0xFF800000> : vector<8xf32>
    %81 = vector.multi_reduction <maximumf>, %80, %cst_62 [1] : vector<8x48xf32> to vector<8xf32>
    %82 = vector.shape_cast %81 : vector<8xf32> to vector<8x1xf32>
    %83 = vector.broadcast %82 : vector<8x1xf32> to vector<8x48xf32>
    %84 = arith.subf %80, %83 : vector<8x48xf32>
    %85 = math.exp %84 : vector<8x48xf32>
    %cst_63 = arith.constant dense<0.000000e+00> : vector<8xf32>
    %86 = vector.multi_reduction <add>, %85, %cst_63 [1] : vector<8x48xf32> to vector<8xf32>
    %87 = vector.shape_cast %86 : vector<8xf32> to vector<8x1xf32>
    %88 = vector.broadcast %87 : vector<8x1xf32> to vector<8x48xf32>
    %89 = arith.divf %85, %88 : vector<8x48xf32>
    %cst_64 = arith.constant dense<0.000000e+00> : vector<8x8xf32>
    %90 = tpu.matmul %89, %79, %cst_64 {dimension_numbers = #tpu.dot_dimension_numbers<[1], [0], [0], [1], [0, 0, 1, 1], [], []>} : vector<8x48xf32>, vector<48x8xf32>, vector<8x8xf32> -> vector<8x8xf32>
    %cst_65 = arith.constant dense<0.000000e+00> : vector<8x8xf32>
    %91 = tpu.matmul %90, %31, %cst_65 {dimension_numbers = #tpu.dot_dimension_numbers<[1], [0], [0], [1], [0, 0, 1, 1], [], []>} : vector<8x8xf32>, vector<8x8xf32>, vector<8x8xf32> -> vector<8x8xf32>
    %92 = vector.extract_strided_slice %49 {offsets = [16, 0], sizes = [8, 8], strides = [1, 1]} : vector<32x8xf32> to vector<8x8xf32>
    %93 = arith.addf %92, %36 : vector<8x8xf32>
    %cst_66 = arith.constant 0.353553385 : f32
    %94 = vector.broadcast %cst_66 : f32 to vector<8x8xf32>
    %95 = arith.mulf %93, %94 : vector<8x8xf32>
    %96 = vector.extract_strided_slice %50 {offsets = [96, 0], sizes = [48, 8], strides = [1, 1]} : vector<192x8xf32> to vector<48x8xf32>
    %97 = arith.addf %96, %47 : vector<48x8xf32>
    %98 = vector.extract_strided_slice %51 {offsets = [96, 0], sizes = [48, 8], strides = [1, 1]} : vector<192x8xf32> to vector<48x8xf32>
    %99 = arith.addf %98, %48 : vector<48x8xf32>
    %cst_67 = arith.constant dense<0.000000e+00> : vector<8x48xf32>
    %100 = tpu.matmul %95, %97, %cst_67 {dimension_numbers = #tpu.dot_dimension_numbers<[1], [1], [0], [0], [0, 0, 1, 0], [], []>} : vector<8x8xf32>, vector<48x8xf32>, vector<8x48xf32> -> vector<8x48xf32>
    %cst_68 = arith.constant dense<0xFF800000> : vector<8xf32>
    %101 = vector.multi_reduction <maximumf>, %100, %cst_68 [1] : vector<8x48xf32> to vector<8xf32>
    %102 = vector.shape_cast %101 : vector<8xf32> to vector<8x1xf32>
    %103 = vector.broadcast %102 : vector<8x1xf32> to vector<8x48xf32>
    %104 = arith.subf %100, %103 : vector<8x48xf32>
    %105 = math.exp %104 : vector<8x48xf32>
    %cst_69 = arith.constant dense<0.000000e+00> : vector<8xf32>
    %106 = vector.multi_reduction <add>, %105, %cst_69 [1] : vector<8x48xf32> to vector<8xf32>
    %107 = vector.shape_cast %106 : vector<8xf32> to vector<8x1xf32>
    %108 = vector.broadcast %107 : vector<8x1xf32> to vector<8x48xf32>
    %109 = arith.divf %105, %108 : vector<8x48xf32>
    %cst_70 = arith.constant dense<0.000000e+00> : vector<8x8xf32>
    %110 = tpu.matmul %109, %99, %cst_70 {dimension_numbers = #tpu.dot_dimension_numbers<[1], [0], [0], [1], [0, 0, 1, 1], [], []>} : vector<8x48xf32>, vector<48x8xf32>, vector<8x8xf32> -> vector<8x8xf32>
    %cst_71 = arith.constant dense<0.000000e+00> : vector<8x8xf32>
    %111 = tpu.matmul %110, %31, %cst_71 {dimension_numbers = #tpu.dot_dimension_numbers<[1], [0], [0], [1], [0, 0, 1, 1], [], []>} : vector<8x8xf32>, vector<8x8xf32>, vector<8x8xf32> -> vector<8x8xf32>
    %112 = vector.extract_strided_slice %49 {offsets = [24, 0], sizes = [8, 8], strides = [1, 1]} : vector<32x8xf32> to vector<8x8xf32>
    %113 = arith.addf %112, %36 : vector<8x8xf32>
    %cst_72 = arith.constant 0.353553385 : f32
    %114 = vector.broadcast %cst_72 : f32 to vector<8x8xf32>
    %115 = arith.mulf %113, %114 : vector<8x8xf32>
    %116 = vector.extract_strided_slice %50 {offsets = [144, 0], sizes = [48, 8], strides = [1, 1]} : vector<192x8xf32> to vector<48x8xf32>
    %117 = arith.addf %116, %47 : vector<48x8xf32>
    %118 = vector.extract_strided_slice %51 {offsets = [144, 0], sizes = [48, 8], strides = [1, 1]} : vector<192x8xf32> to vector<48x8xf32>
    %119 = arith.addf %118, %48 : vector<48x8xf32>
    %cst_73 = arith.constant dense<0.000000e+00> : vector<8x48xf32>
    %120 = tpu.matmul %115, %117, %cst_73 {dimension_numbers = #tpu.dot_dimension_numbers<[1], [1], [0], [0], [0, 0, 1, 0], [], []>} : vector<8x8xf32>, vector<48x8xf32>, vector<8x48xf32> -> vector<8x48xf32>
    %cst_74 = arith.constant dense<0xFF800000> : vector<8xf32>
    %121 = vector.multi_reduction <maximumf>, %120, %cst_74 [1] : vector<8x48xf32> to vector<8xf32>
    %122 = vector.shape_cast %121 : vector<8xf32> to vector<8x1xf32>
    %123 = vector.broadcast %122 : vector<8x1xf32> to vector<8x48xf32>
    %124 = arith.subf %120, %123 : vector<8x48xf32>
    %125 = math.exp %124 : vector<8x48xf32>
    %cst_75 = arith.constant dense<0.000000e+00> : vector<8xf32>
    %126 = vector.multi_reduction <add>, %125, %cst_75 [1] : vector<8x48xf32> to vector<8xf32>
    %127 = vector.shape_cast %126 : vector<8xf32> to vector<8x1xf32>
    %128 = vector.broadcast %127 : vector<8x1xf32> to vector<8x48xf32>
    %129 = arith.divf %125, %128 : vector<8x48xf32>
    %cst_76 = arith.constant dense<0.000000e+00> : vector<8x8xf32>
    %130 = tpu.matmul %129, %119, %cst_76 {dimension_numbers = #tpu.dot_dimension_numbers<[1], [0], [0], [1], [0, 0, 1, 1], [], []>} : vector<8x48xf32>, vector<48x8xf32>, vector<8x8xf32> -> vector<8x8xf32>
    %cst_77 = arith.constant dense<0.000000e+00> : vector<8x8xf32>
    %131 = tpu.matmul %130, %31, %cst_77 {dimension_numbers = #tpu.dot_dimension_numbers<[1], [0], [0], [1], [0, 0, 1, 1], [], []>} : vector<8x8xf32>, vector<8x8xf32>, vector<8x8xf32> -> vector<8x8xf32>
    %c0_78 = arith.constant 0 : index
    %c1_79 = arith.constant 1 : index
    %c0_80 = arith.constant 0 : index
    %c0_81 = arith.constant 0 : index
    %132 = vector.load %arg5[%c0_78, %c1_79, %c0_80, %c0_81] : memref<7x3x8x8xf32, #tpu.memory_space<vmem>>, vector<1x1x8x8xf32>
    %133 = vector.shape_cast %132 : vector<1x1x8x8xf32> to vector<8x8xf32>
    %c1_82 = arith.constant 1 : index
    %c1_83 = arith.constant 1 : index
    %c0_84 = arith.constant 0 : index
    %c0_85 = arith.constant 0 : index
    %134 = vector.load %arg5[%c1_82, %c1_83, %c0_84, %c0_85] : memref<7x3x8x8xf32, #tpu.memory_space<vmem>>, vector<1x1x8x8xf32>
    %135 = vector.shape_cast %134 : vector<1x1x8x8xf32> to vector<8x8xf32>
    %c2_86 = arith.constant 2 : index
    %c1_87 = arith.constant 1 : index
    %c0_88 = arith.constant 0 : index
    %c0_89 = arith.constant 0 : index
    %136 = vector.load %arg5[%c2_86, %c1_87, %c0_88, %c0_89] : memref<7x3x8x8xf32, #tpu.memory_space<vmem>>, vector<1x1x8x8xf32>
    %137 = vector.shape_cast %136 : vector<1x1x8x8xf32> to vector<8x8xf32>
    %c3_90 = arith.constant 3 : index
    %c1_91 = arith.constant 1 : index
    %c0_92 = arith.constant 0 : index
    %c0_93 = arith.constant 0 : index
    %138 = vector.load %arg5[%c3_90, %c1_91, %c0_92, %c0_93] : memref<7x3x8x8xf32, #tpu.memory_space<vmem>>, vector<1x1x8x8xf32>
    %139 = vector.shape_cast %138 : vector<1x1x8x8xf32> to vector<8x8xf32>
    %c4_94 = arith.constant 4 : index
    %c1_95 = arith.constant 1 : index
    %c0_96 = arith.constant 0 : index
    %c0_97 = arith.constant 0 : index
    %140 = vector.load %arg5[%c4_94, %c1_95, %c0_96, %c0_97] : memref<7x3x8x8xf32, #tpu.memory_space<vmem>>, vector<1x1x8x8xf32>
    %141 = vector.shape_cast %140 : vector<1x1x8x8xf32> to vector<8x8xf32>
    %c5_98 = arith.constant 5 : index
    %c1_99 = arith.constant 1 : index
    %c0_100 = arith.constant 0 : index
    %c0_101 = arith.constant 0 : index
    %142 = vector.load %arg5[%c5_98, %c1_99, %c0_100, %c0_101] : memref<7x3x8x8xf32, #tpu.memory_space<vmem>>, vector<1x1x8x8xf32>
    %143 = vector.shape_cast %142 : vector<1x1x8x8xf32> to vector<8x8xf32>
    %c6_102 = arith.constant 6 : index
    %c1_103 = arith.constant 1 : index
    %c0_104 = arith.constant 0 : index
    %c0_105 = arith.constant 0 : index
    %144 = vector.load %arg5[%c6_102, %c1_103, %c0_104, %c0_105] : memref<7x3x8x8xf32, #tpu.memory_space<vmem>>, vector<1x1x8x8xf32>
    %145 = vector.shape_cast %144 : vector<1x1x8x8xf32> to vector<8x8xf32>
    %cst_106 = arith.constant dense<0.000000e+00> : vector<8x8xf32>
    %146 = tpu.matmul %17, %139, %cst_106 {dimension_numbers = #tpu.dot_dimension_numbers<[1], [0], [0], [1], [0, 0, 1, 1], [], []>} : vector<8x8xf32>, vector<8x8xf32>, vector<8x8xf32> -> vector<8x8xf32>
    %c0_107 = arith.constant 0 : index
    %c1_108 = arith.constant 1 : index
    %c0_109 = arith.constant 0 : index
    %c0_110 = arith.constant 0 : index
    %147 = vector.load %arg6[%c0_107, %c1_108, %c0_109, %c0_110] : memref<3x3x1x8xf32, #tpu.memory_space<vmem>>, vector<1x1x1x8xf32>
    %148 = vector.shape_cast %147 : vector<1x1x1x8xf32> to vector<1x8xf32>
    %149 = vector.broadcast %148 : vector<1x8xf32> to vector<8x8xf32>
    %150 = arith.addf %146, %149 : vector<8x8xf32>
    %cst_111 = arith.constant dense<0.000000e+00> : vector<8x8xf32>
    %151 = tpu.matmul %17, %141, %cst_111 {dimension_numbers = #tpu.dot_dimension_numbers<[1], [0], [0], [1], [0, 0, 1, 1], [], []>} : vector<8x8xf32>, vector<8x8xf32>, vector<8x8xf32> -> vector<8x8xf32>
    %c1_112 = arith.constant 1 : index
    %c1_113 = arith.constant 1 : index
    %c0_114 = arith.constant 0 : index
    %c0_115 = arith.constant 0 : index
    %152 = vector.load %arg6[%c1_112, %c1_113, %c0_114, %c0_115] : memref<3x3x1x8xf32, #tpu.memory_space<vmem>>, vector<1x1x1x8xf32>
    %153 = vector.shape_cast %152 : vector<1x1x1x8xf32> to vector<1x8xf32>
    %154 = vector.broadcast %153 : vector<1x8xf32> to vector<8x8xf32>
    %155 = arith.addf %151, %154 : vector<8x8xf32>
    %cst_116 = arith.constant dense<0.000000e+00> : vector<8x8xf32>
    %156 = tpu.matmul %17, %143, %cst_116 {dimension_numbers = #tpu.dot_dimension_numbers<[1], [0], [0], [1], [0, 0, 1, 1], [], []>} : vector<8x8xf32>, vector<8x8xf32>, vector<8x8xf32> -> vector<8x8xf32>
    %c2_117 = arith.constant 2 : index
    %c1_118 = arith.constant 1 : index
    %c0_119 = arith.constant 0 : index
    %c0_120 = arith.constant 0 : index
    %157 = vector.load %arg6[%c2_117, %c1_118, %c0_119, %c0_120] : memref<3x3x1x8xf32, #tpu.memory_space<vmem>>, vector<1x1x1x8xf32>
    %158 = vector.shape_cast %157 : vector<1x1x1x8xf32> to vector<1x8xf32>
    %159 = vector.broadcast %158 : vector<1x8xf32> to vector<8x8xf32>
    %160 = arith.addf %156, %159 : vector<8x8xf32>
    %cst_121 = arith.constant dense<0.000000e+00> : vector<48x8xf32>
    %161 = tpu.matmul %6, %155, %cst_121 {dimension_numbers = #tpu.dot_dimension_numbers<[1], [0], [0], [1], [0, 0, 1, 1], [], []>} : vector<48x8xf32>, vector<8x8xf32>, vector<48x8xf32> -> vector<48x8xf32>
    %cst_122 = arith.constant dense<0.000000e+00> : vector<48x8xf32>
    %162 = tpu.matmul %6, %160, %cst_122 {dimension_numbers = #tpu.dot_dimension_numbers<[1], [0], [0], [1], [0, 0, 1, 1], [], []>} : vector<48x8xf32>, vector<8x8xf32>, vector<48x8xf32> -> vector<48x8xf32>
    %cst_123 = arith.constant dense<0.000000e+00> : vector<32x8xf32>
    %163 = tpu.matmul %1, %133, %cst_123 {dimension_numbers = #tpu.dot_dimension_numbers<[1], [0], [0], [1], [0, 0, 1, 1], [], []>} : vector<32x8xf32>, vector<8x8xf32>, vector<32x8xf32> -> vector<32x8xf32>
    %cst_124 = arith.constant dense<0.000000e+00> : vector<192x8xf32>
    %164 = tpu.matmul %3, %135, %cst_124 {dimension_numbers = #tpu.dot_dimension_numbers<[1], [0], [0], [1], [0, 0, 1, 1], [], []>} : vector<192x8xf32>, vector<8x8xf32>, vector<192x8xf32> -> vector<192x8xf32>
    %cst_125 = arith.constant dense<0.000000e+00> : vector<192x8xf32>
    %165 = tpu.matmul %3, %137, %cst_125 {dimension_numbers = #tpu.dot_dimension_numbers<[1], [0], [0], [1], [0, 0, 1, 1], [], []>} : vector<192x8xf32>, vector<8x8xf32>, vector<192x8xf32> -> vector<192x8xf32>
    %166 = vector.extract_strided_slice %163 {offsets = [0, 0], sizes = [8, 8], strides = [1, 1]} : vector<32x8xf32> to vector<8x8xf32>
    %167 = arith.addf %166, %150 : vector<8x8xf32>
    %cst_126 = arith.constant 0.353553385 : f32
    %168 = vector.broadcast %cst_126 : f32 to vector<8x8xf32>
    %169 = arith.mulf %167, %168 : vector<8x8xf32>
    %170 = vector.extract_strided_slice %164 {offsets = [0, 0], sizes = [48, 8], strides = [1, 1]} : vector<192x8xf32> to vector<48x8xf32>
    %171 = arith.addf %170, %161 : vector<48x8xf32>
    %172 = vector.extract_strided_slice %165 {offsets = [0, 0], sizes = [48, 8], strides = [1, 1]} : vector<192x8xf32> to vector<48x8xf32>
    %173 = arith.addf %172, %162 : vector<48x8xf32>
    %cst_127 = arith.constant dense<0.000000e+00> : vector<8x48xf32>
    %174 = tpu.matmul %169, %171, %cst_127 {dimension_numbers = #tpu.dot_dimension_numbers<[1], [1], [0], [0], [0, 0, 1, 0], [], []>} : vector<8x8xf32>, vector<48x8xf32>, vector<8x48xf32> -> vector<8x48xf32>
    %cst_128 = arith.constant dense<0xFF800000> : vector<8xf32>
    %175 = vector.multi_reduction <maximumf>, %174, %cst_128 [1] : vector<8x48xf32> to vector<8xf32>
    %176 = vector.shape_cast %175 : vector<8xf32> to vector<8x1xf32>
    %177 = vector.broadcast %176 : vector<8x1xf32> to vector<8x48xf32>
    %178 = arith.subf %174, %177 : vector<8x48xf32>
    %179 = math.exp %178 : vector<8x48xf32>
    %cst_129 = arith.constant dense<0.000000e+00> : vector<8xf32>
    %180 = vector.multi_reduction <add>, %179, %cst_129 [1] : vector<8x48xf32> to vector<8xf32>
    %181 = vector.shape_cast %180 : vector<8xf32> to vector<8x1xf32>
    %182 = vector.broadcast %181 : vector<8x1xf32> to vector<8x48xf32>
    %183 = arith.divf %179, %182 : vector<8x48xf32>
    %cst_130 = arith.constant dense<0.000000e+00> : vector<8x8xf32>
    %184 = tpu.matmul %183, %173, %cst_130 {dimension_numbers = #tpu.dot_dimension_numbers<[1], [0], [0], [1], [0, 0, 1, 1], [], []>} : vector<8x48xf32>, vector<48x8xf32>, vector<8x8xf32> -> vector<8x8xf32>
    %cst_131 = arith.constant dense<0.000000e+00> : vector<8x8xf32>
    %185 = tpu.matmul %184, %145, %cst_131 {dimension_numbers = #tpu.dot_dimension_numbers<[1], [0], [0], [1], [0, 0, 1, 1], [], []>} : vector<8x8xf32>, vector<8x8xf32>, vector<8x8xf32> -> vector<8x8xf32>
    %186 = arith.addf %71, %185 : vector<8x8xf32>
    %187 = vector.extract_strided_slice %163 {offsets = [8, 0], sizes = [8, 8], strides = [1, 1]} : vector<32x8xf32> to vector<8x8xf32>
    %188 = arith.addf %187, %150 : vector<8x8xf32>
    %cst_132 = arith.constant 0.353553385 : f32
    %189 = vector.broadcast %cst_132 : f32 to vector<8x8xf32>
    %190 = arith.mulf %188, %189 : vector<8x8xf32>
    %191 = vector.extract_strided_slice %164 {offsets = [48, 0], sizes = [48, 8], strides = [1, 1]} : vector<192x8xf32> to vector<48x8xf32>
    %192 = arith.addf %191, %161 : vector<48x8xf32>
    %193 = vector.extract_strided_slice %165 {offsets = [48, 0], sizes = [48, 8], strides = [1, 1]} : vector<192x8xf32> to vector<48x8xf32>
    %194 = arith.addf %193, %162 : vector<48x8xf32>
    %cst_133 = arith.constant dense<0.000000e+00> : vector<8x48xf32>
    %195 = tpu.matmul %190, %192, %cst_133 {dimension_numbers = #tpu.dot_dimension_numbers<[1], [1], [0], [0], [0, 0, 1, 0], [], []>} : vector<8x8xf32>, vector<48x8xf32>, vector<8x48xf32> -> vector<8x48xf32>
    %cst_134 = arith.constant dense<0xFF800000> : vector<8xf32>
    %196 = vector.multi_reduction <maximumf>, %195, %cst_134 [1] : vector<8x48xf32> to vector<8xf32>
    %197 = vector.shape_cast %196 : vector<8xf32> to vector<8x1xf32>
    %198 = vector.broadcast %197 : vector<8x1xf32> to vector<8x48xf32>
    %199 = arith.subf %195, %198 : vector<8x48xf32>
    %200 = math.exp %199 : vector<8x48xf32>
    %cst_135 = arith.constant dense<0.000000e+00> : vector<8xf32>
    %201 = vector.multi_reduction <add>, %200, %cst_135 [1] : vector<8x48xf32> to vector<8xf32>
    %202 = vector.shape_cast %201 : vector<8xf32> to vector<8x1xf32>
    %203 = vector.broadcast %202 : vector<8x1xf32> to vector<8x48xf32>
    %204 = arith.divf %200, %203 : vector<8x48xf32>
    %cst_136 = arith.constant dense<0.000000e+00> : vector<8x8xf32>
    %205 = tpu.matmul %204, %194, %cst_136 {dimension_numbers = #tpu.dot_dimension_numbers<[1], [0], [0], [1], [0, 0, 1, 1], [], []>} : vector<8x48xf32>, vector<48x8xf32>, vector<8x8xf32> -> vector<8x8xf32>
    %cst_137 = arith.constant dense<0.000000e+00> : vector<8x8xf32>
    %206 = tpu.matmul %205, %145, %cst_137 {dimension_numbers = #tpu.dot_dimension_numbers<[1], [0], [0], [1], [0, 0, 1, 1], [], []>} : vector<8x8xf32>, vector<8x8xf32>, vector<8x8xf32> -> vector<8x8xf32>
    %207 = arith.addf %91, %206 : vector<8x8xf32>
    %208 = vector.extract_strided_slice %163 {offsets = [16, 0], sizes = [8, 8], strides = [1, 1]} : vector<32x8xf32> to vector<8x8xf32>
    %209 = arith.addf %208, %150 : vector<8x8xf32>
    %cst_138 = arith.constant 0.353553385 : f32
    %210 = vector.broadcast %cst_138 : f32 to vector<8x8xf32>
    %211 = arith.mulf %209, %210 : vector<8x8xf32>
    %212 = vector.extract_strided_slice %164 {offsets = [96, 0], sizes = [48, 8], strides = [1, 1]} : vector<192x8xf32> to vector<48x8xf32>
    %213 = arith.addf %212, %161 : vector<48x8xf32>
    %214 = vector.extract_strided_slice %165 {offsets = [96, 0], sizes = [48, 8], strides = [1, 1]} : vector<192x8xf32> to vector<48x8xf32>
    %215 = arith.addf %214, %162 : vector<48x8xf32>
    %cst_139 = arith.constant dense<0.000000e+00> : vector<8x48xf32>
    %216 = tpu.matmul %211, %213, %cst_139 {dimension_numbers = #tpu.dot_dimension_numbers<[1], [1], [0], [0], [0, 0, 1, 0], [], []>} : vector<8x8xf32>, vector<48x8xf32>, vector<8x48xf32> -> vector<8x48xf32>
    %cst_140 = arith.constant dense<0xFF800000> : vector<8xf32>
    %217 = vector.multi_reduction <maximumf>, %216, %cst_140 [1] : vector<8x48xf32> to vector<8xf32>
    %218 = vector.shape_cast %217 : vector<8xf32> to vector<8x1xf32>
    %219 = vector.broadcast %218 : vector<8x1xf32> to vector<8x48xf32>
    %220 = arith.subf %216, %219 : vector<8x48xf32>
    %221 = math.exp %220 : vector<8x48xf32>
    %cst_141 = arith.constant dense<0.000000e+00> : vector<8xf32>
    %222 = vector.multi_reduction <add>, %221, %cst_141 [1] : vector<8x48xf32> to vector<8xf32>
    %223 = vector.shape_cast %222 : vector<8xf32> to vector<8x1xf32>
    %224 = vector.broadcast %223 : vector<8x1xf32> to vector<8x48xf32>
    %225 = arith.divf %221, %224 : vector<8x48xf32>
    %cst_142 = arith.constant dense<0.000000e+00> : vector<8x8xf32>
    %226 = tpu.matmul %225, %215, %cst_142 {dimension_numbers = #tpu.dot_dimension_numbers<[1], [0], [0], [1], [0, 0, 1, 1], [], []>} : vector<8x48xf32>, vector<48x8xf32>, vector<8x8xf32> -> vector<8x8xf32>
    %cst_143 = arith.constant dense<0.000000e+00> : vector<8x8xf32>
    %227 = tpu.matmul %226, %145, %cst_143 {dimension_numbers = #tpu.dot_dimension_numbers<[1], [0], [0], [1], [0, 0, 1, 1], [], []>} : vector<8x8xf32>, vector<8x8xf32>, vector<8x8xf32> -> vector<8x8xf32>
    %228 = arith.addf %111, %227 : vector<8x8xf32>
    %229 = vector.extract_strided_slice %163 {offsets = [24, 0], sizes = [8, 8], strides = [1, 1]} : vector<32x8xf32> to vector<8x8xf32>
    %230 = arith.addf %229, %150 : vector<8x8xf32>
    %cst_144 = arith.constant 0.353553385 : f32
    %231 = vector.broadcast %cst_144 : f32 to vector<8x8xf32>
    %232 = arith.mulf %230, %231 : vector<8x8xf32>
    %233 = vector.extract_strided_slice %164 {offsets = [144, 0], sizes = [48, 8], strides = [1, 1]} : vector<192x8xf32> to vector<48x8xf32>
    %234 = arith.addf %233, %161 : vector<48x8xf32>
    %235 = vector.extract_strided_slice %165 {offsets = [144, 0], sizes = [48, 8], strides = [1, 1]} : vector<192x8xf32> to vector<48x8xf32>
    %236 = arith.addf %235, %162 : vector<48x8xf32>
    %cst_145 = arith.constant dense<0.000000e+00> : vector<8x48xf32>
    %237 = tpu.matmul %232, %234, %cst_145 {dimension_numbers = #tpu.dot_dimension_numbers<[1], [1], [0], [0], [0, 0, 1, 0], [], []>} : vector<8x8xf32>, vector<48x8xf32>, vector<8x48xf32> -> vector<8x48xf32>
    %cst_146 = arith.constant dense<0xFF800000> : vector<8xf32>
    %238 = vector.multi_reduction <maximumf>, %237, %cst_146 [1] : vector<8x48xf32> to vector<8xf32>
    %239 = vector.shape_cast %238 : vector<8xf32> to vector<8x1xf32>
    %240 = vector.broadcast %239 : vector<8x1xf32> to vector<8x48xf32>
    %241 = arith.subf %237, %240 : vector<8x48xf32>
    %242 = math.exp %241 : vector<8x48xf32>
    %cst_147 = arith.constant dense<0.000000e+00> : vector<8xf32>
    %243 = vector.multi_reduction <add>, %242, %cst_147 [1] : vector<8x48xf32> to vector<8xf32>
    %244 = vector.shape_cast %243 : vector<8xf32> to vector<8x1xf32>
    %245 = vector.broadcast %244 : vector<8x1xf32> to vector<8x48xf32>
    %246 = arith.divf %242, %245 : vector<8x48xf32>
    %cst_148 = arith.constant dense<0.000000e+00> : vector<8x8xf32>
    %247 = tpu.matmul %246, %236, %cst_148 {dimension_numbers = #tpu.dot_dimension_numbers<[1], [0], [0], [1], [0, 0, 1, 1], [], []>} : vector<8x48xf32>, vector<48x8xf32>, vector<8x8xf32> -> vector<8x8xf32>
    %cst_149 = arith.constant dense<0.000000e+00> : vector<8x8xf32>
    %248 = tpu.matmul %247, %145, %cst_149 {dimension_numbers = #tpu.dot_dimension_numbers<[1], [0], [0], [1], [0, 0, 1, 1], [], []>} : vector<8x8xf32>, vector<8x8xf32>, vector<8x8xf32> -> vector<8x8xf32>
    %249 = arith.addf %131, %248 : vector<8x8xf32>
    %c0_150 = arith.constant 0 : index
    %c2_151 = arith.constant 2 : index
    %c0_152 = arith.constant 0 : index
    %c0_153 = arith.constant 0 : index
    %250 = vector.load %arg5[%c0_150, %c2_151, %c0_152, %c0_153] : memref<7x3x8x8xf32, #tpu.memory_space<vmem>>, vector<1x1x8x8xf32>
    %251 = vector.shape_cast %250 : vector<1x1x8x8xf32> to vector<8x8xf32>
    %c1_154 = arith.constant 1 : index
    %c2_155 = arith.constant 2 : index
    %c0_156 = arith.constant 0 : index
    %c0_157 = arith.constant 0 : index
    %252 = vector.load %arg5[%c1_154, %c2_155, %c0_156, %c0_157] : memref<7x3x8x8xf32, #tpu.memory_space<vmem>>, vector<1x1x8x8xf32>
    %253 = vector.shape_cast %252 : vector<1x1x8x8xf32> to vector<8x8xf32>
    %c2_158 = arith.constant 2 : index
    %c2_159 = arith.constant 2 : index
    %c0_160 = arith.constant 0 : index
    %c0_161 = arith.constant 0 : index
    %254 = vector.load %arg5[%c2_158, %c2_159, %c0_160, %c0_161] : memref<7x3x8x8xf32, #tpu.memory_space<vmem>>, vector<1x1x8x8xf32>
    %255 = vector.shape_cast %254 : vector<1x1x8x8xf32> to vector<8x8xf32>
    %c3_162 = arith.constant 3 : index
    %c2_163 = arith.constant 2 : index
    %c0_164 = arith.constant 0 : index
    %c0_165 = arith.constant 0 : index
    %256 = vector.load %arg5[%c3_162, %c2_163, %c0_164, %c0_165] : memref<7x3x8x8xf32, #tpu.memory_space<vmem>>, vector<1x1x8x8xf32>
    %257 = vector.shape_cast %256 : vector<1x1x8x8xf32> to vector<8x8xf32>
    %c4_166 = arith.constant 4 : index
    %c2_167 = arith.constant 2 : index
    %c0_168 = arith.constant 0 : index
    %c0_169 = arith.constant 0 : index
    %258 = vector.load %arg5[%c4_166, %c2_167, %c0_168, %c0_169] : memref<7x3x8x8xf32, #tpu.memory_space<vmem>>, vector<1x1x8x8xf32>
    %259 = vector.shape_cast %258 : vector<1x1x8x8xf32> to vector<8x8xf32>
    %c5_170 = arith.constant 5 : index
    %c2_171 = arith.constant 2 : index
    %c0_172 = arith.constant 0 : index
    %c0_173 = arith.constant 0 : index
    %260 = vector.load %arg5[%c5_170, %c2_171, %c0_172, %c0_173] : memref<7x3x8x8xf32, #tpu.memory_space<vmem>>, vector<1x1x8x8xf32>
    %261 = vector.shape_cast %260 : vector<1x1x8x8xf32> to vector<8x8xf32>
    %c6_174 = arith.constant 6 : index
    %c2_175 = arith.constant 2 : index
    %c0_176 = arith.constant 0 : index
    %c0_177 = arith.constant 0 : index
    %262 = vector.load %arg5[%c6_174, %c2_175, %c0_176, %c0_177] : memref<7x3x8x8xf32, #tpu.memory_space<vmem>>, vector<1x1x8x8xf32>
    %263 = vector.shape_cast %262 : vector<1x1x8x8xf32> to vector<8x8xf32>
    %cst_178 = arith.constant dense<0.000000e+00> : vector<8x8xf32>
    %264 = tpu.matmul %17, %257, %cst_178 {dimension_numbers = #tpu.dot_dimension_numbers<[1], [0], [0], [1], [0, 0, 1, 1], [], []>} : vector<8x8xf32>, vector<8x8xf32>, vector<8x8xf32> -> vector<8x8xf32>
    %c0_179 = arith.constant 0 : index
    %c2_180 = arith.constant 2 : index
    %c0_181 = arith.constant 0 : index
    %c0_182 = arith.constant 0 : index
    %265 = vector.load %arg6[%c0_179, %c2_180, %c0_181, %c0_182] : memref<3x3x1x8xf32, #tpu.memory_space<vmem>>, vector<1x1x1x8xf32>
    %266 = vector.shape_cast %265 : vector<1x1x1x8xf32> to vector<1x8xf32>
    %267 = vector.broadcast %266 : vector<1x8xf32> to vector<8x8xf32>
    %268 = arith.addf %264, %267 : vector<8x8xf32>
    %cst_183 = arith.constant dense<0.000000e+00> : vector<8x8xf32>
    %269 = tpu.matmul %17, %259, %cst_183 {dimension_numbers = #tpu.dot_dimension_numbers<[1], [0], [0], [1], [0, 0, 1, 1], [], []>} : vector<8x8xf32>, vector<8x8xf32>, vector<8x8xf32> -> vector<8x8xf32>
    %c1_184 = arith.constant 1 : index
    %c2_185 = arith.constant 2 : index
    %c0_186 = arith.constant 0 : index
    %c0_187 = arith.constant 0 : index
    %270 = vector.load %arg6[%c1_184, %c2_185, %c0_186, %c0_187] : memref<3x3x1x8xf32, #tpu.memory_space<vmem>>, vector<1x1x1x8xf32>
    %271 = vector.shape_cast %270 : vector<1x1x1x8xf32> to vector<1x8xf32>
    %272 = vector.broadcast %271 : vector<1x8xf32> to vector<8x8xf32>
    %273 = arith.addf %269, %272 : vector<8x8xf32>
    %cst_188 = arith.constant dense<0.000000e+00> : vector<8x8xf32>
    %274 = tpu.matmul %17, %261, %cst_188 {dimension_numbers = #tpu.dot_dimension_numbers<[1], [0], [0], [1], [0, 0, 1, 1], [], []>} : vector<8x8xf32>, vector<8x8xf32>, vector<8x8xf32> -> vector<8x8xf32>
    %c2_189 = arith.constant 2 : index
    %c2_190 = arith.constant 2 : index
    %c0_191 = arith.constant 0 : index
    %c0_192 = arith.constant 0 : index
    %275 = vector.load %arg6[%c2_189, %c2_190, %c0_191, %c0_192] : memref<3x3x1x8xf32, #tpu.memory_space<vmem>>, vector<1x1x1x8xf32>
    %276 = vector.shape_cast %275 : vector<1x1x1x8xf32> to vector<1x8xf32>
    %277 = vector.broadcast %276 : vector<1x8xf32> to vector<8x8xf32>
    %278 = arith.addf %274, %277 : vector<8x8xf32>
    %cst_193 = arith.constant dense<0.000000e+00> : vector<48x8xf32>
    %279 = tpu.matmul %6, %273, %cst_193 {dimension_numbers = #tpu.dot_dimension_numbers<[1], [0], [0], [1], [0, 0, 1, 1], [], []>} : vector<48x8xf32>, vector<8x8xf32>, vector<48x8xf32> -> vector<48x8xf32>
    %cst_194 = arith.constant dense<0.000000e+00> : vector<48x8xf32>
    %280 = tpu.matmul %6, %278, %cst_194 {dimension_numbers = #tpu.dot_dimension_numbers<[1], [0], [0], [1], [0, 0, 1, 1], [], []>} : vector<48x8xf32>, vector<8x8xf32>, vector<48x8xf32> -> vector<48x8xf32>
    %cst_195 = arith.constant dense<0.000000e+00> : vector<32x8xf32>
    %281 = tpu.matmul %1, %251, %cst_195 {dimension_numbers = #tpu.dot_dimension_numbers<[1], [0], [0], [1], [0, 0, 1, 1], [], []>} : vector<32x8xf32>, vector<8x8xf32>, vector<32x8xf32> -> vector<32x8xf32>
    %cst_196 = arith.constant dense<0.000000e+00> : vector<192x8xf32>
    %282 = tpu.matmul %3, %253, %cst_196 {dimension_numbers = #tpu.dot_dimension_numbers<[1], [0], [0], [1], [0, 0, 1, 1], [], []>} : vector<192x8xf32>, vector<8x8xf32>, vector<192x8xf32> -> vector<192x8xf32>
    %cst_197 = arith.constant dense<0.000000e+00> : vector<192x8xf32>
    %283 = tpu.matmul %3, %255, %cst_197 {dimension_numbers = #tpu.dot_dimension_numbers<[1], [0], [0], [1], [0, 0, 1, 1], [], []>} : vector<192x8xf32>, vector<8x8xf32>, vector<192x8xf32> -> vector<192x8xf32>
    %284 = vector.extract_strided_slice %281 {offsets = [0, 0], sizes = [8, 8], strides = [1, 1]} : vector<32x8xf32> to vector<8x8xf32>
    %285 = arith.addf %284, %268 : vector<8x8xf32>
    %cst_198 = arith.constant 0.353553385 : f32
    %286 = vector.broadcast %cst_198 : f32 to vector<8x8xf32>
    %287 = arith.mulf %285, %286 : vector<8x8xf32>
    %288 = vector.extract_strided_slice %282 {offsets = [0, 0], sizes = [48, 8], strides = [1, 1]} : vector<192x8xf32> to vector<48x8xf32>
    %289 = arith.addf %288, %279 : vector<48x8xf32>
    %290 = vector.extract_strided_slice %283 {offsets = [0, 0], sizes = [48, 8], strides = [1, 1]} : vector<192x8xf32> to vector<48x8xf32>
    %291 = arith.addf %290, %280 : vector<48x8xf32>
    %cst_199 = arith.constant dense<0.000000e+00> : vector<8x48xf32>
    %292 = tpu.matmul %287, %289, %cst_199 {dimension_numbers = #tpu.dot_dimension_numbers<[1], [1], [0], [0], [0, 0, 1, 0], [], []>} : vector<8x8xf32>, vector<48x8xf32>, vector<8x48xf32> -> vector<8x48xf32>
    %cst_200 = arith.constant dense<0xFF800000> : vector<8xf32>
    %293 = vector.multi_reduction <maximumf>, %292, %cst_200 [1] : vector<8x48xf32> to vector<8xf32>
    %294 = vector.shape_cast %293 : vector<8xf32> to vector<8x1xf32>
    %295 = vector.broadcast %294 : vector<8x1xf32> to vector<8x48xf32>
    %296 = arith.subf %292, %295 : vector<8x48xf32>
    %297 = math.exp %296 : vector<8x48xf32>
    %cst_201 = arith.constant dense<0.000000e+00> : vector<8xf32>
    %298 = vector.multi_reduction <add>, %297, %cst_201 [1] : vector<8x48xf32> to vector<8xf32>
    %299 = vector.shape_cast %298 : vector<8xf32> to vector<8x1xf32>
    %300 = vector.broadcast %299 : vector<8x1xf32> to vector<8x48xf32>
    %301 = arith.divf %297, %300 : vector<8x48xf32>
    %cst_202 = arith.constant dense<0.000000e+00> : vector<8x8xf32>
    %302 = tpu.matmul %301, %291, %cst_202 {dimension_numbers = #tpu.dot_dimension_numbers<[1], [0], [0], [1], [0, 0, 1, 1], [], []>} : vector<8x48xf32>, vector<48x8xf32>, vector<8x8xf32> -> vector<8x8xf32>
    %cst_203 = arith.constant dense<0.000000e+00> : vector<8x8xf32>
    %303 = tpu.matmul %302, %263, %cst_203 {dimension_numbers = #tpu.dot_dimension_numbers<[1], [0], [0], [1], [0, 0, 1, 1], [], []>} : vector<8x8xf32>, vector<8x8xf32>, vector<8x8xf32> -> vector<8x8xf32>
    %304 = arith.addf %186, %303 : vector<8x8xf32>
    %305 = vector.extract_strided_slice %281 {offsets = [8, 0], sizes = [8, 8], strides = [1, 1]} : vector<32x8xf32> to vector<8x8xf32>
    %306 = arith.addf %305, %268 : vector<8x8xf32>
    %cst_204 = arith.constant 0.353553385 : f32
    %307 = vector.broadcast %cst_204 : f32 to vector<8x8xf32>
    %308 = arith.mulf %306, %307 : vector<8x8xf32>
    %309 = vector.extract_strided_slice %282 {offsets = [48, 0], sizes = [48, 8], strides = [1, 1]} : vector<192x8xf32> to vector<48x8xf32>
    %310 = arith.addf %309, %279 : vector<48x8xf32>
    %311 = vector.extract_strided_slice %283 {offsets = [48, 0], sizes = [48, 8], strides = [1, 1]} : vector<192x8xf32> to vector<48x8xf32>
    %312 = arith.addf %311, %280 : vector<48x8xf32>
    %cst_205 = arith.constant dense<0.000000e+00> : vector<8x48xf32>
    %313 = tpu.matmul %308, %310, %cst_205 {dimension_numbers = #tpu.dot_dimension_numbers<[1], [1], [0], [0], [0, 0, 1, 0], [], []>} : vector<8x8xf32>, vector<48x8xf32>, vector<8x48xf32> -> vector<8x48xf32>
    %cst_206 = arith.constant dense<0xFF800000> : vector<8xf32>
    %314 = vector.multi_reduction <maximumf>, %313, %cst_206 [1] : vector<8x48xf32> to vector<8xf32>
    %315 = vector.shape_cast %314 : vector<8xf32> to vector<8x1xf32>
    %316 = vector.broadcast %315 : vector<8x1xf32> to vector<8x48xf32>
    %317 = arith.subf %313, %316 : vector<8x48xf32>
    %318 = math.exp %317 : vector<8x48xf32>
    %cst_207 = arith.constant dense<0.000000e+00> : vector<8xf32>
    %319 = vector.multi_reduction <add>, %318, %cst_207 [1] : vector<8x48xf32> to vector<8xf32>
    %320 = vector.shape_cast %319 : vector<8xf32> to vector<8x1xf32>
    %321 = vector.broadcast %320 : vector<8x1xf32> to vector<8x48xf32>
    %322 = arith.divf %318, %321 : vector<8x48xf32>
    %cst_208 = arith.constant dense<0.000000e+00> : vector<8x8xf32>
    %323 = tpu.matmul %322, %312, %cst_208 {dimension_numbers = #tpu.dot_dimension_numbers<[1], [0], [0], [1], [0, 0, 1, 1], [], []>} : vector<8x48xf32>, vector<48x8xf32>, vector<8x8xf32> -> vector<8x8xf32>
    %cst_209 = arith.constant dense<0.000000e+00> : vector<8x8xf32>
    %324 = tpu.matmul %323, %263, %cst_209 {dimension_numbers = #tpu.dot_dimension_numbers<[1], [0], [0], [1], [0, 0, 1, 1], [], []>} : vector<8x8xf32>, vector<8x8xf32>, vector<8x8xf32> -> vector<8x8xf32>
    %325 = arith.addf %207, %324 : vector<8x8xf32>
    %326 = vector.extract_strided_slice %281 {offsets = [16, 0], sizes = [8, 8], strides = [1, 1]} : vector<32x8xf32> to vector<8x8xf32>
    %327 = arith.addf %326, %268 : vector<8x8xf32>
    %cst_210 = arith.constant 0.353553385 : f32
    %328 = vector.broadcast %cst_210 : f32 to vector<8x8xf32>
    %329 = arith.mulf %327, %328 : vector<8x8xf32>
    %330 = vector.extract_strided_slice %282 {offsets = [96, 0], sizes = [48, 8], strides = [1, 1]} : vector<192x8xf32> to vector<48x8xf32>
    %331 = arith.addf %330, %279 : vector<48x8xf32>
    %332 = vector.extract_strided_slice %283 {offsets = [96, 0], sizes = [48, 8], strides = [1, 1]} : vector<192x8xf32> to vector<48x8xf32>
    %333 = arith.addf %332, %280 : vector<48x8xf32>
    %cst_211 = arith.constant dense<0.000000e+00> : vector<8x48xf32>
    %334 = tpu.matmul %329, %331, %cst_211 {dimension_numbers = #tpu.dot_dimension_numbers<[1], [1], [0], [0], [0, 0, 1, 0], [], []>} : vector<8x8xf32>, vector<48x8xf32>, vector<8x48xf32> -> vector<8x48xf32>
    %cst_212 = arith.constant dense<0xFF800000> : vector<8xf32>
    %335 = vector.multi_reduction <maximumf>, %334, %cst_212 [1] : vector<8x48xf32> to vector<8xf32>
    %336 = vector.shape_cast %335 : vector<8xf32> to vector<8x1xf32>
    %337 = vector.broadcast %336 : vector<8x1xf32> to vector<8x48xf32>
    %338 = arith.subf %334, %337 : vector<8x48xf32>
    %339 = math.exp %338 : vector<8x48xf32>
    %cst_213 = arith.constant dense<0.000000e+00> : vector<8xf32>
    %340 = vector.multi_reduction <add>, %339, %cst_213 [1] : vector<8x48xf32> to vector<8xf32>
    %341 = vector.shape_cast %340 : vector<8xf32> to vector<8x1xf32>
    %342 = vector.broadcast %341 : vector<8x1xf32> to vector<8x48xf32>
    %343 = arith.divf %339, %342 : vector<8x48xf32>
    %cst_214 = arith.constant dense<0.000000e+00> : vector<8x8xf32>
    %344 = tpu.matmul %343, %333, %cst_214 {dimension_numbers = #tpu.dot_dimension_numbers<[1], [0], [0], [1], [0, 0, 1, 1], [], []>} : vector<8x48xf32>, vector<48x8xf32>, vector<8x8xf32> -> vector<8x8xf32>
    %cst_215 = arith.constant dense<0.000000e+00> : vector<8x8xf32>
    %345 = tpu.matmul %344, %263, %cst_215 {dimension_numbers = #tpu.dot_dimension_numbers<[1], [0], [0], [1], [0, 0, 1, 1], [], []>} : vector<8x8xf32>, vector<8x8xf32>, vector<8x8xf32> -> vector<8x8xf32>
    %346 = arith.addf %228, %345 : vector<8x8xf32>
    %347 = vector.extract_strided_slice %281 {offsets = [24, 0], sizes = [8, 8], strides = [1, 1]} : vector<32x8xf32> to vector<8x8xf32>
    %348 = arith.addf %347, %268 : vector<8x8xf32>
    %cst_216 = arith.constant 0.353553385 : f32
    %349 = vector.broadcast %cst_216 : f32 to vector<8x8xf32>
    %350 = arith.mulf %348, %349 : vector<8x8xf32>
    %351 = vector.extract_strided_slice %282 {offsets = [144, 0], sizes = [48, 8], strides = [1, 1]} : vector<192x8xf32> to vector<48x8xf32>
    %352 = arith.addf %351, %279 : vector<48x8xf32>
    %353 = vector.extract_strided_slice %283 {offsets = [144, 0], sizes = [48, 8], strides = [1, 1]} : vector<192x8xf32> to vector<48x8xf32>
    %354 = arith.addf %353, %280 : vector<48x8xf32>
    %cst_217 = arith.constant dense<0.000000e+00> : vector<8x48xf32>
    %355 = tpu.matmul %350, %352, %cst_217 {dimension_numbers = #tpu.dot_dimension_numbers<[1], [1], [0], [0], [0, 0, 1, 0], [], []>} : vector<8x8xf32>, vector<48x8xf32>, vector<8x48xf32> -> vector<8x48xf32>
    %cst_218 = arith.constant dense<0xFF800000> : vector<8xf32>
    %356 = vector.multi_reduction <maximumf>, %355, %cst_218 [1] : vector<8x48xf32> to vector<8xf32>
    %357 = vector.shape_cast %356 : vector<8xf32> to vector<8x1xf32>
    %358 = vector.broadcast %357 : vector<8x1xf32> to vector<8x48xf32>
    %359 = arith.subf %355, %358 : vector<8x48xf32>
    %360 = math.exp %359 : vector<8x48xf32>
    %cst_219 = arith.constant dense<0.000000e+00> : vector<8xf32>
    %361 = vector.multi_reduction <add>, %360, %cst_219 [1] : vector<8x48xf32> to vector<8xf32>
    %362 = vector.shape_cast %361 : vector<8xf32> to vector<8x1xf32>
    %363 = vector.broadcast %362 : vector<8x1xf32> to vector<8x48xf32>
    %364 = arith.divf %360, %363 : vector<8x48xf32>
    %cst_220 = arith.constant dense<0.000000e+00> : vector<8x8xf32>
    %365 = tpu.matmul %364, %354, %cst_220 {dimension_numbers = #tpu.dot_dimension_numbers<[1], [0], [0], [1], [0, 0, 1, 1], [], []>} : vector<8x48xf32>, vector<48x8xf32>, vector<8x8xf32> -> vector<8x8xf32>
    %cst_221 = arith.constant dense<0.000000e+00> : vector<8x8xf32>
    %366 = tpu.matmul %365, %263, %cst_221 {dimension_numbers = #tpu.dot_dimension_numbers<[1], [0], [0], [1], [0, 0, 1, 1], [], []>} : vector<8x8xf32>, vector<8x8xf32>, vector<8x8xf32> -> vector<8x8xf32>
    %367 = arith.addf %249, %366 : vector<8x8xf32>
    %c0_222 = arith.constant 0 : index
    %c0_223 = arith.constant 0 : index
    %368 = vector.load %arg7[%c0_222, %c0_223] : memref<1x8xf32, #tpu.memory_space<vmem>>, vector<1x8xf32>
    %369 = vector.broadcast %368 : vector<1x8xf32> to vector<8x8xf32>
    %370 = arith.addf %304, %369 : vector<8x8xf32>
    %c0_224 = arith.constant 0 : index
    %c0_225 = arith.constant 0 : index
    %c0_226 = arith.constant 0 : index
    %371 = vector.load %arg8[%c0_224, %c0_225, %c0_226] : memref<1x32x8xf32, #tpu.memory_space<vmem>>, vector<1x8x8xf32>
    %372 = vector.shape_cast %371 : vector<1x8x8xf32> to vector<8x8xf32>
    %373 = vector.shape_cast %370 : vector<8x8xf32> to vector<1x8x8xf32>
    tpu.vector_store %arg8[%c0_224, %c0_225, %c0_226], %373 {strides = array<i32>} : memref<1x32x8xf32, #tpu.memory_space<vmem>>, vector<1x8x8xf32>,
    %374 = vector.broadcast %368 : vector<1x8xf32> to vector<8x8xf32>
    %375 = arith.addf %325, %374 : vector<8x8xf32>
    %c0_227 = arith.constant 0 : index
    %c8 = arith.constant 8 : index
    %c0_228 = arith.constant 0 : index
    %376 = vector.load %arg8[%c0_227, %c8, %c0_228] : memref<1x32x8xf32, #tpu.memory_space<vmem>>, vector<1x8x8xf32>
    %377 = vector.shape_cast %376 : vector<1x8x8xf32> to vector<8x8xf32>
    %378 = vector.shape_cast %375 : vector<8x8xf32> to vector<1x8x8xf32>
    tpu.vector_store %arg8[%c0_227, %c8, %c0_228], %378 {strides = array<i32>} : memref<1x32x8xf32, #tpu.memory_space<vmem>>, vector<1x8x8xf32>,
    %379 = vector.broadcast %368 : vector<1x8xf32> to vector<8x8xf32>
    %380 = arith.addf %346, %379 : vector<8x8xf32>
    %c0_229 = arith.constant 0 : index
    %c16 = arith.constant 16 : index
    %c0_230 = arith.constant 0 : index
    %381 = vector.load %arg8[%c0_229, %c16, %c0_230] : memref<1x32x8xf32, #tpu.memory_space<vmem>>, vector<1x8x8xf32>
    %382 = vector.shape_cast %381 : vector<1x8x8xf32> to vector<8x8xf32>
    %383 = vector.shape_cast %380 : vector<8x8xf32> to vector<1x8x8xf32>
    tpu.vector_store %arg8[%c0_229, %c16, %c0_230], %383 {strides = array<i32>} : memref<1x32x8xf32, #tpu.memory_space<vmem>>, vector<1x8x8xf32>,
    %384 = vector.broadcast %368 : vector<1x8xf32> to vector<8x8xf32>
    %385 = arith.addf %367, %384 : vector<8x8xf32>
    %c0_231 = arith.constant 0 : index
    %c24 = arith.constant 24 : index
    %c0_232 = arith.constant 0 : index
    %386 = vector.load %arg8[%c0_231, %c24, %c0_232] : memref<1x32x8xf32, #tpu.memory_space<vmem>>, vector<1x8x8xf32>
    %387 = vector.shape_cast %386 : vector<1x8x8xf32> to vector<8x8xf32>
    %388 = vector.shape_cast %385 : vector<8x8xf32> to vector<1x8x8xf32>
    tpu.vector_store %arg8[%c0_231, %c24, %c0_232], %388 {strides = array<i32>} : memref<1x32x8xf32, #tpu.memory_space<vmem>>, vector<1x8x8xf32>,
    return
  }
  func.func @transform_0(%arg0: i32) -> (i32, i32, i32) {
    %c0_i32 = arith.constant 0 : i32
    %c0_i32_0 = arith.constant 0 : i32
    %c0_i32_1 = arith.constant 0 : i32
    return %arg0, %c0_i32, %c0_i32_0 : i32, i32, i32
  }
  func.func @transform_1(%arg0: i32) -> (i32, i32, i32) {
    %c0_i32 = arith.constant 0 : i32
    %c0_i32_0 = arith.constant 0 : i32
    %c0_i32_1 = arith.constant 0 : i32
    return %arg0, %c0_i32, %c0_i32_0 : i32, i32, i32
  }
  func.func @transform_2(%arg0: i32) -> (i32, i32, i32) {
    %c0_i32 = arith.constant 0 : i32
    %c0_i32_0 = arith.constant 0 : i32
    %c0_i32_1 = arith.constant 0 : i32
    return %arg0, %c0_i32, %c0_i32_0 : i32, i32, i32
  }
  func.func @transform_3(%arg0: i32) -> (i32, i32) {
    %c0_i32 = arith.constant 0 : i32
    %c0_i32_0 = arith.constant 0 : i32
    %c0_i32_1 = arith.constant 0 : i32
    return %c0_i32, %c0_i32_0 : i32, i32
  }
  func.func @transform_4(%arg0: i32) -> (i32, i32, i32, i32) {
    %c0_i32 = arith.constant 0 : i32
    %c0_i32_0 = arith.constant 0 : i32
    %c0_i32_1 = arith.constant 0 : i32
    %c0_i32_2 = arith.constant 0 : i32
    %c0_i32_3 = arith.constant 0 : i32
    return %c0_i32, %c0_i32_0, %c0_i32_1, %c0_i32_2 : i32, i32, i32, i32
  }
  func.func @transform_5(%arg0: i32) -> (i32, i32, i32, i32) {
    %c0_i32 = arith.constant 0 : i32
    %c0_i32_0 = arith.constant 0 : i32
    %c0_i32_1 = arith.constant 0 : i32
    %c0_i32_2 = arith.constant 0 : i32
    %c0_i32_3 = arith.constant 0 : i32
    return %c0_i32, %c0_i32_0, %c0_i32_1, %c0_i32_2 : i32, i32, i32, i32
  }
  func.func @transform_6(%arg0: i32) -> (i32, i32) {
    %c0_i32 = arith.constant 0 : i32
    %c0_i32_0 = arith.constant 0 : i32
    %c0_i32_1 = arith.constant 0 : i32
    return %c0_i32, %c0_i32_0 : i32, i32
  }
  func.func @transform_7(%arg0: i32) -> (i32, i32, i32) {
    %c0_i32 = arith.constant 0 : i32
    %c0_i32_0 = arith.constant 0 : i32
    %c0_i32_1 = arith.constant 0 : i32
    return %arg0, %c0_i32, %c0_i32_0 : i32, i32, i32
  }
}

</mosaic_0001>

<bundles_post_ra>
// kernel: tpu_custom_call.1
= control target key start
LH: loop header
LB: loop body
LE: loop exit
PB: predicated region body
PF: predicated region fallthrough
CT: control target
= control target key end

     0   :  { %s8352_s24 = smov 0   ;;  %s10176_s0 = inlined_call_operand.vmem [shape: f32[2,32,8], index: 0, kind: input, shape index: {}]   ;;  %s10177_s1 = inlined_call_operand.vmem [shape: f32[2,192,8], index: 1, kind: input, shape index: {}]   ;;  %s10178_s2 = inlined_call_operand.vmem [shape: f32[2,8,8], index: 2, kind: input, shape index: {}]   ;;  %s10179_s3 = inlined_call_operand.vmem [shape: f32[48,8], index: 3, kind: input, shape index: {}]   ;;  %s10180_s4 = inlined_call_operand.vmem [shape: f32[7,3,8,8], index: 4, kind: input, shape index: {}]   ;;  %s10181_s5 = inlined_call_operand.vmem [shape: f32[3,3,1,8], index: 5, kind: input, shape index: {}]   ;;  %s10182_s6 = inlined_call_operand.vmem [shape: f32[1,8], index: 6, kind: input, shape index: {}]   ;;  %s10183_s7 = inlined_call_operand.vmem [shape: f32[2,32,8], index: 7, kind: output, shape index: {}]  }
   0x1 LB: > { %s6387_s25 = sadd.s32 4294967295, %s8307_s24   ;;  %p6391_p0 = scmp.ge.s32.totalorder %s8307_s24, 1  ;;  %s8307_s24 = sphi %s8352_s24, %s17_s24  }
   0x2   : > { %p256_p1 = scmp.lt.s32.totalorder %s8307_s24, 3 }
   0x4   : > { %p257_p2 = pnand %p6391_p0, %p256_p1 }
   0x6   : > { %260 = sbr.rel (%p257_p2) target bundleno = 9192 (0x23e8), region = 48 }
   0xd   : > { %v6400_v0 = vld [vmem:[%s10180_s4 + $0x48] sm:$0xff]  ;;  %v6402_v1 = vld [vmem:[%s10180_s4 + $0x78] sm:$0xff]  ;;  %p297_p3 = scmp.lt.s32.totalorder %s6387_s25, 1  ;;  %v10184_v2 = vmov 0.0   ;;  %vm8310_vm0 = vmmov 0   ;;  %vm381_vm2 = vcmask 64512  }
   0xe   : > { %7166 = vmatprep.subr.mxu1 %v10184_v2  ;;  %7176 = vmatprep.subr.mxu0 %v10184_v2  ;;  %v6401_v13 = vld [vmem:[%s10180_s4 + $0x60] sm:$0xff]  ;;  %v8412_v22 = vld [vmem:[%s10179_s3 + $0x8] sm:$0xff]  ;;  %v6398_v23 = vld [vmem:[%s10180_s4 + $0x18] sm:$0xff]  ;;  %v10189_v61 = vmov 0.0|0.0   ;;  %vm1463_vm4 = vcmask 392192  }
   0xf   : > { %7167 = vmatpush3.msra.mxu1 %v6400_v0  ;;  %7168 = vmatprep.mubr.msk.f32.mxu1 %vm8310_vm0, %v10184_v2  ;;  %s10323_s25 = smov (!%p297_p3, %s6387_s25), 1  ;;  %v8395_v14 = vld [vmem:[%s10179_s3] sm:$0xff]  ;;  %v8420_v24 = vld [vmem:[%s10179_s3 + $0x10] sm:$0xff]  ;;  %v8430_v28 = vld [vmem:[%s10179_s3 + $0x18] sm:$0xff] }
  0x10   : > { %7177 = vmatpush3.msra.mxu0 %v6402_v1  ;;  %7178 = vmatprep.mubr.msk.f32.mxu0 %vm8310_vm0, %v10184_v2  ;;  %s6395_s30 = sshll.u32 %s10323_s25, 3  ;;  %v6410_v15 = vld [vmem:[%s10181_s5 + $0x6] ss:$0 sm:$0xff]  ;;  %v6407_v21 = vld [vmem:[%s10181_s5 + $0x3] ss:$0 sm:$0xff]  ;;  %s8201_s27 = smul.u32 192, %s10323_s25  ;;  %vm8703_vm3 = vmpackc.low %vm381_vm2, %vm381_vm2 }
  0x11   : > { %7171 = vmatprep.subr.mxu1 %v10184_v2  ;;  %s310_s10 = scalar_lea.vmem %s10178_s2, %s6395_s30  ;;  %v8435_v29 = vld [vmem:[%s10179_s3 + $0x20] sm:$0xff]  ;;  %s6747_s14 = sshll.u32 %s10323_s25, 5  ;;  %v8457_v31 = vld [vmem:[%s10179_s3 + $0x28] sm:$0xff]  ;;  %v6399_v33 = vld [vmem:[%s10180_s4 + $0x30] sm:$0xff] }
  0x12   : > { %v344_v3 = vld [vmem:[%s310_s10] sm:$0xff]  ;;  %s8440_s11 = scalar_lea.vmem %s10177_s1, %s8201_s27  ;;  %s8467_s19 = scalar_lea.vmem %s10176_s0, %s6747_s14 }
  0x13   : > { %v352_v4 = vmin.f32 %v344_v3, 20.0  ;;  %vm351_vm1 = vcmp.gt.f32.partialorder %v344_v3, 20.0  ;;  %v361_v30 = vld [vmem:[%s10180_s4] sm:$0xff]  ;;  %v8481_v34 = vld [vmem:[%s8440_s11 + $0x8] sm:$0xff]  ;;  %v8487_v36 = vld [vmem:[%s8440_s11 + $0x10] sm:$0xff]  ;;  %s10076_s28 = scalar_lea.vmem %s10183_s7, %s6747_s14 }
  0x14   : > { %v8460_v32 = vld [vmem:[%s8440_s11] sm:$0xff]  ;;  %v8498_v37 = vld [vmem:[%s8467_s19 + $0x8] sm:$0xff]  ;;  %v8501_v38 = vld [vmem:[%s8440_s11 + $0x18] sm:$0xff] }
  0x15   : > { %v353_v5 = vmul.f32 1.442695, %v352_v4  ;;  %v8484_v35 = vld [vmem:[%s8467_s19] sm:$0xff]  ;;  %10233 = vst [vmem:[#allocation4_spill] sm:$0xff] %v8498_v37  ;;  %v8504_v39 = vld [vmem:[%s8467_s19 + $0x10] sm:$0xff]  ;;  %v8518_v41 = vld [vmem:[%s8467_s19 + $0x18] sm:$0xff] }
  0x16   : > { %10232 = vst [vmem:[#allocation3_spill] sm:$0xff] %v8484_v35  ;;  %10234 = vst [vmem:[#allocation5_spill] sm:$0xff] %v8504_v39  ;;  %v8507_v40 = vld [vmem:[%s8440_s11 + $0x20] sm:$0xff]  ;;  %v8521_v42 = vld [vmem:[%s8440_s11 + $0x28] sm:$0xff] }
  0x17   : > { %8213 = vpow2.f32 %v353_v5  ;;  %10235 = vst [vmem:[#allocation6_spill] sm:$0xff] %v8518_v41  ;;  %v8524_v43 = vld [vmem:[%s8440_s11 + $0x30] sm:$0xff]  ;;  %v8535_v44 = vld [vmem:[%s8440_s11 + $0x38] sm:$0xff]  ;;  %v8538_v45 = vld [vmem:[%s8440_s11 + $0x40] sm:$0xff] }
  0x18   : > { %v8549_v46 = vld [vmem:[%s8440_s11 + $0x48] sm:$0xff]  ;;  %v8552_v47 = vld [vmem:[%s8440_s11 + $0x50] sm:$0xff]  ;;  %v8563_v48 = vld [vmem:[%s8440_s11 + $0x58] sm:$0xff] }
  0x19   : > { %10236 = vst [vmem:[#allocation7_spill] sm:$0xff] %v8552_v47  ;;  %10237 = vst [vmem:[#allocation8_spill] sm:$0xff] %v8563_v48  ;;  %v8566_v49 = vld [vmem:[%s8440_s11 + $0x60] sm:$0xff]  ;;  %v8577_v50 = vld [vmem:[%s8440_s11 + $0x68] sm:$0xff] }
  0x1a   : > { %10238 = vst [vmem:[#allocation9_spill] sm:$0xff] %v8566_v49  ;;  %10239 = vst [vmem:[#allocation10_spill] sm:$0xff] %v8577_v50  ;;  %v8580_v51 = vld [vmem:[%s8440_s11 + $0x70] sm:$0xff]  ;;  %v8591_v52 = vld [vmem:[%s8440_s11 + $0x78] sm:$0xff] }
  0x1b   : > { %10240 = vst [vmem:[#allocation11_spill] sm:$0xff] %v8580_v51  ;;  %10241 = vst [vmem:[#allocation12_spill] sm:$0xff] %v8591_v52  ;;  %v8594_v53 = vld [vmem:[%s8440_s11 + $0x80] sm:$0xff]  ;;  %v8605_v54 = vld [vmem:[%s8440_s11 + $0x88] sm:$0xff] }
  0x1c   : > { %10242 = vst [vmem:[#allocation13_spill] sm:$0xff] %v8594_v53  ;;  %10243 = vst [vmem:[#allocation14_spill] sm:$0xff] %v8605_v54  ;;  %v8608_v55 = vld [vmem:[%s8440_s11 + $0x90] sm:$0xff]  ;;  %v8619_v56 = vld [vmem:[%s8440_s11 + $0x98] sm:$0xff] }
  0x1d   : > { %10244 = vst [vmem:[#allocation15_spill] sm:$0xff] %v8608_v55  ;;  %10245 = vst [vmem:[#allocation16_spill] sm:$0xff] %v8619_v56  ;;  %v8622_v57 = vld [vmem:[%s8440_s11 + $0xa0] sm:$0xff]  ;;  %v8633_v58 = vld [vmem:[%s8440_s11 + $0xa8] sm:$0xff] }
  0x1e   : > { %10246 = vst [vmem:[#allocation17_spill] sm:$0xff] %v8622_v57  ;;  %10247 = vst [vmem:[#allocation18_spill] sm:$0xff] %v8633_v58  ;;  %v8636_v59 = vld [vmem:[%s8440_s11 + $0xb0] sm:$0xff]  ;;  %v8647_v60 = vld [vmem:[%s8440_s11 + $0xb8] sm:$0xff] }
  0x1f   : > { %10248 = vst [vmem:[#allocation19_spill] sm:$0xff] %v8636_v59  ;;  %10249 = vst [vmem:[#allocation20_spill] sm:$0xff] %v8647_v60 }
  0x21   : > { %v8214_v6 = vpop.eup %8213 }
  0x22   : > { %v355_v7 = vadd.f32 1.0, %v8214_v6 }
  0x24   : > { %8215 = vlog2.f32 %v355_v7 }
  0x2e   : > { %v8216_v8 = vpop.eup %8215 }
  0x2f   : > { %v357_v9 = vmul.f32 0.6931472, %v8216_v8 }
  0x31   : > { %v358_v10 = vsel %vm351_vm1, %v344_v3, %v357_v9  ;;  %v6404_v9 = vld [vmem:[%s10181_s5] ss:$0 sm:$0xff] }
  0x32   : > { %8217 = vtanh.f32 %v358_v10 }
  0x3c   : > { %v8218_v11 = vpop.eup %8217 }
  0x3d   : > { %v8379_v12 = vmul.f32 %v8218_v11, %v344_v3 }
  0x3f   : > { %10231 = vst [vmem:[#allocation2_spill] sm:$0xff] %v8379_v12  ;;  %7169 = vmatmul.mubr.msk.f32.vlgmr.msra.gmra.mrb[0].mxu1 %vm381_vm2, %v8379_v12  ;;  %7179 = vmatmul.mubr.msk.f32.vlgmr.msra.gmra.mrb[0].mxu0 %vm381_vm2, %v8379_v12 }
  0x40   : > { %7172 = vmatpush3.msra.mxu1 %v6401_v13  ;;  %7173 = vmatprep.mubr.msk.f32.mxu1 %vm8310_vm0, %v10184_v2 }
  0x41   : > { %7194 = vmatprep.mubr.msk.f32.mxu0 %vm381_vm2, %v8395_v14 }
  0x43   : > { %7174 = vmatmul.mubr.msk.f32.vlgmr.msra.gmra.mrb[2].mxu1 %vm381_vm2, %v8379_v12 }
  0x44   : > { %7183 = vmatprep.mubr.msk.f32.mxu1 %vm381_vm2, %v8395_v14 }
 0x112   : > { %v607_v16 = vpop.f32.mrb[0].mxu0  ;;  %v8404_v17 = vpop.f32.mrb[0].mxu1 }
 0x113   : > { %v608_v18 = vadd.f32 %v6410_v15, %v607_v16  ;;  %v7180_v19 = vpop.f32.mrb[1].mxu0  ;;  %v7170_v20 = vpop.f32.mrb[1].mxu1 }
 0x114   : > { %v452_v19 = vadd.f32 %v6404_v9, %v8404_v17  ;;  %v10250_v20 = vmov 0 }
 0x115   : > { %7192 = vmatprep.subr.mxu0 %v608_v18  ;;  %v10251_v20 = vsel %vm8703_vm3, 4294967295, %v10250_v20 }
 0x116   : > { %v529_v25 = vpop.f32.mrb[2].mxu1  ;;  %7193 = vmatpush3.msra.mxu0 %v608_v18  ;;  %10252 = vst [vmem:[#allocation21_spill] sm:$0xff] %v10251_v20 }
 0x117   : > { %v530_v26 = vadd.f32 %v6407_v21, %v529_v25  ;;  %7195 = vmatmul.mubr.msk.f32.vlgmr.msra.gmra.mrb[2].mxu0 %vm381_vm2, %v8412_v22  ;;  %v7175_v27 = vpop.f32.mrb[3].mxu1  ;;  %7211 = vmatprep.subr.mxu0 %v6398_v23 }
 0x118   : > { %7197 = vmatprep.mubr.msk.f32.mxu0 %vm381_vm2, %v8420_v24  ;;  %7212 = vmatpush3.msra.mxu0 %v6398_v23 }
 0x119   : > { %7181 = vmatprep.subr.mxu1 %v530_v26  ;;  %7949 = vmatprep.subr.bf16.mxu0 %v10189_v61 }
 0x11a   : > { %7182 = vmatpush3.msra.mxu1 %v530_v26 }
 0x11b   : > { %7184 = vmatmul.mubr.msk.f32.vlgmr.msra.gmra.mrb[4].mxu1 %vm381_vm2, %v8412_v22  ;;  %7198 = vmatmul.mubr.msk.f32.gmra.mrb[4].mxu0 %vm381_vm2, %v8430_v28 }
 0x11c   : > { %7186 = vmatprep.mubr.msk.f32.mxu1 %vm381_vm2, %v8420_v24  ;;  %7200 = vmatprep.mubr.msk.f32.mxu0 %vm381_vm2, %v8435_v29 }
 0x11d   : > { %7203 = vmatprep.subr.mxu1 %v361_v30 }
 0x11e   : > { %7204 = vmatpush3.msra.mxu1 %v361_v30 }
 0x11f   : > { %7187 = vmatmul.mubr.msk.f32.gmra.mrb[6].mxu1 %vm381_vm2, %v8430_v28  ;;  %7201 = vmatmul.mubr.msk.f32.gmra.mrb[6].mxu0 %vm381_vm2, %v8457_v31 }
 0x120   : > { %7189 = vmatprep.mubr.msk.f32.mxu1 %vm381_vm2, %v8435_v29  ;;  %7213 = vmatprep.mubr.msk.f32.mxu0 %vm381_vm2, %v8460_v32 }
 0x121   : > { %7249 = vmatprep.subr.mxu1 %v6399_v33 }
 0x123   : > { %7190 = vmatmul.mubr.msk.f32.gmra.mrb[8].mxu1 %vm381_vm2, %v8457_v31  ;;  %7214 = vmatmul.mubr.msk.f32.vlgmr.msra.gmra.mrb[8].mxu0 %vm381_vm2, %v8481_v34 }
 0x124   : > { %7205 = vmatprep.mubr.msk.f32.mxu1 %vm381_vm2, %v8484_v35  ;;  %7216 = vmatprep.mubr.msk.f32.mxu0 %vm381_vm2, %v8487_v36 }
 0x127   : > { %7206 = vmatmul.mubr.msk.f32.vlgmr.msra.gmra.mrb[10].mxu1 %vm381_vm2, %v8498_v37  ;;  %7217 = vmatmul.mubr.msk.f32.gmra.mrb[10].mxu0 %vm381_vm2, %v8501_v38 }
 0x128   : > { %7208 = vmatprep.mubr.msk.f32.mxu1 %vm381_vm2, %v8504_v39  ;;  %7219 = vmatprep.mubr.msk.f32.mxu0 %vm381_vm2, %v8507_v40 }
 0x129   : > { %7250 = vmatpush3.msra.mxu1 %v6399_v33 }
 0x12a   : > { %7961 = vmatprep.subr.bf16.mxu1 %v10189_v61 }
 0x12b   : > { %7209 = vmatmul.mubr.msk.f32.gmra.mrb[12].mxu1 %vm381_vm2, %v8518_v41  ;;  %7220 = vmatmul.mubr.msk.f32.gmra.mrb[12].mxu0 %vm381_vm2, %v8521_v42 }
 0x12c   : > { %7222 = vmatprep.mubr.msk.f32.mxu0 %vm381_vm2, %v8524_v43  ;;  %7251 = vmatprep.mubr.msk.f32.mxu1 %vm381_vm2, %v8460_v32 }
 0x12f   : > { %7223 = vmatmul.mubr.msk.f32.gmra.mrb[14].mxu0 %vm381_vm2, %v8535_v44  ;;  %7252 = vmatmul.mubr.msk.f32.vlgmr.msra.gmra.mrb[14].mxu1 %vm381_vm2, %v8481_v34 }
 0x130   : > { %7225 = vmatprep.mubr.msk.f32.mxu0 %vm381_vm2, %v8538_v45  ;;  %7254 = vmatprep.mubr.msk.f32.mxu1 %vm381_vm2, %v8487_v36 }
 0x133   : > { %7226 = vmatmul.mubr.msk.f32.gmra.mrb[16].mxu0 %vm381_vm2, %v8549_v46  ;;  %7255 = vmatmul.mubr.msk.f32.gmra.mrb[16].mxu1 %vm381_vm2, %v8501_v38 }
 0x134   : > { %7228 = vmatprep.mubr.msk.f32.mxu0 %vm381_vm2, %v8552_v47  ;;  %7257 = vmatprep.mubr.msk.f32.mxu1 %vm381_vm2, %v8507_v40 }
 0x137   : > { %7229 = vmatmul.mubr.msk.f32.gmra.mrb[18].mxu0 %vm381_vm2, %v8563_v48  ;;  %7258 = vmatmul.mubr.msk.f32.gmra.mrb[18].mxu1 %vm381_vm2, %v8521_v42 }
 0x138   : > { %7231 = vmatprep.mubr.msk.f32.mxu0 %vm381_vm2, %v8566_v49  ;;  %7260 = vmatprep.mubr.msk.f32.mxu1 %vm381_vm2, %v8524_v43 }
 0x13b   : > { %7232 = vmatmul.mubr.msk.f32.gmra.mrb[20].mxu0 %vm381_vm2, %v8577_v50  ;;  %7261 = vmatmul.mubr.msk.f32.gmra.mrb[20].mxu1 %vm381_vm2, %v8535_v44 }
 0x13c   : > { %7234 = vmatprep.mubr.msk.f32.mxu0 %vm381_vm2, %v8580_v51  ;;  %7263 = vmatprep.mubr.msk.f32.mxu1 %vm381_vm2, %v8538_v45 }
 0x13f   : > { %7235 = vmatmul.mubr.msk.f32.gmra.mrb[22].mxu0 %vm381_vm2, %v8591_v52  ;;  %7264 = vmatmul.mubr.msk.f32.gmra.mrb[22].mxu1 %vm381_vm2, %v8549_v46 }
 0x140   : > { %7237 = vmatprep.mubr.msk.f32.mxu0 %vm381_vm2, %v8594_v53  ;;  %7266 = vmatprep.mubr.msk.f32.mxu1 %vm381_vm2, %v8552_v47 }
 0x143   : > { %7238 = vmatmul.mubr.msk.f32.gmra.mrb[24].mxu0 %vm381_vm2, %v8605_v54  ;;  %7267 = vmatmul.mubr.msk.f32.gmra.mrb[24].mxu1 %vm381_vm2, %v8563_v48 }
 0x144   : > { %7240 = vmatprep.mubr.msk.f32.mxu0 %vm381_vm2, %v8608_v55  ;;  %7269 = vmatprep.mubr.msk.f32.mxu1 %vm381_vm2, %v8566_v49 }
 0x147   : > { %7241 = vmatmul.mubr.msk.f32.gmra.mrb[26].mxu0 %vm381_vm2, %v8619_v56  ;;  %7270 = vmatmul.mubr.msk.f32.gmra.mrb[26].mxu1 %vm381_vm2, %v8577_v50 }
 0x148   : > { %7243 = vmatprep.mubr.msk.f32.mxu0 %vm381_vm2, %v8622_v57  ;;  %7272 = vmatprep.mubr.msk.f32.mxu1 %vm381_vm2, %v8580_v51 }
 0x14b   : > { %7244 = vmatmul.mubr.msk.f32.gmra.mrb[28].mxu0 %vm381_vm2, %v8633_v58  ;;  %7273 = vmatmul.mubr.msk.f32.gmra.mrb[28].mxu1 %vm381_vm2, %v8591_v52 }
 0x14c   : > { %7246 = vmatprep.mubr.msk.f32.mxu0 %vm381_vm2, %v8636_v59  ;;  %7275 = vmatprep.mubr.msk.f32.mxu1 %vm381_vm2, %v8594_v53 }
 0x14f   : > { %7247 = vmatmul.mubr.msk.f32.gmra.mrb[30].mxu0 %vm381_vm2, %v8647_v60  ;;  %7276 = vmatmul.mubr.msk.f32.gmra.mrb[30].mxu1 %vm381_vm2, %v8605_v54 }
 0x150   : > { %7278 = vmatprep.mubr.msk.f32.mxu1 %vm381_vm2, %v8608_v55  ;;  %7299 = vmatprep.mubr.msk.f32.mxu0 %vm8310_vm0, %v10184_v2 }
 0x153   : > { %7279 = vmatmul.mubr.msk.f32.gmra.mrb[32].mxu1 %vm381_vm2, %v8619_v56 }
 0x154   : > { %7281 = vmatprep.mubr.msk.f32.mxu1 %vm381_vm2, %v8622_v57 }
 0x157   : > { %7282 = vmatmul.mubr.msk.f32.gmra.mrb[34].mxu1 %vm381_vm2, %v8633_v58 }
 0x158   : > { %7284 = vmatprep.mubr.msk.f32.mxu1 %vm381_vm2, %v8636_v59 }
 0x15b   : > { %7285 = vmatmul.mubr.msk.f32.gmra.mrb[36].mxu1 %vm381_vm2, %v8647_v60 }
 0x15c   : > { %7314 = vmatprep.mubr.msk.f32.mxu1 %vm8310_vm0, %v10184_v2 }
 0x1ea   : > { %v8671_v62 = vpop.f32.mrb[2].mxu0 }
 0x1eb   : > { %v8673_v63 = vpop.f32.mrb[3].mxu0 }
 0x1ee   : > { %v8675_v0 = vpop.f32.mrb[4].mxu0  ;;  %v8677_v1 = vpop.f32.mrb[4].mxu1 }
 0x1ef   : > { %v8679_v3 = vpop.f32.mrb[5].mxu0  ;;  %v8681_v4 = vpop.f32.mrb[5].mxu1 }
 0x1f2   : > { %v8683_v5 = vpop.f32.mrb[6].mxu0  ;;  %v8685_v6 = vpop.f32.mrb[6].mxu1 }
 0x1f3   : > { %v8687_v7 = vpop.f32.mrb[7].mxu0  ;;  %v8689_v8 = vpop.f32.mrb[7].mxu1 }
 0x1f6   : > { %v7215_v10 = vpop.f32.mrb[8].mxu0  ;;  %v8694_v11 = vpop.f32.mrb[8].mxu1 }
 0x1f7   : > { %v1361_v13 = vadd.f32 %v7215_v10, %v8677_v1  ;;  %v1054_v15 = vpop.f32.mrb[9].mxu0  ;;  %v8697_v16 = vpop.f32.mrb[9].mxu1 }
 0x1f8   : > { %v1360_v18 = vadd.f32 %v1054_v15, %v8681_v4 }
 0x1fa   : > { %v7950_v21 = vpack.c.bf16 %v1361_v13, %v1360_v18  ;;  %v7207_v23 = vpop.f32.mrb[10].mxu1  ;;  %v7218_v25 = vpop.f32.mrb[10].mxu0 }
 0x1fb   : > { %v8707_v26 = vadd.f32 %v7207_v23, %v452_v19  ;;  %v897_v27 = vpop.f32.mrb[11].mxu1  ;;  %v1363_v30 = vadd.f32 %v7218_v25, %v8685_v6  ;;  %v1064_v33 = vpop.f32.mrb[11].mxu0 }
 0x1fc   : > { %v1358_v10 = vadd.f32 %v897_v27, %v452_v19  ;;  %7952 = vmatpush3.bf16.xpose.msk.msra.mxu0 %vm8703_vm3, %v7950_v21  ;;  %v1362_v17 = vadd.f32 %v1064_v33, %v8689_v8 }
 0x1fd   : > { %7953 = vmatprep.subr.bf16.mxu0 %v10189_v61 }
 0x1fe   : > { %v7210_v9 = vpop.f32.mrb[12].mxu1  ;;  %v7954_v15 = vpack.c.bf16 %v1363_v30, %v1362_v17  ;;  %v7221_v2 = vpop.f32.mrb[12].mxu0 }
 0x1ff   : > { %v8714_v13 = vadd.f32 %v7210_v9, %v452_v19  ;;  %v907_v18 = vpop.f32.mrb[13].mxu1  ;;  %v1365_v23 = vadd.f32 %v7221_v2, %v8694_v11  ;;  %v1074_v41 = vpop.f32.mrb[13].mxu0  ;;  %v10253_v2 = vmov 0.0|0.0  }
 0x200   : > { %v8717_v39 = vadd.f32 %v907_v18, %v452_v19  ;;  %v1364_v25 = vadd.f32 %v1074_v41, %v8697_v16 }
 0x202   : > { %v7958_v27 = vpack.c.bf16 %v1365_v23, %v1364_v25  ;;  %v7224_v37 = vpop.f32.mrb[14].mxu0  ;;  %v7253_v21 = vpop.f32.mrb[14].mxu1 }
 0x203   : > { %v1551_v33 = vadd.f32 %v7224_v37, %v8677_v1  ;;  %v1367_v61 = vadd.f32 %v7253_v21, %v8671_v62  ;;  %v1084_v35 = vpop.f32.mrb[15].mxu0  ;;  %v1239_v30 = vpop.f32.mrb[15].mxu1 }
 0x204   : > { %v1550_v17 = vadd.f32 %v1084_v35, %v8681_v4  ;;  %v1366_v9 = vadd.f32 %v1239_v30, %v8673_v63  ;;  %7956 = vmatpush3.bf16.xpose.msk.msra.mxu0 %vm8703_vm3, %v7954_v15 }
 0x205   : > { %7957 = vmatprep.subr.bf16.mxu0 %v10253_v2 }
 0x206   : > { %v7971_v19 = vpack.c.bf16 %v1551_v33, %v1550_v17  ;;  %v7962_v41 = vpack.c.bf16 %v1367_v61, %v1366_v9  ;;  %v7227_v18 = vpop.f32.mrb[16].mxu0  ;;  %v7256_v23 = vpop.f32.mrb[16].mxu1 }
 0x207   : > { %v8728_v25 = vadd.f32 %v7227_v18, %v8685_v6  ;;  %v1369_v37 = vadd.f32 %v7256_v23, %v8675_v0  ;;  %v1094_v21 = vpop.f32.mrb[17].mxu0  ;;  %v1249_v60 = vpop.f32.mrb[17].mxu1 }
 0x208   : > { %v8732_v35 = vadd.f32 %v1094_v21, %v8689_v8  ;;  %v1368_v30 = vadd.f32 %v1249_v60, %v8679_v3  ;;  %7963 = vmatpush3.bf16.msra.mxu1 %v7962_v41 }
 0x209   : > { %7964 = vmatprep.subr.bf16.mxu1 %v10253_v2 }
 0x20a   : > { %v7975_v61 = vpack.c.bf16 %v8728_v25, %v8732_v35  ;;  %v7965_v15 = vpack.c.bf16 %v1369_v37, %v1368_v30  ;;  %v7230_v33 = vpop.f32.mrb[18].mxu0  ;;  %v7259_v17 = vpop.f32.mrb[18].mxu1 }
 0x20b   : > { %v8739_v9 = vadd.f32 %v7230_v33, %v8694_v11  ;;  %v1371_v18 = vadd.f32 %v7259_v17, %v8683_v5  ;;  %v1104_v23 = vpop.f32.mrb[19].mxu0  ;;  %v1259_v59 = vpop.f32.mrb[19].mxu1 }
 0x20c   : > { %v8743_v21 = vadd.f32 %v1104_v23, %v8697_v16  ;;  %v1370_v60 = vadd.f32 %v1259_v59, %v8687_v7  ;;  %7960 = vmatpush3.bf16.xpose.msk.msra.mxu0 %vm8703_vm3, %v7958_v27  ;;  %7966 = vmatpush3.bf16.msra.mxu1 %v7965_v15  ;;  %v1359_v23 = vmul.f32 0.35355338, %v1358_v10 }
 0x20d   : > { %7967 = vmatprep.subr.bf16.mxu1 %v10253_v2  ;;  %7970 = vmatprep.subr.bf16.mxu0 %v10253_v2 }
 0x20e   : > { %v7968_v25 = vpack.c.bf16 %v1371_v18, %v1370_v60  ;;  %v7233_v37 = vpop.f32.mrb[20].mxu0  ;;  %v7262_v35 = vpop.f32.mrb[20].mxu1  ;;  %v10254_v18 = vmov 0.0  }
 0x20f   : > { %v8753_v30 = vadd.f32 %v7233_v37, %v8677_v1  ;;  %v8756_v33 = vadd.f32 %v7262_v35, %v8671_v62  ;;  %v1114_v59 = vpop.f32.mrb[21].mxu0  ;;  %v1269_v17 = vpop.f32.mrb[21].mxu1 }
 0x210   : > { %v8759_v27 = vadd.f32 %v1114_v59, %v8681_v4  ;;  %v8762_v15 = vadd.f32 %v1269_v17, %v8673_v63  ;;  %7969 = vmatpush3.bf16.msra.mxu1 %v7968_v25 }
 0x211   : > { %7982 = vmatprep.subr.bf16.mxu1 %v10253_v2 }
 0x212   : > { %v7236_v37 = vpop.f32.mrb[22].mxu0  ;;  %v7265_v35 = vpop.f32.mrb[22].mxu1 }
 0x213   : > { %v8770_v41 = vadd.f32 %v7236_v37, %v8685_v6  ;;  %v8773_v59 = vadd.f32 %v7265_v35, %v8675_v0  ;;  %v1124_v17 = vpop.f32.mrb[23].mxu0  ;;  %v1279_v58 = vpop.f32.mrb[23].mxu1  ;;  %7300 = vmatmul.mubr.msk.f32.vlgmr.msra.gmra.mrb[32].mxu0 %vm381_vm2, %v1359_v23 }
 0x214   : > { %v8777_v10 = vadd.f32 %v1124_v17, %v8689_v8  ;;  %v8780_v25 = vadd.f32 %v1279_v58, %v8679_v3  ;;  %7973 = vmatpush3.bf16.xpose.msk.msra.mxu0 %vm8703_vm3, %v7971_v19  ;;  %7329 = vmatprep.mubr.msk.f32.mxu0 %vm8310_vm0, %v10254_v18 }
 0x215   : > { %7974 = vmatprep.subr.bf16.mxu0 %v10253_v2 }
 0x216   : > { %v7239_v35 = vpop.f32.mrb[24].mxu0  ;;  %v7268_v17 = vpop.f32.mrb[24].mxu1 }
 0x217   : > { %v8792_v60 = vadd.f32 %v7239_v35, %v8694_v11  ;;  %v8795_v58 = vadd.f32 %v7268_v17, %v8683_v5  ;;  %v1134_v19 = vpop.f32.mrb[25].mxu0  ;;  %v1289_v57 = vpop.f32.mrb[25].mxu1 }
 0x218   : > { %v8798_v56 = vadd.f32 %v1134_v19, %v8697_v16  ;;  %v8801_v55 = vadd.f32 %v1289_v57, %v8687_v7 }
 0x21a   : > { %v7242_v54 = vpop.f32.mrb[26].mxu0  ;;  %v7271_v35 = vpop.f32.mrb[26].mxu1 }
 0x21b   : > { %v8808_v53 = vadd.f32 %v7242_v54, %v8677_v1  ;;  %v1746_v17 = vadd.f32 %v7271_v35, %v8671_v62  ;;  %v1144_v52 = vpop.f32.mrb[27].mxu0  ;;  %v1299_v51 = vpop.f32.mrb[27].mxu1 }
 0x21c   : > { %v8812_v19 = vadd.f32 %v1144_v52, %v8681_v4  ;;  %v1745_v57 = vadd.f32 %v1299_v51, %v8673_v63  ;;  %7977 = vmatpush3.bf16.xpose.msk.msra.mxu0 %vm8703_vm3, %v7975_v61 }
 0x21d   : > { %7978 = vmatprep.subr.bf16.mxu0 %v10253_v2 }
 0x21e   : > { %v8004_v23 = vpack.c.bf16 %v1746_v17, %v1745_v57  ;;  %v7245_v54 = vpop.f32.mrb[28].mxu0  ;;  %v7274_v1 = vpop.f32.mrb[28].mxu1 }
 0x21f   : > { %v8821_v35 = vadd.f32 %v7245_v54, %v8685_v6  ;;  %v1748_v50 = vadd.f32 %v7274_v1, %v8675_v0  ;;  %v1154_v52 = vpop.f32.mrb[29].mxu0  ;;  %v1309_v4 = vpop.f32.mrb[29].mxu1 }
 0x220   : > { %v8825_v51 = vadd.f32 %v1154_v52, %v8689_v8  ;;  %v1747_v61 = vadd.f32 %v1309_v4, %v8679_v3  ;;  %v10255_v52 = vpack.c.bf16 %v8739_v9, %v8743_v21 }
 0x222   : > { %v8017_v49 = vpack.c.bf16 %v8821_v35, %v8825_v51  ;;  %v8007_v48 = vpack.c.bf16 %v1748_v50, %v1747_v61  ;;  %v7248_v37 = vpop.f32.mrb[30].mxu0  ;;  %v7277_v17 = vpop.f32.mrb[30].mxu1 }
 0x223   : > { %v8831_v57 = vadd.f32 %v7248_v37, %v8694_v11  ;;  %v1750_v6 = vadd.f32 %v7277_v17, %v8683_v5  ;;  %v1164_v54 = vpop.f32.mrb[31].mxu0  ;;  %v1319_v1 = vpop.f32.mrb[31].mxu1  ;;  %v1549_v17 = vmul.f32 0.35355338, %v8707_v26 }
 0x224   : > { %v8835_v47 = vadd.f32 %v1164_v54, %v8697_v16  ;;  %v1749_v8 = vadd.f32 %v1319_v1, %v8687_v7  ;;  %7981 = vmatpush3.bf16.xpose.msk.msra.mxu0 %vm8703_vm3, %v10255_v52 }
 0x225   : > { %8003 = vmatprep.subr.bf16.mxu0 %v10253_v2 }
 0x226   : > { %v8021_v50 = vpack.c.bf16 %v8831_v57, %v8835_v47  ;;  %v8010_v11 = vpack.c.bf16 %v1750_v6, %v1749_v8  ;;  %v7280_v37 = vpop.f32.mrb[32].mxu1  ;;  %v6513_v47 = vld [vmem:[%s10180_s4 + $0x80] sm:$0xff] }
 0x227   : > { %v8847_v4 = vadd.f32 %v7280_v37, %v8671_v62  ;;  %v1329_v16 = vpop.f32.mrb[33].mxu1 }
 0x228   : > { %v8850_v61 = vadd.f32 %v1329_v16, %v8673_v63 }
 0x22a   : > { %v8025_v9 = vpack.c.bf16 %v8847_v4, %v8850_v61  ;;  %v7283_v21 = vpop.f32.mrb[34].mxu1 }
 0x22b   : > { %v8856_v54 = vadd.f32 %v7283_v21, %v8675_v0  ;;  %v1339_v1 = vpop.f32.mrb[35].mxu1  ;;  %7330 = vmatmul.mubr.msk.f32.vlgmr.msra.gmra.mrb[34].mxu0 %vm381_vm2, %v1549_v17 }
 0x22c   : > { %v8860_v6 = vadd.f32 %v1339_v1, %v8679_v3  ;;  %8005 = vmatpush3.bf16.msra.mxu0 %v8004_v23  ;;  %7374 = vmatprep.mubr.msk.f32.mxu0 %vm8310_vm0, %v10254_v18 }
 0x22d   : > { %8006 = vmatprep.subr.bf16.mxu0 %v10253_v2 }
 0x22e   : > { %v8028_v62 = vpack.c.bf16 %v8856_v54, %v8860_v6  ;;  %v7286_v63 = vpop.f32.mrb[36].mxu1 }
 0x22f   : > { %v1939_v26 = vadd.f32 %v7286_v63, %v8683_v5  ;;  %v1349_v0 = vpop.f32.mrb[37].mxu1 }
 0x230   : > { %v1938_v8 = vadd.f32 %v1349_v0, %v8687_v7  ;;  %8008 = vmatpush3.bf16.msra.mxu0 %v8007_v48 }
 0x231   : > { %8009 = vmatprep.subr.bf16.mxu0 %v10253_v2 }
 0x232   : > { %v8031_v3 = vpack.c.bf16 %v1939_v26, %v1938_v8 }
 0x234   : > { %8011 = vmatpush3.bf16.msra.mxu0 %v8010_v11 }
 0x235   : > { %8012 = vmatprep.subr.bf16.mxu0 %v10253_v2 }
 0x2e6   : > { %v1459_v23 = vpop.f32.mrb[32].mxu0 }
 0x2e7   : > { %v7301_v52 = vpop.f32.mrb[33].mxu0  ;;  %v1464_v37 = vsel %vm1463_vm4, %v1459_v23, -inf }
 0x2e8   : > { %1465 = vmax.xlane.f32.xlu0 %v1464_v37 }
 0x2fe   : > { %v1649_v16 = vpop.f32.mrb[34].mxu0 }
 0x2ff   : > { %v7331_v17 = vpop.f32.mrb[35].mxu0  ;;  %v1653_v5 = vsel %vm1463_vm4, %v1649_v16, -inf }
 0x300   : > { %1654 = vmax.xlane.f32.xlu0 %v1653_v5  ;;  %v10258_v17 = vpack.c.bf16 %v8795_v58, %v8801_v55  ;;  %v10260_v55 = vpack.c.bf16 %v8770_v41, %v8777_v10 }
 0x375   : > { %v1466_v21 = vpop.xlane.xlu0 %1465 }
 0x376   : > { %v1467_v7 = vsub.f32 %v1459_v23, %v1466_v21  ;;  %v10256_v23 = vpack.c.bf16 %v8756_v33, %v8762_v15  ;;  %v10259_v21 = vpack.c.bf16 %v8753_v30, %v8759_v27  ;;  %v1738_v30 = vmul.f32 0.35355338, %v8717_v39 }
 0x378   : > { %v1468_v48 = vmul.f32 1.442695, %v1467_v7 }
 0x37a   : > { %8219 = vpow2.f32 %v1468_v48 }
 0x384   : > { %v8220_v54 = vpop.eup %8219 }
 0x385   : > { %v1470_v11 = vsel %vm1463_vm4, %v8220_v54, 0.0 }
 0x386   : > { %1471 = vadd.xlane.f32.xlu1 %v1470_v11 }
 0x38d   : > { %v1655_v1 = vpop.xlane.xlu0 %1654 }
 0x38e   : > { %v1656_v6 = vsub.f32 %v1649_v16, %v1655_v1  ;;  %v10257_v16 = vpack.c.bf16 %v8773_v59, %v8780_v25  ;;  %v10261_v59 = vpack.c.bf16 %v8792_v60, %v8798_v56 }
 0x390   : > { %v1657_v63 = vmul.f32 1.442695, %v1656_v6 }
 0x392   : > { %8221 = vpow2.f32 %v1657_v63  ;;  %v6522_v63 = vld [vmem:[%s10181_s5 + $0x7] ss:$0 sm:$0xff] }
 0x39c   : > { %v8222_v26 = vpop.eup %8221 }
 0x39d   : > { %v1659_v0 = vsel %vm1463_vm4, %v8222_v26, 0.0 }
 0x39e   : > { %1660 = vadd.xlane.f32.xlu1 %v1659_v0 }
 0x413   : > { %v1472_v8 = vpop.xlane.xlu1 %1471 }
 0x414   : > { %8223 = vrcp.f32 %v1472_v8 }
 0x41e   : > { %v8224_v52 = vpop.eup %8223 }
 0x41f   : > { %v1474_v37 = vmul.f32 %v8224_v52, %v8220_v54  ;;  %v10264_v54 = vpack.c.bf16 %v8808_v53, %v8812_v19  ;;  %v1927_v53 = vmul.f32 0.35355338, %v8714_v13  ;;  %v6509_v52 = vld [vmem:[%s10180_s4 + $0x20] sm:$0xff] }
 0x421   : > { %7315 = vmatmul.mubr.msk.f32.vlgmr.msra.gmra.mrb[38].mxu1 %vm1463_vm4, %v1474_v37  ;;  %v10266_v37 = vld [vmem:[#allocation7_spill] sm:$0xff] }
 0x422   : > { %7984 = vmatpush3.bf16.msra.mxu1 %v10256_v23  ;;  %7344 = vmatprep.mubr.msk.f32.mxu1 %vm8310_vm0, %v10254_v18  ;;  %v10267_v23 = vld [vmem:[#allocation8_spill] sm:$0xff] }
 0x423   : > { %7985 = vmatprep.subr.bf16.mxu1 %v10253_v2 }
 0x426   : > { %7987 = vmatpush3.bf16.msra.mxu1 %v10257_v16  ;;  %v10268_v16 = vld [vmem:[#allocation9_spill] sm:$0xff] }
 0x427   : > { %7988 = vmatprep.subr.bf16.mxu1 %v10253_v2 }
 0x42a   : > { %7990 = vmatpush3.bf16.msra.mxu1 %v10258_v17  ;;  %v10269_v17 = vld [vmem:[#allocation10_spill] sm:$0xff] }
 0x42b   : > { %v1661_v5 = vpop.xlane.xlu1 %1660  ;;  %7991 = vmatprep.subr.bf16.mxu1 %v10253_v2 }
 0x42c   : > { %8225 = vrcp.f32 %v1661_v5  ;;  %v10270_v5 = vld [vmem:[#allocation11_spill] sm:$0xff] }
 0x436   : > { %v8226_v33 = vpop.eup %8225 }
 0x437   : > { %v1663_v15 = vmul.f32 %v8226_v33, %v8222_v26  ;;  %v10271_v33 = vld [vmem:[#allocation12_spill] sm:$0xff] }
 0x439   : > { %7345 = vmatmul.mubr.msk.f32.vlgmr.msra.gmra.mrb[40].mxu1 %vm1463_vm4, %v1663_v15  ;;  %v10272_v15 = vld [vmem:[#allocation13_spill] sm:$0xff] }
 0x43a   : > { %7994 = vmatpush3.bf16.xpose.msk.msra.mxu1 %vm8703_vm3, %v10259_v21  ;;  %7359 = vmatprep.mubr.msk.f32.mxu1 %vm8310_vm0, %v10254_v18  ;;  %v10273_v21 = vld [vmem:[#allocation14_spill] sm:$0xff] }
 0x43b   : > { %7995 = vmatprep.subr.bf16.mxu1 %v10253_v2 }
 0x442   : > { %7998 = vmatpush3.bf16.xpose.msk.msra.mxu1 %vm8703_vm3, %v10260_v55  ;;  %v10274_v55 = vld [vmem:[#allocation15_spill] sm:$0xff] }
 0x443   : > { %7999 = vmatprep.subr.bf16.mxu1 %v10253_v2 }
 0x44a   : > { %8002 = vmatpush3.bf16.xpose.msk.msra.mxu1 %vm8703_vm3, %v10261_v59  ;;  %v10275_v59 = vld [vmem:[#allocation16_spill] sm:$0xff] }
 0x44b   : > { %8024 = vmatprep.subr.bf16.mxu1 %v10253_v2 }
 0x451   : > { %7360 = vmatmul.mubr.msk.f32.vlgmr.msra.gmra.mrb[42].mxu1 %vm381_vm2, %v1738_v30  ;;  %v10276_v30 = vld [vmem:[#allocation17_spill] sm:$0xff] }
 0x452   : > { %8026 = vmatpush3.bf16.msra.mxu1 %v8025_v9  ;;  %7404 = vmatprep.mubr.msk.f32.mxu1 %vm8310_vm0, %v10254_v18 }
 0x453   : > { %8027 = vmatprep.subr.bf16.mxu1 %v10253_v2 }
 0x456   : > { %8029 = vmatpush3.bf16.msra.mxu1 %v8028_v62 }
 0x457   : > { %8030 = vmatprep.subr.bf16.mxu1 %v10253_v2 }
 0x45a   : > { %8032 = vmatpush3.bf16.msra.mxu1 %v8031_v3 }
 0x45b   : > { %7407 = vmatprep.subr.mxu1 %v10254_v18 }
 0x4f4   : > { %v8921_v56 = vpop.f32.mrb[38].mxu1 }
 0x4f5   : > { %10262 = vst [vmem:[#allocation22_spill] sm:$0xff] %v8921_v56  ;;  %v7316_v39 = vpop.f32.mrb[39].mxu1 }
 0x50c   : > { %v8923_v41 = vpop.f32.mrb[40].mxu1 }
 0x50d   : > { %10263 = vst [vmem:[#allocation23_spill] sm:$0xff] %v8923_v41  ;;  %v7346_v27 = vpop.f32.mrb[41].mxu1 }
 0x50e   : > { %v10277_v27 = vld [vmem:[#allocation18_spill] sm:$0xff] }
 0x524   : > { %v1838_v60 = vpop.f32.mrb[42].mxu1 }
 0x525   : > { %v7361_v10 = vpop.f32.mrb[43].mxu1  ;;  %v1842_v25 = vsel %vm1463_vm4, %v1838_v60, -inf }
 0x526   : > { %1843 = vmax.xlane.f32.xlu0 %v1842_v25  ;;  %v10279_v10 = vld [vmem:[#allocation20_spill] sm:$0xff] }
 0x5b3   : > { %v1844_v58 = vpop.xlane.xlu0 %1843 }
 0x5b4   : > { %v1845_v4 = vsub.f32 %v1838_v60, %v1844_v58  ;;  %v10278_v60 = vld [vmem:[#allocation19_spill] sm:$0xff] }
 0x5b6   : > { %v1846_v61 = vmul.f32 1.442695, %v1845_v4  ;;  %v6511_v4 = vld [vmem:[%s10180_s4 + $0x50] sm:$0xff] }
 0x5b8   : > { %8227 = vpow2.f32 %v1846_v61  ;;  %v6512_v61 = vld [vmem:[%s10180_s4 + $0x68] sm:$0xff] }
 0x5c2   : > { %v8228_v9 = vpop.eup %8227 }
 0x5c3   : > { %v1848_v62 = vsel %vm1463_vm4, %v8228_v9, 0.0 }
 0x5c4   : > { %1849 = vadd.xlane.f32.xlu1 %v1848_v62 }
 0x651   : > { %v1850_v3 = vpop.xlane.xlu1 %1849 }
 0x652   : > { %8229 = vrcp.f32 %v1850_v3 }
 0x65c   : > { %v8230_v7 = vpop.eup %8229 }
 0x65d   : > { %v1852_v48 = vmul.f32 %v8230_v7, %v8228_v9 }
 0x65f   : > { %7375 = vmatmul.mubr.msk.f32.vlgmr.msra.gmra.mrb[36].mxu0 %vm1463_vm4, %v1852_v48 }
 0x660   : > { %8015 = vmatpush3.bf16.xpose.msk.msra.mxu0 %vm8703_vm3, %v10264_v54  ;;  %7389 = vmatprep.mubr.msk.f32.mxu0 %vm8310_vm0, %v10254_v18 }
 0x661   : > { %8016 = vmatprep.subr.bf16.mxu0 %v10253_v2 }
 0x668   : > { %8019 = vmatpush3.bf16.xpose.msk.msra.mxu0 %vm8703_vm3, %v8017_v49 }
 0x669   : > { %8020 = vmatprep.subr.bf16.mxu0 %v10253_v2 }
 0x670   : > { %8023 = vmatpush3.bf16.xpose.msk.msra.mxu0 %vm8703_vm3, %v8021_v50 }
 0x671   : > { %7417 = vmatprep.subr.mxu0 %v10254_v18 }
 0x677   : > { %7390 = vmatmul.mubr.msk.f32.vlgmr.msra.gmra.mrb[38].mxu0 %vm381_vm2, %v1927_v53 }
 0x678   : > { %7419 = vmatprep.mubr.msk.f32.mxu0 %vm8310_vm0, %v10254_v18  ;;  %7418 = vmatpush3.msra.mxu0 %v6513_v47 }
 0x67b   : > { %7420 = vmatmul.mubr.msk.f32.vlgmr.msra.gmra.mrb[40].mxu0 %vm381_vm2, %v8379_v12 }
 0x67c   : > { %7435 = vmatprep.mubr.msk.f32.mxu0 %vm381_vm2, %v8395_v14 }
 0x732   : > { %v8952_v19 = vpop.f32.mrb[36].mxu0 }
 0x733   : > { %10265 = vst [vmem:[#allocation24_spill] sm:$0xff] %v8952_v19  ;;  %v7376_v49 = vpop.f32.mrb[37].mxu0 }
 0x74a   : > { %v2027_v35 = vpop.f32.mrb[38].mxu0 }
 0x74b   : > { %v7391_v51 = vpop.f32.mrb[39].mxu0  ;;  %v2031_v11 = vsel %vm1463_vm4, %v2027_v35, -inf }
 0x74c   : > { %2032 = vmax.xlane.f32.xlu0 %v2031_v11 }
 0x74e   : > { %v2359_v26 = vpop.f32.mrb[40].mxu0 }
 0x74f   : > { %v2360_v0 = vadd.f32 %v6522_v63, %v2359_v26  ;;  %v7421_v8 = vpop.f32.mrb[41].mxu0 }
 0x751   : > { %7433 = vmatprep.subr.mxu0 %v2360_v0 }
 0x752   : > { %7434 = vmatpush3.msra.mxu0 %v2360_v0 }
 0x753   : > { %7436 = vmatmul.mubr.msk.f32.vlgmr.msra.gmra.mrb[42].mxu0 %vm381_vm2, %v8412_v22  ;;  %7452 = vmatprep.subr.mxu0 %v6509_v52 }
 0x754   : > { %7438 = vmatprep.mubr.msk.f32.mxu0 %vm381_vm2, %v8420_v24  ;;  %7453 = vmatpush3.msra.mxu0 %v6509_v52 }
 0x755   : > { %8033 = vmatprep.subr.bf16.mxu0 %v10253_v2 }
 0x757   : > { %7439 = vmatmul.mubr.msk.f32.gmra.mrb[44].mxu0 %vm381_vm2, %v8430_v28 }
 0x758   : > { %7441 = vmatprep.mubr.msk.f32.mxu0 %vm381_vm2, %v8435_v29 }
 0x75b   : > { %7442 = vmatmul.mubr.msk.f32.gmra.mrb[46].mxu0 %vm381_vm2, %v8457_v31 }
 0x75c   : > { %7454 = vmatprep.mubr.msk.f32.mxu0 %vm381_vm2, %v8460_v32 }
 0x75f   : > { %7455 = vmatmul.mubr.msk.f32.vlgmr.msra.gmra.mrb[48].mxu0 %vm381_vm2, %v8481_v34 }
 0x760   : > { %7457 = vmatprep.mubr.msk.f32.mxu0 %vm381_vm2, %v8487_v36 }
 0x763   : > { %7458 = vmatmul.mubr.msk.f32.gmra.mrb[50].mxu0 %vm381_vm2, %v8501_v38 }
 0x764   : > { %7460 = vmatprep.mubr.msk.f32.mxu0 %vm381_vm2, %v8507_v40 }
 0x767   : > { %7461 = vmatmul.mubr.msk.f32.gmra.mrb[52].mxu0 %vm381_vm2, %v8521_v42 }
 0x768   : > { %7463 = vmatprep.mubr.msk.f32.mxu0 %vm381_vm2, %v8524_v43 }
 0x76b   : > { %7464 = vmatmul.mubr.msk.f32.gmra.mrb[54].mxu0 %vm381_vm2, %v8535_v44 }
 0x76c   : > { %7466 = vmatprep.mubr.msk.f32.mxu0 %vm381_vm2, %v8538_v45 }
 0x76f   : > { %7467 = vmatmul.mubr.msk.f32.gmra.mrb[56].mxu0 %vm381_vm2, %v8549_v46 }
 0x770   : > { %7469 = vmatprep.mubr.msk.f32.mxu0 %vm381_vm2, %v10266_v37 }
 0x773   : > { %7470 = vmatmul.mubr.msk.f32.gmra.mrb[58].mxu0 %vm381_vm2, %v10267_v23 }
 0x774   : > { %7472 = vmatprep.mubr.msk.f32.mxu0 %vm381_vm2, %v10268_v16 }
 0x777   : > { %7473 = vmatmul.mubr.msk.f32.gmra.mrb[60].mxu0 %vm381_vm2, %v10269_v17 }
 0x778   : > { %7475 = vmatprep.mubr.msk.f32.mxu0 %vm381_vm2, %v10270_v5 }
 0x77b   : > { %7476 = vmatmul.mubr.msk.f32.gmra.mrb[62].mxu0 %vm381_vm2, %v10271_v33 }
 0x77c   : > { %7478 = vmatprep.mubr.msk.f32.mxu0 %vm381_vm2, %v10272_v15 }
 0x77f   : > { %7479 = vmatmul.mubr.msk.f32.gmra.mrb[64].mxu0 %vm381_vm2, %v10273_v21 }
 0x780   : > { %7481 = vmatprep.mubr.msk.f32.mxu0 %vm381_vm2, %v10274_v55 }
 0x783   : > { %7482 = vmatmul.mubr.msk.f32.gmra.mrb[66].mxu0 %vm381_vm2, %v10275_v59 }
 0x784   : > { %7484 = vmatprep.mubr.msk.f32.mxu0 %vm381_vm2, %v10276_v30 }
 0x787   : > { %7485 = vmatmul.mubr.msk.f32.gmra.mrb[68].mxu0 %vm381_vm2, %v10277_v27 }
 0x788   : > { %7487 = vmatprep.mubr.msk.f32.mxu0 %vm381_vm2, %v10278_v60 }
 0x78b   : > { %7488 = vmatmul.mubr.msk.f32.gmra.mrb[70].mxu0 %vm381_vm2, %v10279_v10 }
 0x78c   : > { %7540 = vmatprep.mubr.msk.f32.mxu0 %vm8310_vm0, %v10254_v18 }
 0x7d9   : > { %v2033_v13 = vpop.xlane.xlu0 %2032 }
 0x7da   : > { %v2034_v57 = vsub.f32 %v2027_v35, %v2033_v13 }
 0x7dc   : > { %v2035_v50 = vmul.f32 1.442695, %v2034_v57 }
 0x7de   : > { %8231 = vpow2.f32 %v2035_v50 }
 0x7e8   : > { %v8232_v1 = vpop.eup %8231 }
 0x7e9   : > { %v2037_v6 = vsel %vm1463_vm4, %v8232_v1, 0.0 }
 0x7ea   : > { %2038 = vadd.xlane.f32.xlu1 %v2037_v6 }
 0x826   : > { %v9048_v9 = vpop.f32.mrb[42].mxu0 }
 0x827   : > { %v9050_v62 = vpop.f32.mrb[43].mxu0 }
 0x82a   : > { %v9052_v3 = vpop.f32.mrb[44].mxu0 }
 0x82b   : > { %v9054_v7 = vpop.f32.mrb[45].mxu0 }
 0x82e   : > { %v9056_v48 = vpop.f32.mrb[46].mxu0 }
 0x82f   : > { %v9058_v54 = vpop.f32.mrb[47].mxu0 }
 0x830   : > { %10280 = vst [vmem:[#allocation7_spill] sm:$0xff] %v9058_v54  ;;  %v6508_v54 = vld [vmem:[%s10180_s4 + $0x8] sm:$0xff] }
 0x832   : > { %v9060_v53 = vpop.f32.mrb[48].mxu0 }
 0x833   : > { %v9062_v49 = vpop.f32.mrb[49].mxu0 }
 0x836   : > { %v9064_v35 = vpop.f32.mrb[50].mxu0 }
 0x837   : > { %v9066_v51 = vpop.f32.mrb[51].mxu0 }
 0x877   : > { %v2039_v39 = vpop.xlane.xlu1 %2038 }
 0x878   : > { %8233 = vrcp.f32 %v2039_v39 }
 0x882   : > { %v8234_v25 = vpop.eup %8233 }
 0x883   : > { %v2041_v58 = vmul.f32 %v8234_v25, %v8232_v1 }
 0x885   : > { %7405 = vmatmul.mubr.msk.f32.vlgmr.msra.gmra.mrb[44].mxu1 %vm1463_vm4, %v2041_v58 }
 0x886   : > { %7408 = vmatpush3.msra.mxu1 %v6511_v4  ;;  %7409 = vmatprep.mubr.msk.f32.mxu1 %vm8310_vm0, %v10254_v18 }
 0x887   : > { %7412 = vmatprep.subr.mxu1 %v10254_v18 }
 0x889   : > { %7410 = vmatmul.mubr.msk.f32.vlgmr.msra.gmra.mrb[46].mxu1 %vm381_vm2, %v8379_v12 }
 0x88a   : > { %7413 = vmatpush3.msra.mxu1 %v6512_v61  ;;  %7414 = vmatprep.mubr.msk.f32.mxu1 %vm8310_vm0, %v10254_v18 }
 0x88d   : > { %7415 = vmatmul.mubr.msk.f32.vlgmr.msra.gmra.mrb[48].mxu1 %vm381_vm2, %v8379_v12  ;;  %v6519_v12 = vld [vmem:[%s10181_s5 + $0x4] ss:$0 sm:$0xff] }
 0x88e   : > { %7424 = vmatprep.mubr.msk.f32.mxu1 %vm381_vm2, %v8395_v14  ;;  %v9068_v14 = vpop.f32.mrb[52].mxu0 }
 0x88f   : > { %v9070_v11 = vpop.f32.mrb[53].mxu0 }
 0x890   : > { %v9072_v47 = vpop.f32.mrb[54].mxu0 }
 0x891   : > { %v9074_v13 = vpop.f32.mrb[55].mxu0 }
 0x892   : > { %v9076_v57 = vpop.f32.mrb[56].mxu0 }
 0x893   : > { %v9078_v50 = vpop.f32.mrb[57].mxu0 }
 0x894   : > { %v9080_v1 = vpop.f32.mrb[58].mxu0 }
 0x895   : > { %v9082_v6 = vpop.f32.mrb[59].mxu0 }
 0x896   : > { %v9084_v63 = vpop.f32.mrb[60].mxu0 }
 0x897   : > { %v9086_v26 = vpop.f32.mrb[61].mxu0 }
 0x898   : > { %v9088_v0 = vpop.f32.mrb[62].mxu0 }
 0x899   : > { %v9090_v8 = vpop.f32.mrb[63].mxu0 }
 0x89a   : > { %v9092_v52 = vpop.f32.mrb[64].mxu0 }
 0x89b   : > { %v9094_v39 = vpop.f32.mrb[65].mxu0 }
 0x958   : > { %v9096_v25 = vpop.f32.mrb[44].mxu1 }
 0x959   : > { %v7406_v58 = vpop.f32.mrb[45].mxu1 }
 0x95a   : > { %v6510_v58 = vld [vmem:[%s10180_s4 + $0x38] sm:$0xff] }
 0x95c   : > { %v9098_v4 = vpop.f32.mrb[46].mxu1 }
 0x95d   : > { %v7411_v61 = vpop.f32.mrb[47].mxu1 }
 0x960   : > { %v2281_v19 = vpop.f32.mrb[48].mxu1 }
 0x961   : > { %v2282_v41 = vadd.f32 %v6519_v12, %v2281_v19  ;;  %v7416_v56 = vpop.f32.mrb[49].mxu1  ;;  %v10281_v12 = vld [vmem:[#allocation3_spill] sm:$0xff] }
 0x962   : > { %v10282_v56 = vld [vmem:[#allocation4_spill] sm:$0xff] }
 0x963   : > { %7422 = vmatprep.subr.mxu1 %v2282_v41 }
 0x964   : > { %7423 = vmatpush3.msra.mxu1 %v2282_v41 }
 0x965   : > { %7425 = vmatmul.mubr.msk.f32.vlgmr.msra.gmra.mrb[50].mxu1 %vm381_vm2, %v8412_v22  ;;  %7444 = vmatprep.subr.mxu1 %v6508_v54  ;;  %v10283_v22 = vld [vmem:[#allocation5_spill] sm:$0xff] }
 0x966   : > { %7427 = vmatprep.mubr.msk.f32.mxu1 %vm381_vm2, %v8420_v24  ;;  %7445 = vmatpush3.msra.mxu1 %v6508_v54  ;;  %v10284_v24 = vld [vmem:[#allocation6_spill] sm:$0xff] }
 0x967   : > { %7490 = vmatprep.subr.mxu1 %v6510_v58 }
 0x969   : > { %7428 = vmatmul.mubr.msk.f32.gmra.mrb[52].mxu1 %vm381_vm2, %v8430_v28  ;;  %v7483_v28 = vpop.f32.mrb[66].mxu0 }
 0x96a   : > { %7430 = vmatprep.mubr.msk.f32.mxu1 %vm381_vm2, %v8435_v29  ;;  %v2794_v29 = vpop.f32.mrb[67].mxu0 }
 0x96d   : > { %7431 = vmatmul.mubr.msk.f32.gmra.mrb[54].mxu1 %vm381_vm2, %v8457_v31  ;;  %v7486_v31 = vpop.f32.mrb[68].mxu0 }
 0x96e   : > { %7446 = vmatprep.mubr.msk.f32.mxu1 %vm381_vm2, %v10281_v12 }
 0x971   : > { %7447 = vmatmul.mubr.msk.f32.vlgmr.msra.gmra.mrb[56].mxu1 %vm381_vm2, %v10282_v56 }
 0x972   : > { %7449 = vmatprep.mubr.msk.f32.mxu1 %vm381_vm2, %v10283_v22  ;;  %7491 = vmatpush3.msra.mxu1 %v6510_v58 }
 0x973   : > { %8045 = vmatprep.subr.bf16.mxu1 %v10253_v2 }
 0x975   : > { %7450 = vmatmul.mubr.msk.f32.gmra.mrb[58].mxu1 %vm381_vm2, %v10284_v24 }
 0x976   : > { %7492 = vmatprep.mubr.msk.f32.mxu1 %vm381_vm2, %v8460_v32  ;;  %v2804_v32 = vpop.f32.mrb[69].mxu0 }
 0x979   : > { %7493 = vmatmul.mubr.msk.f32.vlgmr.msra.gmra.mrb[60].mxu1 %vm381_vm2, %v8481_v34  ;;  %v7489_v34 = vpop.f32.mrb[70].mxu0 }
 0x97a   : > { %7495 = vmatprep.mubr.msk.f32.mxu1 %vm381_vm2, %v8487_v36  ;;  %v2814_v36 = vpop.f32.mrb[71].mxu0 }
 0x97d   : > { %7496 = vmatmul.mubr.msk.f32.gmra.mrb[62].mxu1 %vm381_vm2, %v8501_v38 }
 0x97e   : > { %7498 = vmatprep.mubr.msk.f32.mxu1 %vm381_vm2, %v8507_v40 }
 0x981   : > { %7499 = vmatmul.mubr.msk.f32.gmra.mrb[64].mxu1 %vm381_vm2, %v8521_v42 }
 0x982   : > { %7501 = vmatprep.mubr.msk.f32.mxu1 %vm381_vm2, %v8524_v43 }
 0x985   : > { %7502 = vmatmul.mubr.msk.f32.gmra.mrb[66].mxu1 %vm381_vm2, %v8535_v44 }
 0x986   : > { %7504 = vmatprep.mubr.msk.f32.mxu1 %vm381_vm2, %v8538_v45 }
 0x989   : > { %7505 = vmatmul.mubr.msk.f32.gmra.mrb[68].mxu1 %vm381_vm2, %v8549_v46 }
 0x98a   : > { %7507 = vmatprep.mubr.msk.f32.mxu1 %vm381_vm2, %v10266_v37 }
 0x98d   : > { %7508 = vmatmul.mubr.msk.f32.gmra.mrb[70].mxu1 %vm381_vm2, %v10267_v23 }
 0x98e   : > { %7510 = vmatprep.mubr.msk.f32.mxu1 %vm381_vm2, %v10268_v16 }
 0x991   : > { %7511 = vmatmul.mubr.msk.f32.gmra.mrb[72].mxu1 %vm381_vm2, %v10269_v17 }
 0x992   : > { %7513 = vmatprep.mubr.msk.f32.mxu1 %vm381_vm2, %v10270_v5 }
 0x995   : > { %7514 = vmatmul.mubr.msk.f32.gmra.mrb[74].mxu1 %vm381_vm2, %v10271_v33 }
 0x996   : > { %7516 = vmatprep.mubr.msk.f32.mxu1 %vm381_vm2, %v10272_v15 }
 0x999   : > { %7517 = vmatmul.mubr.msk.f32.gmra.mrb[76].mxu1 %vm381_vm2, %v10273_v21 }
 0x99a   : > { %7519 = vmatprep.mubr.msk.f32.mxu1 %vm381_vm2, %v10274_v55 }
 0x99d   : > { %7520 = vmatmul.mubr.msk.f32.gmra.mrb[78].mxu1 %vm381_vm2, %v10275_v59 }
 0x99e   : > { %7522 = vmatprep.mubr.msk.f32.mxu1 %vm381_vm2, %v10276_v30 }
 0x9a1   : > { %7523 = vmatmul.mubr.msk.f32.gmra.mrb[80].mxu1 %vm381_vm2, %v10277_v27 }
 0x9a2   : > { %7525 = vmatprep.mubr.msk.f32.mxu1 %vm381_vm2, %v10278_v60 }
 0x9a5   : > { %7526 = vmatmul.mubr.msk.f32.gmra.mrb[82].mxu1 %vm381_vm2, %v10279_v10 }
 0x9a6   : > { %7555 = vmatprep.mubr.msk.f32.mxu1 %vm8310_vm0, %v10254_v18 }
 0xa38   : > { %v7426_v38 = vpop.f32.mrb[50].mxu1 }
 0xa39   : > { %v3011_v40 = vadd.f32 %v9060_v53, %v7426_v38  ;;  %v9180_v42 = vadd.f32 %v9072_v47, %v7426_v38  ;;  %v9183_v43 = vadd.f32 %v9084_v63, %v7426_v38  ;;  %v9185_v44 = vadd.f32 %v7483_v28, %v7426_v38  ;;  %v2429_v45 = vpop.f32.mrb[51].mxu1  ;;  %v6516_v53 = vld [vmem:[%s10181_s5 + $0x1] ss:$0 sm:$0xff] }
 0xa3a   : > { %v3010_v46 = vadd.f32 %v9062_v49, %v2429_v45  ;;  %v9189_v41 = vadd.f32 %v9074_v13, %v2429_v45  ;;  %v9192_v19 = vadd.f32 %v9086_v26, %v2429_v45  ;;  %v9194_v37 = vadd.f32 %v2794_v29, %v2429_v45 }
 0xa3c   : > { %v8034_v23 = vpack.c.bf16 %v3011_v40, %v3010_v46  ;;  %v8055_v16 = vpack.c.bf16 %v9180_v42, %v9189_v41  ;;  %v8076_v17 = vpack.c.bf16 %v9183_v43, %v9192_v19  ;;  %v8097_v5 = vpack.c.bf16 %v9185_v44, %v9194_v37  ;;  %v7429_v33 = vpop.f32.mrb[52].mxu1  ;;  %v9368_v41 = vld [vmem:[%s10180_s4 + $0x98] sm:$0xff] }
 0xa3d   : > { %v3013_v15 = vadd.f32 %v9064_v35, %v7429_v33  ;;  %v9204_v21 = vadd.f32 %v9076_v57, %v7429_v33  ;;  %v9207_v55 = vadd.f32 %v9088_v0, %v7429_v33  ;;  %v9209_v59 = vadd.f32 %v7486_v31, %v7429_v33  ;;  %v2439_v30 = vpop.f32.mrb[53].mxu1 }
 0xa3e   : > { %8036 = vmatpush3.bf16.xpose.msk.msra.mxu0 %vm8703_vm3, %v8034_v23  ;;  %v3012_v27 = vadd.f32 %v9066_v51, %v2439_v30  ;;  %v9215_v60 = vadd.f32 %v9078_v50, %v2439_v30  ;;  %v9218_v10 = vadd.f32 %v9090_v8, %v2439_v30  ;;  %v9220_v54 = vadd.f32 %v2804_v32, %v2439_v30 }
 0xa3f   : > { %8037 = vmatprep.subr.bf16.mxu0 %v10253_v2 }
 0xa40   : > { %v8038_v49 = vpack.c.bf16 %v3013_v15, %v3012_v27  ;;  %v8059_v35 = vpack.c.bf16 %v9204_v21, %v9215_v60  ;;  %v8080_v51 = vpack.c.bf16 %v9207_v55, %v9218_v10  ;;  %v7432_v13 = vpop.f32.mrb[54].mxu1 }
 0xa41   : > { %v3015_v57 = vadd.f32 %v9068_v14, %v7432_v13  ;;  %v9234_v50 = vadd.f32 %v9080_v1, %v7432_v13  ;;  %v9237_v63 = vadd.f32 %v9092_v52, %v7432_v13  ;;  %v2449_v26 = vpop.f32.mrb[55].mxu1  ;;  %v9239_v0 = vadd.f32 %v7489_v34, %v7432_v13  ;;  %v10285_v13 = vld [vmem:[#allocation7_spill] sm:$0xff] }
 0xa42   : > { %v3014_v8 = vadd.f32 %v9070_v11, %v2449_v26  ;;  %v9243_v61 = vadd.f32 %v9082_v6, %v2449_v26  ;;  %v9246_v58 = vadd.f32 %v9094_v39, %v2449_v26  ;;  %v9248_v12 = vadd.f32 %v2814_v36, %v2449_v26 }
 0xa43   : > { %v2204_v14 = vadd.f32 %v6516_v53, %v9098_v4 }
 0xa44   : > { %v8042_v1 = vpack.c.bf16 %v3015_v57, %v3014_v8  ;;  %v8063_v52 = vpack.c.bf16 %v9234_v50, %v9243_v61  ;;  %v8084_v56 = vpack.c.bf16 %v9237_v63, %v9246_v58  ;;  %v7448_v22 = vpop.f32.mrb[56].mxu1 }
 0xa45   : > { %v9257_v6 = vadd.f32 %v7448_v22, %v2204_v14  ;;  %v2619_v24 = vpop.f32.mrb[57].mxu1 }
 0xa46   : > { %v3008_v39 = vadd.f32 %v2619_v24, %v2204_v14  ;;  %8040 = vmatpush3.bf16.xpose.msk.msra.mxu0 %vm8703_vm3, %v8038_v49 }
 0xa47   : > { %8041 = vmatprep.subr.bf16.mxu0 %v10253_v2  ;;  %v3344_v42 = vmul.f32 0.35355338, %v9257_v6 }
 0xa48   : > { %v7451_v4 = vpop.f32.mrb[58].mxu1  ;;  %v3009_v15 = vmul.f32 0.35355338, %v3008_v39 }
 0xa49   : > { %v9262_v28 = vadd.f32 %v7451_v4, %v2204_v14  ;;  %v2629_v29 = vpop.f32.mrb[59].mxu1 }
 0xa4a   : > { %v9264_v31 = vadd.f32 %v2629_v29, %v2204_v14 }
 0xa4b   : > { %v4014_v44 = vmul.f32 0.35355338, %v9262_v28 }
 0xa4c   : > { %v7494_v32 = vpop.f32.mrb[60].mxu1  ;;  %v3679_v43 = vmul.f32 0.35355338, %v9264_v31 }
 0xa4d   : > { %v3017_v34 = vadd.f32 %v7494_v32, %v9048_v9  ;;  %v2889_v36 = vpop.f32.mrb[61].mxu1 }
 0xa4e   : > { %v3016_v38 = vadd.f32 %v2889_v36, %v9050_v62  ;;  %8044 = vmatpush3.bf16.xpose.msk.msra.mxu0 %vm8703_vm3, %v8042_v1 }
 0xa4f   : > { %7558 = vmatprep.subr.mxu0 %v10254_v18 }
 0xa50   : > { %v8046_v40 = vpack.c.bf16 %v3017_v34, %v3016_v38  ;;  %v7497_v45 = vpop.f32.mrb[62].mxu1 }
 0xa51   : > { %v3019_v46 = vadd.f32 %v7497_v45, %v9052_v3  ;;  %v2899_v23 = vpop.f32.mrb[63].mxu1 }
 0xa52   : > { %v3018_v33 = vadd.f32 %v2899_v23, %v9054_v7  ;;  %8047 = vmatpush3.bf16.msra.mxu1 %v8046_v40 }
 0xa53   : > { %8048 = vmatprep.subr.bf16.mxu1 %v10253_v2 }
 0xa54   : > { %v8049_v30 = vpack.c.bf16 %v3019_v46, %v3018_v33  ;;  %v7500_v27 = vpop.f32.mrb[64].mxu1 }
 0xa55   : > { %v3021_v53 = vadd.f32 %v7500_v27, %v9056_v48  ;;  %v2909_v49 = vpop.f32.mrb[65].mxu1  ;;  %7541 = vmatmul.mubr.msk.f32.vlgmr.msra.gmra.mrb[72].mxu0 %vm381_vm2, %v3009_v15 }
 0xa56   : > { %v3020_v57 = vadd.f32 %v2909_v49, %v10285_v13  ;;  %8050 = vmatpush3.bf16.msra.mxu1 %v8049_v30  ;;  %7560 = vmatprep.mubr.msk.f32.mxu0 %vm8310_vm0, %v10254_v18 }
 0xa57   : > { %8051 = vmatprep.subr.bf16.mxu1 %v10253_v2  ;;  %7559 = vmatpush3.msra.mxu0 %v9368_v41 }
 0xa58   : > { %v8052_v26 = vpack.c.bf16 %v3021_v53, %v3020_v57  ;;  %v7503_v8 = vpop.f32.mrb[66].mxu1  ;;  %7563 = vmatprep.subr.mxu0 %v10254_v18 }
 0xa59   : > { %v9281_v14 = vadd.f32 %v7503_v8, %v9048_v9  ;;  %v2919_v1 = vpop.f32.mrb[67].mxu1 }
 0xa5a   : > { %v9284_v22 = vadd.f32 %v2919_v1, %v9050_v62  ;;  %8053 = vmatpush3.bf16.msra.mxu1 %v8052_v26 }
 0xa5b   : > { %8054 = vmatprep.subr.bf16.mxu1 %v10253_v2 }
 0xa5c   : > { %v8067_v24 = vpack.c.bf16 %v9281_v14, %v9284_v22  ;;  %v7506_v39 = vpop.f32.mrb[68].mxu1 }
 0xa5d   : > { %v9290_v4 = vadd.f32 %v7506_v39, %v9052_v3  ;;  %v2929_v29 = vpop.f32.mrb[69].mxu1 }
 0xa5e   : > { %v9293_v32 = vadd.f32 %v2929_v29, %v9054_v7 }
 0xa60   : > { %v8070_v34 = vpack.c.bf16 %v9290_v4, %v9293_v32  ;;  %v7509_v36 = vpop.f32.mrb[70].mxu1 }
 0xa61   : > { %v9298_v38 = vadd.f32 %v7509_v36, %v9056_v48  ;;  %v2939_v40 = vpop.f32.mrb[71].mxu1 }
 0xa62   : > { %v9301_v45 = vadd.f32 %v2939_v40, %v10285_v13 }
 0xa64   : > { %v8073_v46 = vpack.c.bf16 %v9298_v38, %v9301_v45  ;;  %v7512_v23 = vpop.f32.mrb[72].mxu1 }
 0xa65   : > { %v3687_v33 = vadd.f32 %v7512_v23, %v9048_v9  ;;  %v2949_v15 = vpop.f32.mrb[73].mxu1 }
 0xa66   : > { %v3686_v30 = vadd.f32 %v2949_v15, %v9050_v62 }
 0xa68   : > { %v8088_v27 = vpack.c.bf16 %v3687_v33, %v3686_v30  ;;  %v7515_v53 = vpop.f32.mrb[74].mxu1 }
 0xa69   : > { %v3689_v49 = vadd.f32 %v7515_v53, %v9052_v3  ;;  %v2959_v57 = vpop.f32.mrb[75].mxu1 }
 0xa6a   : > { %v3688_v26 = vadd.f32 %v2959_v57, %v9054_v7 }
 0xa6c   : > { %v8091_v8 = vpack.c.bf16 %v3689_v49, %v3688_v26  ;;  %v7518_v1 = vpop.f32.mrb[76].mxu1 }
 0xa6d   : > { %v3691_v39 = vadd.f32 %v7518_v1, %v9056_v48  ;;  %v2969_v29 = vpop.f32.mrb[77].mxu1 }
 0xa6e   : > { %v3690_v36 = vadd.f32 %v2969_v29, %v10285_v13 }
 0xa70   : > { %v8094_v40 = vpack.c.bf16 %v3691_v39, %v3690_v36  ;;  %v7521_v11 = vpop.f32.mrb[78].mxu1 }
 0xa71   : > { %v9312_v23 = vadd.f32 %v7521_v11, %v9048_v9  ;;  %v2979_v15 = vpop.f32.mrb[79].mxu1 }
 0xa72   : > { %v9315_v33 = vadd.f32 %v2979_v15, %v9050_v62 }
 0xa74   : > { %v8109_v30 = vpack.c.bf16 %v9312_v23, %v9315_v33  ;;  %v7524_v53 = vpop.f32.mrb[80].mxu1 }
 0xa75   : > { %v9320_v49 = vadd.f32 %v7524_v53, %v9052_v3  ;;  %v2989_v57 = vpop.f32.mrb[81].mxu1 }
 0xa76   : > { %v9323_v26 = vadd.f32 %v2989_v57, %v9054_v7 }
 0xa78   : > { %v8112_v1 = vpack.c.bf16 %v9320_v49, %v9323_v26  ;;  %v7527_v9 = vpop.f32.mrb[82].mxu1 }
 0xa79   : > { %v9328_v11 = vadd.f32 %v7527_v9, %v9056_v48  ;;  %v2999_v62 = vpop.f32.mrb[83].mxu1 }
 0xa7a   : > { %v9331_v39 = vadd.f32 %v2999_v62, %v10285_v13 }
 0xa7c   : > { %v8115_v29 = vpack.c.bf16 %v9328_v11, %v9331_v39 }
 0xb28   : > { %v3109_v3 = vpop.f32.mrb[72].mxu0 }
 0xb29   : > { %v7542_v36 = vpop.f32.mrb[73].mxu0  ;;  %v3113_v15 = vsel %vm1463_vm4, %v3109_v3, -inf }
 0xb2a   : > { %3114 = vmax.xlane.f32.xlu0 %v3113_v15  ;;  %v10288_v36 = vld [vmem:[#allocation23_spill] sm:$0xff]  ;;  %v10290_v15 = vld [vmem:[#allocation24_spill] sm:$0xff] }
 0xbb7   : > { %v3115_v7 = vpop.xlane.xlu0 %3114 }
 0xbb8   : > { %v3116_v53 = vsub.f32 %v3109_v3, %v3115_v7  ;;  %v10291_v7 = vpack.c.bf16 %v9209_v59, %v9220_v54 }
 0xbba   : > { %v3117_v57 = vmul.f32 1.442695, %v3116_v53  ;;  %v10292_v53 = vpack.c.bf16 %v9239_v0, %v9248_v12 }
 0xbbc   : > { %8235 = vpow2.f32 %v3117_v57 }
 0xbc6   : > { %v8236_v47 = vpop.eup %8235 }
 0xbc7   : > { %v3119_v48 = vsel %vm1463_vm4, %v8236_v47, 0.0 }
 0xbc8   : > { %3120 = vadd.xlane.f32.xlu1 %v3119_v48 }
 0xc55   : > { %v3121_v9 = vpop.xlane.xlu1 %3120 }
 0xc56   : > { %8237 = vrcp.f32 %v3121_v9 }
 0xc60   : > { %v8238_v13 = vpop.eup %8237 }
 0xc61   : > { %v3123_v62 = vmul.f32 %v8238_v13, %v8236_v47 }
 0xc63   : > { %7556 = vmatmul.mubr.msk.f32.vlgmr.msra.gmra.mrb[84].mxu1 %vm1463_vm4, %v3123_v62 }
 0xc64   : > { %8057 = vmatpush3.bf16.xpose.msk.msra.mxu1 %vm8703_vm3, %v8055_v16  ;;  %7580 = vmatprep.mubr.msk.f32.mxu1 %vm8310_vm0, %v10254_v18  ;;  %v9375_v16 = vld [vmem:[%s10180_s4 + $0x90] sm:$0xff] }
 0xc65   : > { %8058 = vmatprep.subr.bf16.mxu1 %v10253_v2 }
 0xc6c   : > { %8061 = vmatpush3.bf16.xpose.msk.msra.mxu1 %vm8703_vm3, %v8059_v35  ;;  %v10286_v35 = vld [vmem:[#allocation22_spill] sm:$0xff] }
 0xc6d   : > { %8062 = vmatprep.subr.bf16.mxu1 %v10253_v2 }
 0xc74   : > { %8065 = vmatpush3.bf16.xpose.msk.msra.mxu1 %vm8703_vm3, %v8063_v52 }
 0xc75   : > { %8087 = vmatprep.subr.bf16.mxu1 %v10253_v2 }
 0xc7b   : > { %7581 = vmatmul.mubr.msk.f32.vlgmr.msra.gmra.mrb[86].mxu1 %vm381_vm2, %v3344_v42 }
 0xc7c   : > { %8089 = vmatpush3.bf16.msra.mxu1 %v8088_v27  ;;  %7635 = vmatprep.mubr.msk.f32.mxu1 %vm8310_vm0, %v10254_v18 }
 0xc7d   : > { %8090 = vmatprep.subr.bf16.mxu1 %v10253_v2 }
 0xc80   : > { %8092 = vmatpush3.bf16.msra.mxu1 %v8091_v8 }
 0xc81   : > { %8093 = vmatprep.subr.bf16.mxu1 %v10253_v2 }
 0xc84   : > { %8095 = vmatpush3.bf16.msra.mxu1 %v8094_v40 }
 0xc85   : > { %7638 = vmatprep.subr.mxu1 %v10254_v18 }
 0xd36   : > { %v3193_v21 = vpop.f32.mrb[84].mxu1 }
 0xd37   : > { %v7557_v60 = vpop.f32.mrb[85].mxu1  ;;  %7561 = vmatmul.mubr.msk.f32.vlgmr.msra.gmra.mrb[74].mxu0 %vm381_vm2, %v3193_v21  ;;  %v6632_v21 = vld [vmem:[%s10180_s4 + $0x70] sm:$0xff] }
 0xd38   : > { %7564 = vmatpush3.msra.mxu0 %v9375_v16  ;;  %7565 = vmatprep.mubr.msk.f32.mxu0 %vm8310_vm0, %v10254_v18  ;;  %v10294_v60 = vld [vmem:[#allocation2_spill] sm:$0xff] }
 0xd39   : > { %8066 = vmatprep.subr.bf16.mxu0 %v10253_v2 }
 0xd3b   : > { %7566 = vmatmul.mubr.msk.f32.vlgmr.msra.gmra.mrb[76].mxu0 %vm381_vm2, %v10286_v35  ;;  %v9502_v35 = vld [vmem:[%s10179_s3] sm:$0xff] }
 0xd3c   : > { %8068 = vmatpush3.bf16.msra.mxu0 %v8067_v24  ;;  %7595 = vmatprep.mubr.msk.f32.mxu0 %vm8310_vm0, %v10254_v18 }
 0xd3d   : > { %8069 = vmatprep.subr.bf16.mxu0 %v10253_v2 }
 0xd40   : > { %8071 = vmatpush3.bf16.msra.mxu0 %v8070_v34 }
 0xd41   : > { %8072 = vmatprep.subr.bf16.mxu0 %v10253_v2 }
 0xd44   : > { %8074 = vmatpush3.bf16.msra.mxu0 %v8073_v46 }
 0xd45   : > { %7598 = vmatprep.subr.mxu0 %v10254_v18 }
 0xd4e   : > { %v3444_v47 = vpop.f32.mrb[86].mxu1 }
 0xd4f   : > { %v7582_v50 = vpop.f32.mrb[87].mxu1  ;;  %v3448_v61 = vsel %vm1463_vm4, %v3444_v47, -inf }
 0xd50   : > { %3449 = vmax.xlane.f32.xlu0 %v3448_v61 }
 0xddd   : > { %v3450_v52 = vpop.xlane.xlu0 %3449 }
 0xdde   : > { %v3451_v6 = vsub.f32 %v3444_v47, %v3450_v52  ;;  %v6639_v52 = vld [vmem:[%s10181_s5 + $0x5] ss:$0 sm:$0xff] }
 0xde0   : > { %v3452_v14 = vmul.f32 1.442695, %v3451_v6 }
 0xde2   : > { %8239 = vpow2.f32 %v3452_v14 }
 0xdec   : > { %v8240_v22 = vpop.eup %8239 }
 0xded   : > { %v3454_v24 = vsel %vm1463_vm4, %v8240_v22, 0.0 }
 0xdee   : > { %3455 = vadd.xlane.f32.xlu1 %v3454_v24  ;;  %v9524_v24 = vld [vmem:[%s10179_s3 + $0x10] sm:$0xff] }
 0xe0a   : > { %v3266_v4 = vpop.f32.mrb[74].mxu0 }
 0xe0b   : > { %v7562_v32 = vpop.f32.mrb[75].mxu0 }
 0xe0c   : > { %v9538_v32 = vld [vmem:[%s10179_s3 + $0x20] sm:$0xff] }
 0xe0e   : > { %v3339_v34 = vpop.f32.mrb[76].mxu0 }
 0xe0f   : > { %v9400_v38 = vadd.f32 %v3339_v34, %v3266_v4  ;;  %v7567_v45 = vpop.f32.mrb[77].mxu0  ;;  %v9531_v4 = vld [vmem:[%s10179_s3 + $0x18] sm:$0xff]  ;;  %v9545_v34 = vld [vmem:[%s10179_s3 + $0x28] sm:$0xff] }
 0xe10   : > { %v6628_v45 = vld [vmem:[%s10180_s4 + $0x10] sm:$0xff] }
 0xe11   : > { %10287 = vst [vmem:[#allocation8_spill] sm:$0xff] %v9400_v38 }
 0xe7b   : > { %v3456_v46 = vpop.xlane.xlu1 %3455 }
 0xe7c   : > { %8241 = vrcp.f32 %v3456_v46  ;;  %v8273_v46 = vld [vmem:[%s8467_s19] sm:$0xff] }
 0xe86   : > { %v8242_v27 = vpop.eup %8241 }
 0xe87   : > { %v3458_v8 = vmul.f32 %v8242_v27, %v8240_v22  ;;  %v8274_v27 = vld [vmem:[%s8467_s19 + $0x8] sm:$0xff] }
 0xe89   : > { %7596 = vmatmul.mubr.msk.f32.vlgmr.msra.gmra.mrb[78].mxu0 %vm1463_vm4, %v3458_v8  ;;  %v8275_v8 = vld [vmem:[%s8467_s19 + $0x10] sm:$0xff] }
 0xe8a   : > { %7599 = vmatpush3.msra.mxu0 %v9368_v41  ;;  %7600 = vmatprep.mubr.msk.f32.mxu0 %vm8310_vm0, %v10254_v18 }
 0xe8b   : > { %7603 = vmatprep.subr.mxu0 %v10254_v18 }
 0xf5c   : > { %v3528_v40 = vpop.f32.mrb[78].mxu0 }
 0xf5d   : > { %v7597_v3 = vpop.f32.mrb[79].mxu0  ;;  %7601 = vmatmul.mubr.msk.f32.vlgmr.msra.gmra.mrb[80].mxu0 %vm381_vm2, %v3528_v40  ;;  %v8276_v40 = vld [vmem:[%s8467_s19 + $0x18] sm:$0xff] }
 0xf5e   : > { %7604 = vmatpush3.msra.mxu0 %v9375_v16  ;;  %7605 = vmatprep.mubr.msk.f32.mxu0 %vm8310_vm0, %v10254_v18  ;;  %v9561_v3 = vld [vmem:[%s8440_s11] sm:$0xff] }
 0xf5f   : > { %8075 = vmatprep.subr.bf16.mxu0 %v10253_v2 }
 0xf61   : > { %7606 = vmatmul.mubr.msk.f32.vlgmr.msra.gmra.mrb[82].mxu0 %vm381_vm2, %v10288_v36  ;;  %v6630_v36 = vld [vmem:[%s10180_s4 + $0x40] sm:$0xff] }
 0xf62   : > { %7620 = vmatprep.mubr.msk.f32.mxu0 %vm8310_vm0, %v10254_v18 }
 0xf65   : > { %8078 = vmatpush3.bf16.xpose.msk.msra.mxu0 %vm8703_vm3, %v8076_v17 }
 0xf66   : > { %8079 = vmatprep.subr.bf16.mxu0 %v10253_v2 }
 0xf6d   : > { %8082 = vmatpush3.bf16.xpose.msk.msra.mxu0 %vm8703_vm3, %v8080_v51 }
 0xf6e   : > { %8083 = vmatprep.subr.bf16.mxu0 %v10253_v2 }
 0xf75   : > { %8086 = vmatpush3.bf16.xpose.msk.msra.mxu0 %vm8703_vm3, %v8084_v56 }
 0xf76   : > { %8108 = vmatprep.subr.bf16.mxu0 %v10253_v2 }
 0xf7c   : > { %7621 = vmatmul.mubr.msk.f32.vlgmr.msra.gmra.mrb[84].mxu0 %vm381_vm2, %v3679_v43  ;;  %v9569_v43 = vld [vmem:[%s8440_s11 + $0x8] sm:$0xff] }
 0xf7d   : > { %8110 = vmatpush3.bf16.msra.mxu0 %v8109_v30  ;;  %7675 = vmatprep.mubr.msk.f32.mxu0 %vm8310_vm0, %v10254_v18 }
 0xf7e   : > { %8111 = vmatprep.subr.bf16.mxu0 %v10253_v2 }
 0xf81   : > { %8113 = vmatpush3.bf16.msra.mxu0 %v8112_v1 }
 0xf82   : > { %8114 = vmatprep.subr.bf16.mxu0 %v10253_v2 }
 0xf85   : > { %8116 = vmatpush3.bf16.msra.mxu0 %v8115_v29 }
 0xf86   : > { %7678 = vmatprep.subr.mxu0 %v10254_v18 }
0x1030   : > { %v3601_v19 = vpop.f32.mrb[80].mxu0 }
0x1031   : > { %v7602_v17 = vpop.f32.mrb[81].mxu0 }
0x1032   : > { %v9580_v17 = vld [vmem:[%s8440_s11 + $0x18] sm:$0xff] }
0x1034   : > { %v3674_v55 = vpop.f32.mrb[82].mxu0 }
0x1035   : > { %v9450_v10 = vadd.f32 %v3674_v55, %v3601_v19  ;;  %v7607_v51 = vpop.f32.mrb[83].mxu0  ;;  %v9575_v19 = vld [vmem:[%s8440_s11 + $0x10] sm:$0xff]  ;;  %v9585_v55 = vld [vmem:[%s8440_s11 + $0x20] sm:$0xff] }
0x1036   : > { %v9590_v51 = vld [vmem:[%s8440_s11 + $0x28] sm:$0xff] }
0x1037   : > { %10289 = vst [vmem:[#allocation9_spill] sm:$0xff] %v9450_v10 }
0x104f   : > { %v3779_v63 = vpop.f32.mrb[84].mxu0 }
0x1050   : > { %v7622_v58 = vpop.f32.mrb[85].mxu0  ;;  %v3783_v56 = vsel %vm1463_vm4, %v3779_v63, -inf }
0x1051   : > { %3784 = vmax.xlane.f32.xlu0 %v3783_v56  ;;  %v9600_v58 = vld [vmem:[%s8440_s11 + $0x38] sm:$0xff]  ;;  %v9605_v56 = vld [vmem:[%s8440_s11 + $0x40] sm:$0xff] }
0x10de   : > { %v3785_v31 = vpop.xlane.xlu0 %3784 }
0x10df   : > { %v3786_v23 = vsub.f32 %v3779_v63, %v3785_v31  ;;  %v9595_v63 = vld [vmem:[%s8440_s11 + $0x30] sm:$0xff]  ;;  %v9610_v31 = vld [vmem:[%s8440_s11 + $0x48] sm:$0xff] }
0x10e1   : > { %v3787_v33 = vmul.f32 1.442695, %v3786_v23  ;;  %v9615_v23 = vld [vmem:[%s8440_s11 + $0x50] sm:$0xff] }
0x10e3   : > { %8243 = vpow2.f32 %v3787_v33  ;;  %v9620_v33 = vld [vmem:[%s8440_s11 + $0x58] sm:$0xff] }
0x10ed   : > { %v8244_v30 = vpop.eup %8243 }
0x10ee   : > { %v3789_v49 = vsel %vm1463_vm4, %v8244_v30, 0.0 }
0x10ef   : > { %3790 = vadd.xlane.f32.xlu1 %v3789_v49  ;;  %v9630_v49 = vld [vmem:[%s8440_s11 + $0x68] sm:$0xff] }
0x117c   : > { %v3791_v26 = vpop.xlane.xlu1 %3790 }
0x117d   : > { %8245 = vrcp.f32 %v3791_v26  ;;  %v9635_v26 = vld [vmem:[%s8440_s11 + $0x70] sm:$0xff] }
0x1187   : > { %v8246_v1 = vpop.eup %8245 }
0x1188   : > { %v3793_v11 = vmul.f32 %v8246_v1, %v8244_v30  ;;  %v9625_v30 = vld [vmem:[%s8440_s11 + $0x60] sm:$0xff]  ;;  %v9640_v1 = vld [vmem:[%s8440_s11 + $0x78] sm:$0xff] }
0x118a   : > { %7636 = vmatmul.mubr.msk.f32.vlgmr.msra.gmra.mrb[88].mxu1 %vm1463_vm4, %v3793_v11  ;;  %v9645_v11 = vld [vmem:[%s8440_s11 + $0x80] sm:$0xff] }
0x118b   : > { %7639 = vmatpush3.msra.mxu1 %v9368_v41  ;;  %7640 = vmatprep.mubr.msk.f32.mxu1 %vm8310_vm0, %v10254_v18 }
0x118c   : > { %7643 = vmatprep.subr.mxu1 %v10254_v18 }
0x125d   : > { %v3863_v39 = vpop.f32.mrb[88].mxu1 }
0x125e   : > { %v7637_v29 = vpop.f32.mrb[89].mxu1  ;;  %7641 = vmatmul.mubr.msk.f32.vlgmr.msra.gmra.mrb[90].mxu1 %vm381_vm2, %v3863_v39  ;;  %v9650_v39 = vld [vmem:[%s8440_s11 + $0x88] sm:$0xff] }
0x125f   : > { %7644 = vmatpush3.msra.mxu1 %v9375_v16  ;;  %7645 = vmatprep.mubr.msk.f32.mxu1 %vm8310_vm0, %v10254_v18  ;;  %v9655_v29 = vld [vmem:[%s8440_s11 + $0x90] sm:$0xff] }
0x1260   : > { %8096 = vmatprep.subr.bf16.mxu1 %v10253_v2 }
0x1262   : > { %7646 = vmatmul.mubr.msk.f32.vlgmr.msra.gmra.mrb[92].mxu1 %vm381_vm2, %v10290_v15  ;;  %v9660_v15 = vld [vmem:[%s8440_s11 + $0x98] sm:$0xff] }
0x1263   : > { %7660 = vmatprep.mubr.msk.f32.mxu1 %vm8310_vm0, %v10254_v18 }
0x1266   : > { %8099 = vmatpush3.bf16.xpose.msk.msra.mxu1 %vm8703_vm3, %v8097_v5 }
0x1267   : > { %8100 = vmatprep.subr.bf16.mxu1 %v10253_v2 }
0x126e   : > { %8103 = vmatpush3.bf16.xpose.msk.msra.mxu1 %vm8703_vm3, %v10291_v7  ;;  %v9665_v7 = vld [vmem:[%s8440_s11 + $0xa0] sm:$0xff] }
0x126f   : > { %8104 = vmatprep.subr.bf16.mxu1 %v10253_v2 }
0x1276   : > { %8107 = vmatpush3.bf16.xpose.msk.msra.mxu1 %vm8703_vm3, %v10292_v53  ;;  %v9670_v53 = vld [vmem:[%s8440_s11 + $0xa8] sm:$0xff] }
0x1277   : > { %7693 = vmatprep.subr.mxu1 %v10254_v18 }
0x127d   : > { %7661 = vmatmul.mubr.msk.f32.vlgmr.msra.gmra.mrb[94].mxu1 %vm381_vm2, %v4014_v44  ;;  %v9675_v44 = vld [vmem:[%s8440_s11 + $0xb0] sm:$0xff] }
0x127e   : > { %7695 = vmatprep.mubr.msk.f32.mxu1 %vm8310_vm0, %v10254_v18  ;;  %7694 = vmatpush3.msra.mxu1 %v6632_v21 }
0x1281   : > { %7696 = vmatmul.mubr.msk.f32.vlgmr.msra.gmra.mrb[96].mxu1 %vm381_vm2, %v10294_v60 }
0x1282   : > { %7705 = vmatprep.mubr.msk.f32.mxu1 %vm381_vm2, %v9502_v35 }
0x1331   : > { %v3936_v37 = vpop.f32.mrb[90].mxu1 }
0x1332   : > { %v7642_v5 = vpop.f32.mrb[91].mxu1 }
0x1335   : > { %v4009_v59 = vpop.f32.mrb[92].mxu1 }
0x1336   : > { %v9490_v54 = vadd.f32 %v4009_v59, %v3936_v37  ;;  %v7647_v57 = vpop.f32.mrb[93].mxu1  ;;  %v9680_v37 = vld [vmem:[%s8440_s11 + $0xb8] sm:$0xff] }
0x1337   : > { %v6631_v57 = vld [vmem:[%s10180_s4 + $0x58] sm:$0xff] }
0x1338   : > { %10293 = vst [vmem:[#allocation10_spill] sm:$0xff] %v9490_v54 }
0x1350   : > { %v4114_v48 = vpop.f32.mrb[94].mxu1 }
0x1351   : > { %v7662_v0 = vpop.f32.mrb[95].mxu1  ;;  %v4118_v12 = vsel %vm1463_vm4, %v4114_v48, -inf }
0x1352   : > { %4119 = vmax.xlane.f32.xlu0 %v4118_v12 }
0x1354   : > { %v4514_v6 = vpop.f32.mrb[96].mxu1 }
0x1355   : > { %v4515_v14 = vadd.f32 %v6639_v52, %v4514_v6  ;;  %v7697_v22 = vpop.f32.mrb[97].mxu1 }
0x1357   : > { %7703 = vmatprep.subr.mxu1 %v4515_v14 }
0x1358   : > { %7704 = vmatpush3.msra.mxu1 %v4515_v14 }
0x1359   : > { %7725 = vmatprep.subr.mxu1 %v6628_v45 }
0x13df   : > { %v4120_v9 = vpop.xlane.xlu0 %4119 }
0x13e0   : > { %v4121_v13 = vsub.f32 %v4114_v48, %v4120_v9 }
0x13e2   : > { %v4122_v62 = vmul.f32 1.442695, %v4121_v13 }
0x13e4   : > { %8247 = vpow2.f32 %v4122_v62 }
0x13ee   : > { %v8248_v28 = vpop.eup %8247 }
0x13ef   : > { %v4124_v42 = vsel %vm1463_vm4, %v8248_v28, 0.0 }
0x13f0   : > { %4125 = vadd.xlane.f32.xlu1 %v4124_v42 }
0x147d   : > { %v4126_v47 = vpop.xlane.xlu1 %4125 }
0x147e   : > { %8249 = vrcp.f32 %v4126_v47 }
0x1488   : > { %v8250_v50 = vpop.eup %8249 }
0x1489   : > { %v4128_v61 = vmul.f32 %v8250_v50, %v8248_v28 }
0x148b   : > { %7676 = vmatmul.mubr.msk.f32.vlgmr.msra.gmra.mrb[86].mxu0 %vm1463_vm4, %v4128_v61 }
0x148c   : > { %7679 = vmatpush3.msra.mxu0 %v9368_v41  ;;  %7680 = vmatprep.mubr.msk.f32.mxu0 %vm8310_vm0, %v10254_v18  ;;  %v9517_v41 = vld [vmem:[%s10179_s3 + $0x8] sm:$0xff] }
0x148d   : > { %7683 = vmatprep.subr.mxu0 %v10254_v18  ;;  %7706 = vmatmul.mubr.msk.f32.vlgmr.msra.gmra.mrb[98].mxu1 %vm381_vm2, %v9517_v41 }
0x148e   : > { %7708 = vmatprep.mubr.msk.f32.mxu1 %vm381_vm2, %v9524_v24  ;;  %7726 = vmatpush3.msra.mxu1 %v6628_v45 }
0x148f   : > { %7771 = vmatprep.subr.mxu1 %v6630_v36 }
0x1491   : > { %7709 = vmatmul.mubr.msk.f32.gmra.mrb[100].mxu1 %vm381_vm2, %v9531_v4 }
0x1492   : > { %7711 = vmatprep.mubr.msk.f32.mxu1 %vm381_vm2, %v9538_v32 }
0x1495   : > { %7712 = vmatmul.mubr.msk.f32.gmra.mrb[102].mxu1 %vm381_vm2, %v9545_v34 }
0x1496   : > { %7727 = vmatprep.mubr.msk.f32.mxu1 %vm381_vm2, %v8273_v46 }
0x1499   : > { %7728 = vmatmul.mubr.msk.f32.vlgmr.msra.gmra.mrb[104].mxu1 %vm381_vm2, %v8274_v27 }
0x149a   : > { %7730 = vmatprep.mubr.msk.f32.mxu1 %vm381_vm2, %v8275_v8  ;;  %7772 = vmatpush3.msra.mxu1 %v6630_v36 }
0x149b   : > { %8129 = vmatprep.subr.bf16.mxu1 %v10253_v2 }
0x149d   : > { %7731 = vmatmul.mubr.msk.f32.gmra.mrb[106].mxu1 %vm381_vm2, %v8276_v40 }
0x149e   : > { %7773 = vmatprep.mubr.msk.f32.mxu1 %vm381_vm2, %v9561_v3 }
0x14a1   : > { %7774 = vmatmul.mubr.msk.f32.vlgmr.msra.gmra.mrb[108].mxu1 %vm381_vm2, %v9569_v43 }
0x14a2   : > { %7776 = vmatprep.mubr.msk.f32.mxu1 %vm381_vm2, %v9575_v19 }
0x14a5   : > { %7777 = vmatmul.mubr.msk.f32.gmra.mrb[110].mxu1 %vm381_vm2, %v9580_v17 }
0x14a6   : > { %7779 = vmatprep.mubr.msk.f32.mxu1 %vm381_vm2, %v9585_v55 }
0x14a9   : > { %7780 = vmatmul.mubr.msk.f32.gmra.mrb[112].mxu1 %vm381_vm2, %v9590_v51 }
0x14aa   : > { %7782 = vmatprep.mubr.msk.f32.mxu1 %vm381_vm2, %v9595_v63 }
0x14ad   : > { %7783 = vmatmul.mubr.msk.f32.gmra.mrb[114].mxu1 %vm381_vm2, %v9600_v58 }
0x14ae   : > { %7785 = vmatprep.mubr.msk.f32.mxu1 %vm381_vm2, %v9605_v56 }
0x14b1   : > { %7786 = vmatmul.mubr.msk.f32.gmra.mrb[116].mxu1 %vm381_vm2, %v9610_v31 }
0x14b2   : > { %7788 = vmatprep.mubr.msk.f32.mxu1 %vm381_vm2, %v9615_v23 }
0x14b5   : > { %7789 = vmatmul.mubr.msk.f32.gmra.mrb[118].mxu1 %vm381_vm2, %v9620_v33 }
0x14b6   : > { %7791 = vmatprep.mubr.msk.f32.mxu1 %vm381_vm2, %v9625_v30 }
0x14b9   : > { %7792 = vmatmul.mubr.msk.f32.gmra.mrb[120].mxu1 %vm381_vm2, %v9630_v49 }
0x14ba   : > { %7794 = vmatprep.mubr.msk.f32.mxu1 %vm381_vm2, %v9635_v26 }
0x14bd   : > { %7795 = vmatmul.mubr.msk.f32.gmra.mrb[122].mxu1 %vm381_vm2, %v9640_v1 }
0x14be   : > { %7797 = vmatprep.mubr.msk.f32.mxu1 %vm381_vm2, %v9645_v11 }
0x14c1   : > { %7798 = vmatmul.mubr.msk.f32.gmra.mrb[124].mxu1 %vm381_vm2, %v9650_v39 }
0x14c2   : > { %7800 = vmatprep.mubr.msk.f32.mxu1 %vm381_vm2, %v9655_v29 }
0x14c5   : > { %7801 = vmatmul.mubr.msk.f32.gmra.mrb[126].mxu1 %vm381_vm2, %v9660_v15 }
0x14c6   : > { %7803 = vmatprep.mubr.msk.f32.mxu1 %vm381_vm2, %v9665_v7 }
0x14c9   : > { %7804 = vmatmul.mubr.msk.f32.gmra.mrb[128].mxu1 %vm381_vm2, %v9670_v53 }
0x14ca   : > { %7806 = vmatprep.mubr.msk.f32.mxu1 %vm381_vm2, %v9675_v44 }
0x14cd   : > { %7807 = vmatmul.mubr.msk.f32.gmra.mrb[130].mxu1 %vm381_vm2, %v9680_v37 }
0x14ce   : > { %7836 = vmatprep.mubr.msk.f32.mxu1 %vm8310_vm0, %v10254_v18 }
0x155e   : > { %v4198_v5 = vpop.f32.mrb[86].mxu0 }
0x155f   : > { %v7677_v59 = vpop.f32.mrb[87].mxu0  ;;  %7681 = vmatmul.mubr.msk.f32.vlgmr.msra.gmra.mrb[88].mxu0 %vm381_vm2, %v4198_v5 }
0x1560   : > { %7684 = vmatpush3.msra.mxu0 %v9375_v16  ;;  %7685 = vmatprep.mubr.msk.f32.mxu0 %vm8310_vm0, %v10254_v18  ;;  %v6633_v16 = vld [vmem:[%s10180_s4 + $0x88] sm:$0xff] }
0x1561   : > { %7688 = vmatprep.subr.mxu0 %v10254_v18 }
0x1563   : > { %7686 = vmatmul.mubr.msk.f32.vlgmr.msra.gmra.mrb[90].mxu0 %vm381_vm2, %v9096_v25  ;;  %v9710_v25 = vpop.f32.mrb[98].mxu1 }
0x1564   : > { %7689 = vmatpush3.msra.mxu0 %v6631_v57  ;;  %7690 = vmatprep.mubr.msk.f32.mxu0 %vm8310_vm0, %v10254_v18  ;;  %10295 = vst [vmem:[#allocation11_spill] sm:$0xff] %v9710_v25  ;;  %v9712_v48 = vpop.f32.mrb[99].mxu1 }
0x1565   : > { %7698 = vmatprep.subr.mxu0 %v10254_v18  ;;  %10296 = vst [vmem:[#allocation12_spill] sm:$0xff] %v9712_v48  ;;  %v9714_v0 = vpop.f32.mrb[100].mxu1  ;;  %v6642_v48 = vld [vmem:[%s10181_s5 + $0x8] ss:$0 sm:$0xff] }
0x1566   : > { %10297 = vst [vmem:[#allocation13_spill] sm:$0xff] %v9714_v0  ;;  %v9716_v12 = vpop.f32.mrb[101].mxu1 }
0x1567   : > { %7691 = vmatmul.mubr.msk.f32.vlgmr.msra.gmra.mrb[92].mxu0 %vm381_vm2, %v10294_v60  ;;  %10298 = vst [vmem:[#allocation14_spill] sm:$0xff] %v9716_v12 }
0x1568   : > { %7699 = vmatpush3.msra.mxu0 %v6633_v16  ;;  %7700 = vmatprep.mubr.msk.f32.mxu0 %vm8310_vm0, %v10254_v18  ;;  %v9718_v9 = vpop.f32.mrb[102].mxu1 }
0x1569   : > { %10299 = vst [vmem:[#allocation15_spill] sm:$0xff] %v9718_v9  ;;  %v9720_v13 = vpop.f32.mrb[103].mxu1  ;;  %v6636_v9 = vld [vmem:[%s10181_s5 + $0x2] ss:$0 sm:$0xff] }
0x156a   : > { %10300 = vst [vmem:[#allocation16_spill] sm:$0xff] %v9720_v13 }
0x156b   : > { %7701 = vmatmul.mubr.msk.f32.vlgmr.msra.gmra.mrb[94].mxu0 %vm381_vm2, %v10294_v60 }
0x156c   : > { %7716 = vmatprep.mubr.msk.f32.mxu0 %vm381_vm2, %v9502_v35  ;;  %v7729_v62 = vpop.f32.mrb[104].mxu1 }
0x156d   : > { %v4852_v28 = vpop.f32.mrb[105].mxu1 }
0x1570   : > { %v7732_v42 = vpop.f32.mrb[106].mxu1 }
0x1571   : > { %v4862_v21 = vpop.f32.mrb[107].mxu1 }
0x1574   : > { %v9722_v60 = vpop.f32.mrb[108].mxu1 }
0x1575   : > { %v9724_v47 = vpop.f32.mrb[109].mxu1 }
0x1578   : > { %v9726_v35 = vpop.f32.mrb[110].mxu1 }
0x1579   : > { %v9728_v50 = vpop.f32.mrb[111].mxu1 }
0x157c   : > { %v9730_v61 = vpop.f32.mrb[112].mxu1 }
0x157d   : > { %v9732_v52 = vpop.f32.mrb[113].mxu1 }
0x1580   : > { %v9734_v6 = vpop.f32.mrb[114].mxu1 }
0x1581   : > { %v9736_v14 = vpop.f32.mrb[115].mxu1 }
0x1584   : > { %v9738_v22 = vpop.f32.mrb[116].mxu1 }
0x1585   : > { %v9740_v45 = vpop.f32.mrb[117].mxu1 }
0x1588   : > { %v9742_v46 = vpop.f32.mrb[118].mxu1 }
0x1589   : > { %v9744_v27 = vpop.f32.mrb[119].mxu1 }
0x158c   : > { %v9746_v8 = vpop.f32.mrb[120].mxu1 }
0x158d   : > { %v9748_v40 = vpop.f32.mrb[121].mxu1 }
0x1590   : > { %v9750_v36 = vpop.f32.mrb[122].mxu1 }
0x1591   : > { %v9752_v5 = vpop.f32.mrb[123].mxu1 }
0x1594   : > { %v9754_v59 = vpop.f32.mrb[124].mxu1 }
0x1595   : > { %v9756_v57 = vpop.f32.mrb[125].mxu1 }
0x1596   : > { %10301 = vst [vmem:[#allocation17_spill] sm:$0xff] %v9756_v57 }
0x1632   : > { %v4271_v16 = vpop.f32.mrb[88].mxu0 }
0x1633   : > { %v7682_v54 = vpop.f32.mrb[89].mxu0 }
0x1636   : > { %v4344_v10 = vpop.f32.mrb[90].mxu0 }
0x1637   : > { %v9758_v38 = vadd.f32 %v4344_v10, %v4271_v16  ;;  %v7687_v13 = vpop.f32.mrb[91].mxu0 }
0x1639   : > { %10302 = vst [vmem:[#allocation18_spill] sm:$0xff] %v9758_v38 }
0x163a   : > { %v4436_v12 = vpop.f32.mrb[92].mxu0 }
0x163b   : > { %v4437_v20 = vadd.f32 %v6636_v9, %v4436_v12  ;;  %v7692_v0 = vpop.f32.mrb[93].mxu0  ;;  %v6629_v12 = vld [vmem:[%s10180_s4 + $0x28] sm:$0xff] }
0x163d   : > { %v9766_v25 = vadd.f32 %v7729_v62, %v4437_v20  ;;  %v9768_v57 = vadd.f32 %v4852_v28, %v4437_v20  ;;  %v9770_v54 = vadd.f32 %v7732_v42, %v4437_v20  ;;  %v9772_v10 = vadd.f32 %v4862_v21, %v4437_v20  ;;  %v7802_v20 = vpop.f32.mrb[126].mxu1 }
0x163e   : > { %v4592_v13 = vpop.f32.mrb[94].mxu0 }
0x163f   : > { %v4593_v16 = vadd.f32 %v6642_v48, %v4592_v13  ;;  %v7702_v38 = vpop.f32.mrb[95].mxu0 }
0x1640   : > { %v5212_v38 = vpop.f32.mrb[127].mxu1 }
0x1641   : > { %7714 = vmatprep.subr.mxu0 %v4593_v16 }
0x1642   : > { %7715 = vmatpush3.msra.mxu0 %v4593_v16 }
0x1643   : > { %7717 = vmatmul.mubr.msk.f32.vlgmr.msra.gmra.mrb[96].mxu0 %vm381_vm2, %v9517_v41  ;;  %7733 = vmatprep.subr.mxu0 %v6629_v12  ;;  %v7805_v41 = vpop.f32.mrb[128].mxu1 }
0x1644   : > { %7719 = vmatprep.mubr.msk.f32.mxu0 %vm381_vm2, %v9524_v24  ;;  %7734 = vmatpush3.msra.mxu0 %v6629_v12  ;;  %v5222_v24 = vpop.f32.mrb[129].mxu1  ;;  %v10306_v12 = vld [vmem:[#allocation13_spill] sm:$0xff] }
0x1645   : > { %8117 = vmatprep.subr.bf16.mxu0 %v10253_v2 }
0x1647   : > { %7720 = vmatmul.mubr.msk.f32.gmra.mrb[98].mxu0 %vm381_vm2, %v9531_v4  ;;  %v7808_v4 = vpop.f32.mrb[130].mxu1 }
0x1648   : > { %7722 = vmatprep.mubr.msk.f32.mxu0 %vm381_vm2, %v9538_v32  ;;  %v5232_v32 = vpop.f32.mrb[131].mxu1 }
0x164b   : > { %7723 = vmatmul.mubr.msk.f32.gmra.mrb[100].mxu0 %vm381_vm2, %v9545_v34 }
0x164c   : > { %7735 = vmatprep.mubr.msk.f32.mxu0 %vm381_vm2, %v9561_v3 }
0x164f   : > { %7736 = vmatmul.mubr.msk.f32.vlgmr.msra.gmra.mrb[102].mxu0 %vm381_vm2, %v9569_v43 }
0x1650   : > { %7738 = vmatprep.mubr.msk.f32.mxu0 %vm381_vm2, %v9575_v19 }
0x1653   : > { %7739 = vmatmul.mubr.msk.f32.gmra.mrb[104].mxu0 %vm381_vm2, %v9580_v17 }
0x1654   : > { %7741 = vmatprep.mubr.msk.f32.mxu0 %vm381_vm2, %v9585_v55 }
0x1657   : > { %7742 = vmatmul.mubr.msk.f32.gmra.mrb[106].mxu0 %vm381_vm2, %v9590_v51 }
0x1658   : > { %7744 = vmatprep.mubr.msk.f32.mxu0 %vm381_vm2, %v9595_v63 }
0x165b   : > { %7745 = vmatmul.mubr.msk.f32.gmra.mrb[108].mxu0 %vm381_vm2, %v9600_v58 }
0x165c   : > { %7747 = vmatprep.mubr.msk.f32.mxu0 %vm381_vm2, %v9605_v56 }
0x165f   : > { %7748 = vmatmul.mubr.msk.f32.gmra.mrb[110].mxu0 %vm381_vm2, %v9610_v31 }
0x1660   : > { %7750 = vmatprep.mubr.msk.f32.mxu0 %vm381_vm2, %v9615_v23 }
0x1663   : > { %7751 = vmatmul.mubr.msk.f32.gmra.mrb[112].mxu0 %vm381_vm2, %v9620_v33 }
0x1664   : > { %7753 = vmatprep.mubr.msk.f32.mxu0 %vm381_vm2, %v9625_v30 }
0x1667   : > { %7754 = vmatmul.mubr.msk.f32.gmra.mrb[114].mxu0 %vm381_vm2, %v9630_v49 }
0x1668   : > { %7756 = vmatprep.mubr.msk.f32.mxu0 %vm381_vm2, %v9635_v26 }
0x166b   : > { %7757 = vmatmul.mubr.msk.f32.gmra.mrb[116].mxu0 %vm381_vm2, %v9640_v1 }
0x166c   : > { %7759 = vmatprep.mubr.msk.f32.mxu0 %vm381_vm2, %v9645_v11 }
0x166f   : > { %7760 = vmatmul.mubr.msk.f32.gmra.mrb[118].mxu0 %vm381_vm2, %v9650_v39 }
0x1670   : > { %7762 = vmatprep.mubr.msk.f32.mxu0 %vm381_vm2, %v9655_v29 }
0x1673   : > { %7763 = vmatmul.mubr.msk.f32.gmra.mrb[120].mxu0 %vm381_vm2, %v9660_v15 }
0x1674   : > { %7765 = vmatprep.mubr.msk.f32.mxu0 %vm381_vm2, %v9665_v7 }
0x1677   : > { %7766 = vmatmul.mubr.msk.f32.gmra.mrb[122].mxu0 %vm381_vm2, %v9670_v53 }
0x1678   : > { %7768 = vmatprep.mubr.msk.f32.mxu0 %vm381_vm2, %v9675_v44 }
0x167b   : > { %7769 = vmatmul.mubr.msk.f32.gmra.mrb[124].mxu0 %vm381_vm2, %v9680_v37 }
0x167c   : > { %7821 = vmatprep.mubr.msk.f32.mxu0 %vm8310_vm0, %v10254_v18 }
0x1716   : > { %v7718_v34 = vpop.f32.mrb[96].mxu0 }
0x1717   : > { %v5250_v3 = vadd.f32 %v9722_v60, %v7718_v34  ;;  %v9840_v43 = vadd.f32 %v9734_v6, %v7718_v34  ;;  %v9843_v19 = vadd.f32 %v9746_v8, %v7718_v34  ;;  %v9845_v17 = vadd.f32 %v7802_v20, %v7718_v34  ;;  %v4757_v55 = vpop.f32.mrb[97].mxu0  ;;  %v10303_v6 = vld [vmem:[#allocation17_spill] sm:$0xff] }
0x1718   : > { %v5249_v51 = vadd.f32 %v9724_v47, %v4757_v55  ;;  %v9849_v63 = vadd.f32 %v9736_v14, %v4757_v55  ;;  %v9852_v58 = vadd.f32 %v9748_v40, %v4757_v55  ;;  %v9854_v56 = vadd.f32 %v5212_v38, %v4757_v55 }
0x171a   : > { %v7721_v23 = vpop.f32.mrb[98].mxu0  ;;  %v8130_v33 = vpack.c.bf16 %v5250_v3, %v5249_v51  ;;  %v8151_v30 = vpack.c.bf16 %v9840_v43, %v9849_v63  ;;  %v8172_v49 = vpack.c.bf16 %v9843_v19, %v9852_v58  ;;  %v10309_v3 = vld [vmem:[#allocation15_spill] sm:$0xff]  ;;  %v5505_v63 = vmul.f32 0.35355338, %v9766_v25  ;;  %v10068_v19 = vld [vmem:[%s10182_s6] ss:$0 sm:$0xff] }
0x171b   : > { %v5252_v26 = vadd.f32 %v9726_v35, %v7721_v23  ;;  %v9864_v1 = vadd.f32 %v9738_v22, %v7721_v23  ;;  %v9867_v11 = vadd.f32 %v9750_v36, %v7721_v23  ;;  %v9869_v39 = vadd.f32 %v7805_v41, %v7721_v23  ;;  %v4767_v29 = vpop.f32.mrb[99].mxu0  ;;  %v10310_v23 = vld [vmem:[#allocation16_spill] sm:$0xff] }
0x171c   : > { %v5251_v15 = vadd.f32 %v9728_v50, %v4767_v29  ;;  %v9873_v7 = vadd.f32 %v9740_v45, %v4767_v29  ;;  %v9876_v53 = vadd.f32 %v9752_v5, %v4767_v29  ;;  %v9878_v44 = vadd.f32 %v5222_v24, %v4767_v29  ;;  %8131 = vmatpush3.bf16.msra.mxu1 %v8130_v33  ;;  %v10305_v5 = vld [vmem:[#allocation12_spill] sm:$0xff]  ;;  %v10308_v24 = vld [vmem:[#allocation14_spill] sm:$0xff] }
0x171d   : > { %8132 = vmatprep.subr.bf16.mxu1 %v10253_v2  ;;  %v10311_v58 = vld [vmem:[#allocation8_spill] sm:$0xff] }
0x171e   : > { %v7724_v48 = vpop.f32.mrb[100].mxu0  ;;  %v8133_v0 = vpack.c.bf16 %v5252_v26, %v5251_v15  ;;  %v8154_v9 = vpack.c.bf16 %v9864_v1, %v9873_v7  ;;  %v8175_v62 = vpack.c.bf16 %v9867_v11, %v9876_v53 }
0x171f   : > { %v5254_v28 = vadd.f32 %v9730_v61, %v7724_v48  ;;  %v9889_v42 = vadd.f32 %v9742_v46, %v7724_v48  ;;  %v9892_v21 = vadd.f32 %v9754_v59, %v7724_v48  ;;  %v9894_v60 = vadd.f32 %v7808_v4, %v7724_v48  ;;  %v4777_v47 = vpop.f32.mrb[101].mxu0 }
0x1720   : > { %v5253_v35 = vadd.f32 %v9732_v52, %v4777_v47  ;;  %v9898_v50 = vadd.f32 %v9744_v27, %v4777_v47  ;;  %v9901_v14 = vadd.f32 %v10303_v6, %v4777_v47  ;;  %v9903_v22 = vadd.f32 %v5232_v32, %v4777_v47  ;;  %8134 = vmatpush3.bf16.msra.mxu1 %v8133_v0  ;;  %v10304_v27 = vld [vmem:[#allocation11_spill] sm:$0xff] }
0x1721   : > { %8135 = vmatprep.subr.bf16.mxu1 %v10253_v2 }
0x1722   : > { %v7737_v45 = vpop.f32.mrb[102].mxu0  ;;  %v8136_v46 = vpack.c.bf16 %v5254_v28, %v5253_v35  ;;  %v8157_v8 = vpack.c.bf16 %v9889_v42, %v9898_v50  ;;  %v8178_v52 = vpack.c.bf16 %v9892_v21, %v9901_v14 }
0x1723   : > { %v5244_v40 = vadd.f32 %v7737_v45, %v10304_v27  ;;  %v4937_v36 = vpop.f32.mrb[103].mxu0 }
0x1724   : > { %v5243_v59 = vadd.f32 %v4937_v36, %v10305_v5  ;;  %8137 = vmatpush3.bf16.msra.mxu1 %v8136_v46 }
0x1725   : > { %8150 = vmatprep.subr.bf16.mxu1 %v10253_v2 }
0x1726   : > { %v8118_v13 = vpack.c.bf16 %v5244_v40, %v5243_v59  ;;  %v7740_v16 = vpop.f32.mrb[104].mxu0 }
0x1727   : > { %v5246_v20 = vadd.f32 %v7740_v16, %v10306_v12  ;;  %v4947_v38 = vpop.f32.mrb[105].mxu0 }
0x1728   : > { %8120 = vmatpush3.bf16.xpose.msk.msra.mxu0 %vm8703_vm3, %v8118_v13  ;;  %v5245_v4 = vadd.f32 %v4947_v38, %v10308_v24 }
0x1729   : > { %8121 = vmatprep.subr.bf16.mxu0 %v10253_v2 }
0x172a   : > { %v8122_v32 = vpack.c.bf16 %v5246_v20, %v5245_v4  ;;  %v7743_v34 = vpop.f32.mrb[106].mxu0 }
0x172b   : > { %v5248_v55 = vadd.f32 %v7743_v34, %v10309_v3  ;;  %v4957_v51 = vpop.f32.mrb[107].mxu0  ;;  %v5242_v34 = vmul.f32 0.35355338, %v9768_v57 }
0x172c   : > { %v5247_v33 = vadd.f32 %v4957_v51, %v10310_v23 }
0x172e   : > { %v8126_v26 = vpack.c.bf16 %v5248_v55, %v5247_v33  ;;  %v7746_v29 = vpop.f32.mrb[108].mxu0 }
0x172f   : > { %v9923_v15 = vadd.f32 %v7746_v29, %v10304_v27  ;;  %v4967_v48 = vpop.f32.mrb[109].mxu0 }
0x1730   : > { %v9926_v0 = vadd.f32 %v4967_v48, %v10305_v5  ;;  %8124 = vmatpush3.bf16.xpose.msk.msra.mxu0 %vm8703_vm3, %v8122_v32 }
0x1731   : > { %8125 = vmatprep.subr.bf16.mxu0 %v10253_v2 }
0x1732   : > { %v8139_v28 = vpack.c.bf16 %v9923_v15, %v9926_v0  ;;  %v7749_v47 = vpop.f32.mrb[110].mxu0 }
0x1733   : > { %v9934_v35 = vadd.f32 %v7749_v47, %v10306_v12  ;;  %v4977_v6 = vpop.f32.mrb[111].mxu0 }
0x1734   : > { %v9937_v45 = vadd.f32 %v4977_v6, %v10308_v24 }
0x1736   : > { %v8143_v46 = vpack.c.bf16 %v9934_v35, %v9937_v45  ;;  %v7752_v40 = vpop.f32.mrb[112].mxu0  ;;  %v5768_v45 = vmul.f32 0.35355338, %v9772_v10  ;;  %v10316_v10 = vpack.c.bf16 %v9894_v60, %v9903_v22 }
0x1737   : > { %v9942_v36 = vadd.f32 %v7752_v40, %v10309_v3  ;;  %v4987_v59 = vpop.f32.mrb[113].mxu0 }
0x1738   : > { %8128 = vmatpush3.bf16.xpose.msk.msra.mxu0 %vm8703_vm3, %v8126_v26  ;;  %v9947_v13 = vadd.f32 %v4987_v59, %v10310_v23 }
0x1739   : > { %7839 = vmatprep.subr.mxu0 %v10254_v18 }
0x173a   : > { %v8147_v16 = vpack.c.bf16 %v9942_v36, %v9947_v13  ;;  %v7755_v20 = vpop.f32.mrb[114].mxu0  ;;  %v10315_v36 = vpack.c.bf16 %v9869_v39, %v9878_v44 }
0x173b   : > { %v9953_v38 = vadd.f32 %v7755_v20, %v10304_v27  ;;  %v4997_v4 = vpop.f32.mrb[115].mxu0 }
0x173c   : > { %v9956_v32 = vadd.f32 %v4997_v4, %v10305_v5 }
0x173e   : > { %v8160_v55 = vpack.c.bf16 %v9953_v38, %v9956_v32  ;;  %v7758_v51 = vpop.f32.mrb[116].mxu0 }
0x173f   : > { %v9962_v33 = vadd.f32 %v7758_v51, %v10306_v12  ;;  %v5007_v26 = vpop.f32.mrb[117].mxu0  ;;  %7822 = vmatmul.mubr.msk.f32.vlgmr.msra.gmra.mrb[126].mxu0 %vm381_vm2, %v5242_v34 }
0x1740   : > { %v9966_v29 = vadd.f32 %v5007_v26, %v10308_v24  ;;  %7841 = vmatprep.mubr.msk.f32.mxu0 %vm8310_vm0, %v10254_v18 }
0x1742   : > { %v7761_v57 = vpop.f32.mrb[118].mxu0 }
0x1743   : > { %v9973_v47 = vadd.f32 %v7761_v57, %v10309_v3  ;;  %v5017_v6 = vpop.f32.mrb[119].mxu0 }
0x1744   : > { %v9976_v40 = vadd.f32 %v5017_v6, %v10310_v23 }
0x1746   : > { %v7764_v20 = vpop.f32.mrb[120].mxu0  ;;  %v10313_v35 = vpack.c.bf16 %v9973_v47, %v9976_v40 }
0x1747   : > { %v9981_v4 = vadd.f32 %v7764_v20, %v10304_v27  ;;  %v5027_v34 = vpop.f32.mrb[121].mxu0 }
0x1748   : > { %v9984_v51 = vadd.f32 %v5027_v34, %v10305_v5 }
0x174a   : > { %v7767_v57 = vpop.f32.mrb[122].mxu0 }
0x174b   : > { %v9989_v61 = vadd.f32 %v7767_v57, %v10306_v12  ;;  %v5037_v6 = vpop.f32.mrb[123].mxu0 }
0x174c   : > { %v9992_v37 = vadd.f32 %v5037_v6, %v10308_v24 }
0x174e   : > { %v7770_v27 = vpop.f32.mrb[124].mxu0 }
0x174f   : > { %v9997_v20 = vadd.f32 %v7770_v27, %v10309_v3  ;;  %v5047_v5 = vpop.f32.mrb[125].mxu0 }
0x1750   : > { %v10000_v34 = vadd.f32 %v5047_v5, %v10310_v23  ;;  %v10009_v23 = vld [vmem:[%s10180_s4 + $0xa0] sm:$0xff] }
0x1751   : > { %7840 = vmatpush3.msra.mxu0 %v10009_v23 }
0x1752   : > { %v8189_v26 = vpack.c.bf16 %v9997_v20, %v10000_v34  ;;  %8138 = vmatprep.subr.bf16.mxu0 %v10253_v2 }
0x1812   : > { %v5342_v12 = vpop.f32.mrb[126].mxu0 }
0x1813   : > { %v7823_v57 = vpop.f32.mrb[127].mxu0  ;;  %v5346_v59 = vsel %vm1463_vm4, %v5342_v12, -inf }
0x1814   : > { %5347 = vmax.xlane.f32.xlu0 %v5346_v59 }
0x18a1   : > { %v5348_v24 = vpop.xlane.xlu0 %5347 }
0x18a2   : > { %v5349_v6 = vsub.f32 %v5342_v12, %v5348_v24  ;;  %v10318_v24 = vpack.c.bf16 %v9981_v4, %v9984_v51  ;;  %v6031_v4 = vmul.f32 0.35355338, %v9770_v54 }
0x18a4   : > { %v5350_v48 = vmul.f32 1.442695, %v5349_v6  ;;  %v10319_v6 = vpack.c.bf16 %v9989_v61, %v9992_v37 }
0x18a6   : > { %8251 = vpow2.f32 %v5350_v48 }
0x18b0   : > { %v8252_v31 = vpop.eup %8251 }
0x18b1   : > { %v5352_v3 = vsel %vm1463_vm4, %v8252_v31, 0.0 }
0x18b2   : > { %5353 = vadd.xlane.f32.xlu1 %v5352_v3  ;;  %v10320_v3 = vld [vmem:[#allocation10_spill] sm:$0xff] }
0x193f   : > { %v5354_v27 = vpop.xlane.xlu1 %5353 }
0x1940   : > { %8253 = vrcp.f32 %v5354_v27 }
0x194a   : > { %v8254_v59 = vpop.eup %8253 }
0x194b   : > { %v5356_v5 = vmul.f32 %v8254_v59, %v8252_v31 }
0x194d   : > { %7837 = vmatmul.mubr.msk.f32.vlgmr.msra.gmra.mrb[132].mxu1 %vm1463_vm4, %v5356_v5 }
0x194e   : > { %8152 = vmatpush3.bf16.msra.mxu1 %v8151_v30  ;;  %7871 = vmatprep.mubr.msk.f32.mxu1 %vm8310_vm0, %v10254_v18 }
0x194f   : > { %8153 = vmatprep.subr.bf16.mxu1 %v10253_v2 }
0x1952   : > { %8155 = vmatpush3.bf16.msra.mxu1 %v8154_v9 }
0x1953   : > { %8156 = vmatprep.subr.bf16.mxu1 %v10253_v2 }
0x1956   : > { %8158 = vmatpush3.bf16.msra.mxu1 %v8157_v8 }
0x1957   : > { %7874 = vmatprep.subr.mxu1 %v10254_v18 }
0x1a20   : > { %v5426_v31 = vpop.f32.mrb[132].mxu1 }
0x1a21   : > { %v7838_v43 = vpop.f32.mrb[133].mxu1  ;;  %7842 = vmatmul.mubr.msk.f32.vlgmr.msra.gmra.mrb[128].mxu0 %vm381_vm2, %v5426_v31 }
0x1a22   : > { %8141 = vmatpush3.bf16.xpose.msk.msra.mxu0 %vm8703_vm3, %v8139_v28  ;;  %7856 = vmatprep.mubr.msk.f32.mxu0 %vm8310_vm0, %v10254_v18  ;;  %v10312_v28 = vpack.c.bf16 %v9962_v33, %v9966_v29 }
0x1a23   : > { %8142 = vmatprep.subr.bf16.mxu0 %v10253_v2 }
0x1a2a   : > { %8145 = vmatpush3.bf16.xpose.msk.msra.mxu0 %vm8703_vm3, %v8143_v46  ;;  %v10314_v46 = vpack.c.bf16 %v9845_v17, %v9854_v56  ;;  %v10317_v17 = vld [vmem:[#allocation9_spill] sm:$0xff] }
0x1a2b   : > { %8146 = vmatprep.subr.bf16.mxu0 %v10253_v2 }
0x1a32   : > { %8149 = vmatpush3.bf16.xpose.msk.msra.mxu0 %vm8703_vm3, %v8147_v16 }
0x1a33   : > { %8171 = vmatprep.subr.bf16.mxu0 %v10253_v2 }
0x1a39   : > { %7857 = vmatmul.mubr.msk.f32.vlgmr.msra.gmra.mrb[130].mxu0 %vm381_vm2, %v5505_v63 }
0x1a3a   : > { %8173 = vmatpush3.bf16.msra.mxu0 %v8172_v49  ;;  %7906 = vmatprep.mubr.msk.f32.mxu0 %vm8310_vm0, %v10254_v18 }
0x1a3b   : > { %8174 = vmatprep.subr.bf16.mxu0 %v10253_v2 }
0x1a3e   : > { %8176 = vmatpush3.bf16.msra.mxu0 %v8175_v62 }
0x1a3f   : > { %8177 = vmatprep.subr.bf16.mxu0 %v10253_v2 }
0x1a42   : > { %8179 = vmatpush3.bf16.msra.mxu0 %v8178_v52 }
0x1a43   : > { %7909 = vmatprep.subr.mxu0 %v10254_v18 }
0x1af4   : > { %v5499_v25 = vpop.f32.mrb[128].mxu0 }
0x1af5   : > { %v5503_v30 = vadd.f32 %v5499_v25, %v10311_v58  ;;  %v7843_v49 = vpop.f32.mrb[129].mxu0 }
0x1af6   : > { %v10321_v49 = vld [vmem:[#allocation18_spill] sm:$0xff] }
0x1af7   : > { %v6300_v1 = vadd.f32 %v10068_v19, %v5503_v30 }
0x1af9   : > { %6301 = vst.msk [vmem:[%s10076_s28] sm:$0xff] %vm381_vm2, %v6300_v1 }
0x1b0c   : > { %v5605_v11 = vpop.f32.mrb[130].mxu0 }
0x1b0d   : > { %v7858_v7 = vpop.f32.mrb[131].mxu0  ;;  %v5609_v53 = vsel %vm1463_vm4, %v5605_v11, -inf }
0x1b0e   : > { %5610 = vmax.xlane.f32.xlu0 %v5609_v53 }
0x1b9b   : > { %v5611_v9 = vpop.xlane.xlu0 %5610 }
0x1b9c   : > { %v5612_v62 = vsub.f32 %v5605_v11, %v5611_v9 }
0x1b9e   : > { %v5613_v42 = vmul.f32 1.442695, %v5612_v62 }
0x1ba0   : > { %8255 = vpow2.f32 %v5613_v42 }
0x1baa   : > { %v8256_v21 = vpop.eup %8255 }
0x1bab   : > { %v5615_v50 = vsel %vm1463_vm4, %v8256_v21, 0.0 }
0x1bac   : > { %5616 = vadd.xlane.f32.xlu1 %v5615_v50 }
0x1c39   : > { %v5617_v14 = vpop.xlane.xlu1 %5616 }
0x1c3a   : > { %8257 = vrcp.f32 %v5617_v14 }
0x1c44   : > { %v8258_v8 = vpop.eup %8257 }
0x1c45   : > { %v5619_v52 = vmul.f32 %v8258_v8, %v8256_v21 }
0x1c47   : > { %7872 = vmatmul.mubr.msk.f32.vlgmr.msra.gmra.mrb[134].mxu1 %vm1463_vm4, %v5619_v52 }
0x1c48   : > { %7875 = vmatpush3.msra.mxu1 %v10009_v23  ;;  %7876 = vmatprep.mubr.msk.f32.mxu1 %vm8310_vm0, %v10254_v18 }
0x1c49   : > { %8159 = vmatprep.subr.bf16.mxu1 %v10253_v2 }
0x1d1a   : > { %v5689_v15 = vpop.f32.mrb[134].mxu1 }
0x1d1b   : > { %v7873_v0 = vpop.f32.mrb[135].mxu1  ;;  %7877 = vmatmul.mubr.msk.f32.vlgmr.msra.gmra.mrb[136].mxu1 %vm381_vm2, %v5689_v15 }
0x1d1c   : > { %8162 = vmatpush3.bf16.xpose.msk.msra.mxu1 %vm8703_vm3, %v8160_v55  ;;  %7891 = vmatprep.mubr.msk.f32.mxu1 %vm8310_vm0, %v10254_v18 }
0x1d1d   : > { %8163 = vmatprep.subr.bf16.mxu1 %v10253_v2 }
0x1d24   : > { %8166 = vmatpush3.bf16.xpose.msk.msra.mxu1 %vm8703_vm3, %v10312_v28 }
0x1d25   : > { %8167 = vmatprep.subr.bf16.mxu1 %v10253_v2 }
0x1d2c   : > { %8170 = vmatpush3.bf16.xpose.msk.msra.mxu1 %vm8703_vm3, %v10313_v35 }
0x1d2d   : > { %8192 = vmatprep.subr.bf16.mxu1 %v10253_v2 }
0x1d33   : > { %7892 = vmatmul.mubr.msk.f32.vlgmr.msra.gmra.mrb[138].mxu1 %vm381_vm2, %v5768_v45 }
0x1d34   : > { %8194 = vmatpush3.bf16.msra.mxu1 %v10314_v46  ;;  %7941 = vmatprep.mubr.msk.f32.mxu1 %vm8310_vm0, %v10254_v18 }
0x1d35   : > { %8195 = vmatprep.subr.bf16.mxu1 %v10253_v2 }
0x1d38   : > { %8197 = vmatpush3.bf16.msra.mxu1 %v10315_v36 }
0x1d39   : > { %8198 = vmatprep.subr.bf16.mxu1 %v10253_v2 }
0x1d3c   : > { %8200 = vmatpush3.bf16.msra.mxu1 %v10316_v10 }
0x1d3d   : > { %7944 = vmatprep.subr.mxu1 %v10254_v18 }
0x1dee   : > { %v5762_v13 = vpop.f32.mrb[136].mxu1 }
0x1def   : > { %v5766_v56 = vadd.f32 %v5762_v13, %v10317_v17  ;;  %v7878_v16 = vpop.f32.mrb[137].mxu1 }
0x1df1   : > { %v6302_v38 = vadd.f32 %v10068_v19, %v5766_v56 }
0x1df3   : > { %6303 = vst.msk [vmem:[%s10076_s28 + $0x8] sm:$0xff] %vm381_vm2, %v6302_v38 }
0x1e06   : > { %v5868_v32 = vpop.f32.mrb[138].mxu1 }
0x1e07   : > { %v7893_v55 = vpop.f32.mrb[139].mxu1  ;;  %v5872_v39 = vsel %vm1463_vm4, %v5868_v32, -inf }
0x1e08   : > { %5873 = vmax.xlane.f32.xlu0 %v5872_v39 }
0x1e95   : > { %v5874_v44 = vpop.xlane.xlu0 %5873 }
0x1e96   : > { %v5875_v33 = vsub.f32 %v5868_v32, %v5874_v44 }
0x1e98   : > { %v5876_v29 = vmul.f32 1.442695, %v5875_v33 }
0x1e9a   : > { %8259 = vpow2.f32 %v5876_v29 }
0x1ea4   : > { %v8260_v60 = vpop.eup %8259 }
0x1ea5   : > { %v5878_v22 = vsel %vm1463_vm4, %v8260_v60, 0.0 }
0x1ea6   : > { %5879 = vadd.xlane.f32.xlu1 %v5878_v22 }
0x1f33   : > { %v5880_v48 = vpop.xlane.xlu1 %5879 }
0x1f34   : > { %8261 = vrcp.f32 %v5880_v48 }
0x1f3e   : > { %v8262_v47 = vpop.eup %8261 }
0x1f3f   : > { %v5882_v40 = vmul.f32 %v8262_v47, %v8260_v60 }
0x1f41   : > { %7907 = vmatmul.mubr.msk.f32.vlgmr.msra.gmra.mrb[132].mxu0 %vm1463_vm4, %v5882_v40 }
0x1f42   : > { %7910 = vmatpush3.msra.mxu0 %v10009_v23  ;;  %7911 = vmatprep.mubr.msk.f32.mxu0 %vm8310_vm0, %v10254_v18 }
0x1f43   : > { %8180 = vmatprep.subr.bf16.mxu0 %v10253_v2 }
0x2014   : > { %v5952_v12 = vpop.f32.mrb[132].mxu0 }
0x2015   : > { %v7908_v57 = vpop.f32.mrb[133].mxu0  ;;  %7912 = vmatmul.mubr.msk.f32.vlgmr.msra.gmra.mrb[134].mxu0 %vm381_vm2, %v5952_v12 }
0x2016   : > { %8183 = vmatpush3.bf16.xpose.msk.msra.mxu0 %vm8703_vm3, %v10318_v24  ;;  %7926 = vmatprep.mubr.msk.f32.mxu0 %vm8310_vm0, %v10254_v18 }
0x2017   : > { %8184 = vmatprep.subr.bf16.mxu0 %v10253_v2 }
0x201e   : > { %8187 = vmatpush3.bf16.xpose.msk.msra.mxu0 %vm8703_vm3, %v10319_v6 }
0x201f   : > { %8188 = vmatprep.subr.bf16.mxu0 %v10253_v2 }
0x2026   : > { %8191 = vmatpush3.bf16.xpose.msk.msra.mxu0 %vm8703_vm3, %v8189_v26 }
0x202d   : > { %7927 = vmatmul.mubr.msk.f32.vlgmr.msra.gmra.mrb[136].mxu0 %vm381_vm2, %v6031_v4 }
0x20e8   : > { %v6025_v51 = vpop.f32.mrb[134].mxu0 }
0x20e9   : > { %v6029_v27 = vadd.f32 %v6025_v51, %v10320_v3  ;;  %v7913_v59 = vpop.f32.mrb[135].mxu0 }
0x20eb   : > { %v6304_v37 = vadd.f32 %v10068_v19, %v6029_v27 }
0x20ed   : > { %6305 = vst.msk [vmem:[%s10076_s28 + $0x10] sm:$0xff] %vm381_vm2, %v6304_v37 }
0x2100   : > { %v6131_v61 = vpop.f32.mrb[136].mxu0 }
0x2101   : > { %v7928_v2 = vpop.f32.mrb[137].mxu0  ;;  %v6135_v5 = vsel %vm1463_vm4, %v6131_v61, -inf }
0x2102   : > { %6136 = vmax.xlane.f32.xlu0 %v6135_v5 }
0x218f   : > { %v6137_v20 = vpop.xlane.xlu0 %6136 }
0x2190   : > { %v6138_v41 = vsub.f32 %v6131_v61, %v6137_v20 }
0x2192   : > { %v6139_v26 = vmul.f32 1.442695, %v6138_v41 }
0x2194   : > { %8263 = vpow2.f32 %v6139_v26 }
0x219e   : > { %v8264_v54 = vpop.eup %8263 }
0x219f   : > { %v6141_v34 = vsel %vm1463_vm4, %v8264_v54, 0.0 }
0x21a0   : > { %6142 = vadd.xlane.f32.xlu1 %v6141_v34 }
0x222d   : > { %v6143_v31 = vpop.xlane.xlu1 %6142 }
0x222e   : > { %8265 = vrcp.f32 %v6143_v31 }
0x2238   : > { %v8266_v43 = vpop.eup %8265 }
0x2239   : > { %v6145_v63 = vmul.f32 %v8266_v43, %v8264_v54 }
0x223b   : > { %7942 = vmatmul.mubr.msk.f32.vlgmr.msra.gmra.mrb[140].mxu1 %vm1463_vm4, %v6145_v63 }
0x223c   : > { %7945 = vmatpush3.msra.mxu1 %v10009_v23  ;;  %7946 = vmatprep.mubr.msk.f32.mxu1 %vm8310_vm0, %v10254_v18 }
0x230e   : > { %v6215_v25 = vpop.f32.mrb[140].mxu1 }
0x230f   : > { %v7943_v58 = vpop.f32.mrb[141].mxu1  ;;  %7947 = vmatmul.mubr.msk.f32.vlgmr.msra.gmra.mrb[142].mxu1 %vm381_vm2, %v6215_v25 }
0x23e2   : > { %v6288_v30 = vpop.f32.mrb[142].mxu1 }
0x23e3   : > { %v6292_v1 = vadd.f32 %v6288_v30, %v10321_v49  ;;  %v7948_v11 = vpop.f32.mrb[143].mxu1 }
0x23e5   : > { %v6306_v7 = vadd.f32 %v10068_v19, %v6292_v1 }
0x23e7   : > { %6307 = vst.msk [vmem:[%s10076_s28 + $0x18] sm:$0xff] %vm381_vm2, %v6306_v7 }
0x23e8 PF: > { %s17_s24 = sadd.s32 1, %s8307_s24  }
0x23e9   : > { %p14_p4 = scmp.ge.s32.totalorder %s17_s24, 4  }
0x23eb   :  { %16 = sbr.rel (!%p14_p4) target bundleno = 1 (0x1), region = 112 }

</bundles_post_ra>
